<compile_context>
chip_gen: v7x
topology: tpu7x:2x2x1
jax: 0.10.0
libtpu: 0.0.40
codegen_flags: <defaults>
</compile_context>

<pallas_src>
from functools import partial

import jax
import jax.numpy as jnp
from jax.experimental import pallas as pl
from jax.experimental.pallas import tpu as pltpu


def _round_up(n, m):
    return (n + m - 1) // m * m


# ----------------------------------------------------------------------------
# Probe once whether single-buffered grid-invariant BlockSpecs are supported.
# ----------------------------------------------------------------------------
def _probe_kernel(a_ref, o_ref):
    o_ref[...] = a_ref[...] + 1.0


def _probe_buffered_one():
    try:
        f = pl.pallas_call(
            _probe_kernel,
            out_shape=jax.ShapeDtypeStruct((8, 128), jnp.float32),
            grid_spec=pltpu.PrefetchScalarGridSpec(
                num_scalar_prefetch=0,
                grid=(1,),
                in_specs=[pl.BlockSpec((8, 128), lambda i: (0, 0),
                                       pipeline_mode=pl.Buffered(1))],
                out_specs=pl.BlockSpec((8, 128), lambda i: (0, 0)),
            ),
        )
        jax.block_until_ready(f(jnp.zeros((8, 128), jnp.float32)))
        return True
    except Exception:
        return False


_WEIGHTS_SINGLE_BUFFERED = _probe_buffered_one()


# ----------------------------------------------------------------------------
# Fused forward kernel: all layers as VMEM-resident dense matmuls (bf16 x bf16 -> f32).
# ----------------------------------------------------------------------------
def _dcec_fused_kernel(n_clusters,
                       x_ref, m1_ref, b1_ref, m2_ref, b2_ref,
                       wez_ref, bez_ref, mut2_ref, mu2_ref,
                       wdz_ref, bdz_ref, m3_ref, b3_ref, m4_ref, b4_ref,
                       recon_ref, q_ref):
    f32 = jnp.float32
    bf16 = jnp.bfloat16

    def dense(x_bf, w_ref, b_ref, relu):
        # bf16 x bf16 MXU matmul, f32 accumulation, f32 bias + ReLU epilogue.
        y = jnp.dot(x_bf, w_ref[...], preferred_element_type=f32) + b_ref[...]
        return jnp.maximum(y, 0.0) if relu else y

    x = x_ref[...]                                           # (TB, C*H*W) bf16, NCHW-flat

    # ---- encoder ----
    h = dense(x, m1_ref, b1_ref, True).astype(bf16)          # conv1 (s=2,p=1)+ReLU -> (TB,512)
    h = dense(h, m2_ref, b2_ref, True).astype(bf16)          # conv2 (s=2,p=1)+ReLU -> (TB,256)
    z32 = dense(h, wez_ref, bez_ref, False)                  # fc -> z (f32)         (TB,z_dim)
    z = z32.astype(bf16)

    # ---- clustering layer: Student-t (alpha=1) soft assignment, row-normalized ----
    # TODO(synk): ClusteringLayer definition is not in the source snippet; this is the
    # standard DEC/DCEC Student-t (alpha=1) soft assignment.
    z2 = jnp.sum(z32 * z32, axis=1, keepdims=True)           # (TB, 1) f32
    cross = jnp.dot(z, mut2_ref[...], preferred_element_type=f32)   # z @ (2*mu^T), (TB, Kp)
    d2 = jnp.maximum(z2 + mu2_ref[...] - cross, 0.0)
    qn = pl.reciprocal(1.0 + d2, approx=True)                # EUP slot
    col = jax.lax.broadcasted_iota(jnp.int32, qn.shape, 1)
    qn = jnp.where(col < n_clusters, qn, 0.0)                # mask lane-padded clusters
    q_ref[...] = qn * pl.reciprocal(jnp.sum(qn, axis=1, keepdims=True), approx=False)

    # ---- decoder ----
    d = dense(z, wdz_ref, bdz_ref, True).astype(bf16)        # fc + ReLU              (TB,256)
    d = dense(d, m3_ref, b3_ref, True).astype(bf16)          # convT1 (s=2,p=1,op=1)+ReLU (TB,512)
    recon_ref[...] = dense(d, m4_ref, b4_ref, False)         # convT2 (s=2,p=1,op=1)  (TB,C*H*W)


@partial(jax.jit, static_argnames=("n_clusters",))
def dcec_forward(packed, x_nchw, *, n_clusters):
    """x:(B,C,H,W) -> (recon:(B,C,H,W), q:(B,n_clusters)). One fused pallas_call."""
    B, C, H, W = x_nchw.shape
    n_in = C * H * W
    Kp = packed['mut2'].shape[1]                             # n_clusters padded to 128 lanes

    x_flat = x_nchw.reshape(B, n_in).astype(jnp.bfloat16)    # NCHW flatten: free reshape

    # Batch tile: multiple of 16 (bf16 sublanes), up to 256 rows (256-wide MXU on v6e/v7x),
    # and always >= 2 grid steps so v7x's second TensorCore gets work.
    tb = min(256, _round_up(max(1, (B + 1) // 2), 16))
    bp = max(_round_up(B, tb), 2 * tb)
    if bp != B:
        x_flat = jnp.pad(x_flat, ((0, bp - B), (0, 0)))

    w_names = ('m1', 'b1', 'm2', 'b2', 'wez', 'bez', 'mut2', 'mu2',
               'wdz', 'bdz', 'm3', 'b3', 'm4', 'b4')
    weights = [packed[k] for k in w_names]

    def resident(arr):
        # Whole-array block, constant index -> loaded once, VMEM-resident across the grid.
        if _WEIGHTS_SINGLE_BUFFERED:
            return pl.BlockSpec(arr.shape, lambda i: (0, 0), pipeline_mode=pl.Buffered(1))
        return pl.BlockSpec(arr.shape, lambda i: (0, 0))

    recon_flat, q = pl.pallas_call(
        partial(_dcec_fused_kernel, n_clusters),
        out_shape=(jax.ShapeDtypeStruct((bp, n_in), jnp.float32),
                   jax.ShapeDtypeStruct((bp, Kp), jnp.float32)),
        grid_spec=pltpu.PrefetchScalarGridSpec(
            num_scalar_prefetch=0,
            grid=(bp // tb,),
            in_specs=[pl.BlockSpec((tb, n_in), lambda i: (i, 0))]
                     + [resident(w) for w in weights],
            out_specs=[pl.BlockSpec((tb, n_in), lambda i: (i, 0)),
                       pl.BlockSpec((tb, Kp), lambda i: (i, 0))],
        ),
        compiler_params=pltpu.CompilerParams(dimension_semantics=("parallel",)),
    )(x_flat, *weights)

    recon = recon_flat[:B].reshape(B, C, H, W)
    return recon, q[:B, :n_clusters]


# ----------------------------------------------------------------------------
# One-time prepack: exact linearization of the conv / convT layers (NCHW flatten),
# bf16 operator matrices, f32 biases, prepacked mu^2 and 2*mu^T (lane-padded to 128).
# ----------------------------------------------------------------------------
def _conv2d_nchw(x, w, b, stride, pad):
    """PyTorch Conv2d semantics. x:(B,C,H,W), w:(Cout,Cin,kh,kw)."""
    y = jax.lax.conv_general_dilated(
        x, w, window_strides=(stride, stride),
        padding=((pad, pad), (pad, pad)),
        dimension_numbers=('NCHW', 'OIHW', 'NCHW'))
    return y + b.reshape(1, -1, 1, 1)


def _conv_transpose2d_nchw(x, w, b, stride, pad, outpad):
    """PyTorch ConvTranspose2d semantics. w:(Cin,Cout,kh,kw)."""
    kh, kw = int(w.shape[2]), int(w.shape[3])
    w_conv = jnp.transpose(jnp.flip(w, (2, 3)), (1, 0, 2, 3))   # -> (Cout,Cin,kh,kw)
    y = jax.lax.conv_general_dilated(
        x, w_conv, window_strides=(1, 1),
        padding=((kh - 1 - pad, kh - 1 - pad + outpad),
                 (kw - 1 - pad, kw - 1 - pad + outpad)),
        lhs_dilation=(stride, stride),
        dimension_numbers=('NCHW', 'OIHW', 'NCHW'))
    return y + b.reshape(1, -1, 1, 1)


def _linearize(layer_fn, in_shape_chw):
    """Exact (W, b) with layer(x).reshape(B,-1) == x.reshape(B,-1) @ W + b (NCHW flatten)."""
    n_in = 1
    for s in in_shape_chw:
        n_in *= int(s)
    basis = jnp.eye(n_in, dtype=jnp.float32).reshape((n_in,) + tuple(in_shape_chw))
    zero = jnp.zeros((1,) + tuple(in_shape_chw), jnp.float32)
    b_flat = layer_fn(zero).reshape(1, -1)                      # (1, n_out)
    w_mat = layer_fn(basis).reshape(n_in, -1) - b_flat          # (n_in, n_out)
    return w_mat, b_flat


def prepack_params(params, *, in_ch=4, in_hw=16):
    h1 = in_hw // 2
    h2 = h1 // 2
    c1 = int(params['ew1'].shape[0])    # 8
    c2 = int(params['ew2'].shape[0])    # 16

    m1, b1 = _linearize(lambda v: _conv2d_nchw(v, params['ew1'], params['eb1'], 2, 1),
                        (in_ch, in_hw, in_hw))
    m2, b2 = _linearize(lambda v: _conv2d_nchw(v, params['ew2'], params['eb2'], 2, 1),
                        (c1, h1, h1))
    m3, b3 = _linearize(lambda v: _conv_transpose2d_nchw(v, params['dw1'], params['db1'], 2, 1, 1),
                        (c2, h2, h2))
    m4, b4 = _linearize(lambda v: _conv_transpose2d_nchw(v, params['dw2'], params['db2'], 2, 1, 1),
                        (c1, h1, h1))

    # Clustering prepack: 2*mu^T and |mu|^2, lane-padded so q is stored lane-dense.
    mu = params['mu'].astype(jnp.float32)                       # (K, z_dim)
    K, z_dim = int(mu.shape[0]), int(mu.shape[1])
    Kp = _round_up(K, 128)
    mut2 = jnp.zeros((z_dim, Kp), jnp.float32).at[:, :K].set(2.0 * mu.T)
    mu2 = jnp.zeros((1, Kp), jnp.float32).at[:, :K].set(jnp.sum(mu * mu, axis=1)[None, :])

    bf16 = lambda a: a.astype(jnp.bfloat16)
    f32 = lambda a: a.astype(jnp.float32)
    return {
        'm1': bf16(m1), 'b1': f32(b1), 'm2': bf16(m2), 'b2': f32(b2),
        'wez': bf16(jnp.transpose(params['ewf'])), 'bez': f32(params['ebf']).reshape(1, -1),
        'mut2': bf16(mut2), 'mu2': mu2,
        'wdz': bf16(jnp.transpose(params['dwf'])), 'bdz': f32(params['dbf']).reshape(1, -1),
        'm3': bf16(m3), 'b3': f32(b3), 'm4': bf16(m4), 'b4': f32(b4),
    }


# ----------------------------------------------------------------------------
# Model params (same architecture / init as before).
# ----------------------------------------------------------------------------
def init_params(key, *, in_ch=4, z_dim=32, n_clusters=10, feat_hw=4, feat_ch=16):
    keys = jax.random.split(key, 13)
    s = 0.1
    n = lambda k, shape: (jax.random.normal(k, shape, jnp.float32) * s)
    flat = feat_ch * feat_hw * feat_hw      # 16 * 4 * 4 = 256
    return {
        # encoder
        'ew1': n(keys[0], (8, in_ch, 3, 3)),  'eb1': n(keys[1], (8,)),
        'ew2': n(keys[2], (16, 8, 3, 3)),     'eb2': n(keys[3], (16,)),
        'ewf': n(keys[4], (z_dim, flat)),     'ebf': n(keys[5], (z_dim,)),
        # clustering layer (cluster centers)
        'mu':  n(keys[6], (n_clusters, z_dim)),
        # decoder
        'dwf': n(keys[7], (flat, z_dim)),     'dbf': n(keys[8], (flat,)),
        'dw1': n(keys[9], (16, 8, 3, 3)),     'db1': n(keys[10], (8,)),      # ConvT 16->8
        'dw2': n(keys[11], (8, in_ch, 3, 3)), 'db2': n(keys[12], (in_ch,)),  # ConvT 8->in_ch
    }


# Plain-JAX reference (lax.conv path, f32) for correctness cross-checking only.
def dcec_reference(params, x_nchw):
    B = x_nchw.shape[0]
    x = x_nchw.astype(jnp.float32)
    h = jax.nn.relu(_conv2d_nchw(x, params['ew1'], params['eb1'], 2, 1))
    h = jax.nn.relu(_conv2d_nchw(h, params['ew2'], params['eb2'], 2, 1))
    z = h.reshape(B, -1) @ params['ewf'].T + params['ebf']
    d2 = jnp.sum((z[:, None, :] - params['mu'][None, :, :]) ** 2, axis=-1)
    qn = 1.0 / (1.0 + d2)
    q = qn / jnp.sum(qn, axis=1, keepdims=True)
    d = jax.nn.relu(z @ params['dwf'].T + params['dbf'])
    d = d.reshape(B, 16, 4, 4)
    d = jax.nn.relu(_conv_transpose2d_nchw(d, params['dw1'], params['db1'], 2, 1, 1))
    d = _conv_transpose2d_nchw(d, params['dw2'], params['db2'], 2, 1, 1)
    return d, q


if __name__ == "__main__":
    key = jax.random.PRNGKey(0)
    k_x, k_p = jax.random.split(key)

    B, C, H, W = 2, 4, 16, 16
    n_clusters = 10
    x = jax.random.normal(k_x, (B, C, H, W), jnp.float32)
    params = init_params(k_p, in_ch=C, z_dim=32, n_clusters=n_clusters)

    packed = prepack_params(params, in_ch=C, in_hw=H)     # one-time weight repack (bf16)

    recon, q = dcec_forward(packed, x, n_clusters=n_clusters)
    recon = jax.block_until_ready(recon)
    q = jax.block_until_ready(q)

    assert recon.shape == (B, C, H, W), recon.shape
    assert q.shape == (B, n_clusters), q.shape
    assert bool(jnp.all(jnp.isfinite(recon))) and bool(jnp.all(jnp.isfinite(q)))
    # q rows are a probability distribution
    assert bool(jnp.allclose(jnp.sum(q, axis=1), 1.0, atol=1e-5))

    # cross-check the fused bf16 kernel against the plain-JAX f32 conv reference
    ref_recon, ref_q = jax.jit(dcec_reference)(params, x)
    assert float(jnp.max(jnp.abs(recon - ref_recon))) < 5e-2, "recon mismatch vs reference"
    assert float(jnp.max(jnp.abs(q - ref_q))) < 3e-2, "q mismatch vs reference"

    print("KERNEL_OK")
</pallas_src>

<mosaic_0001>
module attributes {stable_mosaic.version = 11 : i64} {
  func.func @_probe_kernel(%arg0: i32, %arg1: memref<8x128xf32, #tpu.memory_space<vmem>>, %arg2: memref<8x128xf32, #tpu.memory_space<vmem>>) attributes {dimension_semantics = [#tpu.dimension_semantics<arbitrary>], iteration_bounds = array<i64: 1>, scalar_prefetch = 0 : i64, scratch_operands = 0 : i64, tpu.core_type = #tpu.core_type<tc>, window_params = [{pipeline_mode = #tpu.pipeline_mode<synchronous>, transform_indices = @transform_0, window_bounds = array<i64: 8, 128>}, {pipeline_mode = #tpu.pipeline_mode<synchronous>, transform_indices = @transform_1, window_bounds = array<i64: 8, 128>}]} {
    %c0 = arith.constant 0 : index
    %c0_0 = arith.constant 0 : index
    %0 = vector.load %arg1[%c0, %c0_0] : memref<8x128xf32, #tpu.memory_space<vmem>>, vector<8x128xf32>
    %cst = arith.constant 1.000000e+00 : f32
    %1 = vector.broadcast %cst : f32 to vector<8x128xf32>
    %2 = arith.addf %0, %1 : vector<8x128xf32>
    %c0_1 = arith.constant 0 : index
    %c0_2 = arith.constant 0 : index
    %3 = vector.load %arg2[%c0_1, %c0_2] : memref<8x128xf32, #tpu.memory_space<vmem>>, vector<8x128xf32>
    tpu.vector_store %arg2[%c0_1, %c0_2], %2 {strides = array<i32>} : memref<8x128xf32, #tpu.memory_space<vmem>>, vector<8x128xf32>,
    return
  }
  func.func @transform_0(%arg0: i32) -> (i32, i32) {
    %c0_i32 = arith.constant 0 : i32
    %c0_i32_0 = arith.constant 0 : i32
    %c0_i32_1 = arith.constant 0 : i32
    return %c0_i32, %c0_i32_0 : i32, i32
  }
  func.func @transform_1(%arg0: i32) -> (i32, i32) {
    %c0_i32 = arith.constant 0 : i32
    %c0_i32_0 = arith.constant 0 : i32
    %c0_i32_1 = arith.constant 0 : i32
    return %c0_i32, %c0_i32_0 : i32, i32
  }
}

module attributes {stable_mosaic.version = 11 : i64} {
  func.func @_dcec_fused_kernel(%arg0: i32, %arg1: memref<16x1024xbf16, #tpu.memory_space<vmem>>, %arg2: memref<1024x512xbf16, #tpu.memory_space<vmem>>, %arg3: memref<1x512xf32, #tpu.memory_space<vmem>>, %arg4: memref<512x256xbf16, #tpu.memory_space<vmem>>, %arg5: memref<1x256xf32, #tpu.memory_space<vmem>>, %arg6: memref<256x32xbf16, #tpu.memory_space<vmem>>, %arg7: memref<1x32xf32, #tpu.memory_space<vmem>>, %arg8: memref<32x128xbf16, #tpu.memory_space<vmem>>, %arg9: memref<1x128xf32, #tpu.memory_space<vmem>>, %arg10: memref<32x256xbf16, #tpu.memory_space<vmem>>, %arg11: memref<1x256xf32, #tpu.memory_space<vmem>>, %arg12: memref<256x512xbf16, #tpu.memory_space<vmem>>, %arg13: memref<1x512xf32, #tpu.memory_space<vmem>>, %arg14: memref<512x1024xbf16, #tpu.memory_space<vmem>>, %arg15: memref<1x1024xf32, #tpu.memory_space<vmem>>, %arg16: memref<16x1024xf32, #tpu.memory_space<vmem>>, %arg17: memref<16x128xf32, #tpu.memory_space<vmem>>) attributes {dimension_semantics = [#tpu.dimension_semantics<parallel>], iteration_bounds = array<i64: 2>, scalar_prefetch = 0 : i64, scratch_operands = 0 : i64, tpu.core_type = #tpu.core_type<tc>, window_params = [{transform_indices = @transform_0, window_bounds = array<i64: 16, 1024>}, {pipeline_mode = #tpu.pipeline_mode<synchronous>, transform_indices = @transform_1, window_bounds = array<i64: 1024, 512>}, {pipeline_mode = #tpu.pipeline_mode<synchronous>, transform_indices = @transform_2, window_bounds = array<i64: 1, 512>}, {pipeline_mode = #tpu.pipeline_mode<synchronous>, transform_indices = @transform_3, window_bounds = array<i64: 512, 256>}, {pipeline_mode = #tpu.pipeline_mode<synchronous>, transform_indices = @transform_4, window_bounds = array<i64: 1, 256>}, {pipeline_mode = #tpu.pipeline_mode<synchronous>, transform_indices = @transform_5, window_bounds = array<i64: 256, 32>}, {pipeline_mode = #tpu.pipeline_mode<synchronous>, transform_indices = @transform_6, window_bounds = array<i64: 1, 32>}, {pipeline_mode = #tpu.pipeline_mode<synchronous>, transform_indices = @transform_7, window_bounds = array<i64: 32, 128>}, {pipeline_mode = #tpu.pipeline_mode<synchronous>, transform_indices = @transform_8, window_bounds = array<i64: 1, 128>}, {pipeline_mode = #tpu.pipeline_mode<synchronous>, transform_indices = @transform_9, window_bounds = array<i64: 32, 256>}, {pipeline_mode = #tpu.pipeline_mode<synchronous>, transform_indices = @transform_10, window_bounds = array<i64: 1, 256>}, {pipeline_mode = #tpu.pipeline_mode<synchronous>, transform_indices = @transform_11, window_bounds = array<i64: 256, 512>}, {pipeline_mode = #tpu.pipeline_mode<synchronous>, transform_indices = @transform_12, window_bounds = array<i64: 1, 512>}, {pipeline_mode = #tpu.pipeline_mode<synchronous>, transform_indices = @transform_13, window_bounds = array<i64: 512, 1024>}, {pipeline_mode = #tpu.pipeline_mode<synchronous>, transform_indices = @transform_14, window_bounds = array<i64: 1, 1024>}, {transform_indices = @transform_15, window_bounds = array<i64: 16, 1024>}, {transform_indices = @transform_16, window_bounds = array<i64: 16, 128>}]} {
    %c0 = arith.constant 0 : index
    %c0_0 = arith.constant 0 : index
    %0 = vector.load %arg1[%c0, %c0_0] : memref<16x1024xbf16, #tpu.memory_space<vmem>>, vector<16x1024xbf16>
    %c0_1 = arith.constant 0 : index
    %c0_2 = arith.constant 0 : index
    %1 = vector.load %arg2[%c0_1, %c0_2] : memref<1024x512xbf16, #tpu.memory_space<vmem>>, vector<1024x512xbf16>
    %cst = arith.constant dense<0.000000e+00> : vector<16x512xf32>
    %2 = tpu.matmul %0, %1, %cst {dimension_numbers = #tpu.dot_dimension_numbers<[1], [0], [0], [1], [0, 0, 1, 1], [], []>} : vector<16x1024xbf16>, vector<1024x512xbf16>, vector<16x512xf32> -> vector<16x512xf32>
    %c0_3 = arith.constant 0 : index
    %c0_4 = arith.constant 0 : index
    %3 = vector.load %arg3[%c0_3, %c0_4] : memref<1x512xf32, #tpu.memory_space<vmem>>, vector<1x512xf32>
    %4 = vector.broadcast %3 : vector<1x512xf32> to vector<16x512xf32>
    %5 = arith.addf %2, %4 : vector<16x512xf32>
    %cst_5 = arith.constant 0.000000e+00 : f32
    %6 = vector.broadcast %cst_5 : f32 to vector<16x512xf32>
    %7 = arith.maximumf %5, %6 : vector<16x512xf32>
    %8 = arith.truncf %7 : vector<16x512xf32> to vector<16x512xbf16>
    %c0_6 = arith.constant 0 : index
    %c0_7 = arith.constant 0 : index
    %9 = vector.load %arg4[%c0_6, %c0_7] : memref<512x256xbf16, #tpu.memory_space<vmem>>, vector<512x256xbf16>
    %cst_8 = arith.constant dense<0.000000e+00> : vector<16x256xf32>
    %10 = tpu.matmul %8, %9, %cst_8 {dimension_numbers = #tpu.dot_dimension_numbers<[1], [0], [0], [1], [0, 0, 1, 1], [], []>} : vector<16x512xbf16>, vector<512x256xbf16>, vector<16x256xf32> -> vector<16x256xf32>
    %c0_9 = arith.constant 0 : index
    %c0_10 = arith.constant 0 : index
    %11 = vector.load %arg5[%c0_9, %c0_10] : memref<1x256xf32, #tpu.memory_space<vmem>>, vector<1x256xf32>
    %12 = vector.broadcast %11 : vector<1x256xf32> to vector<16x256xf32>
    %13 = arith.addf %10, %12 : vector<16x256xf32>
    %cst_11 = arith.constant 0.000000e+00 : f32
    %14 = vector.broadcast %cst_11 : f32 to vector<16x256xf32>
    %15 = arith.maximumf %13, %14 : vector<16x256xf32>
    %16 = arith.truncf %15 : vector<16x256xf32> to vector<16x256xbf16>
    %c0_12 = arith.constant 0 : index
    %c0_13 = arith.constant 0 : index
    %17 = vector.load %arg6[%c0_12, %c0_13] : memref<256x32xbf16, #tpu.memory_space<vmem>>, vector<256x32xbf16>
    %cst_14 = arith.constant dense<0.000000e+00> : vector<16x32xf32>
    %18 = tpu.matmul %16, %17, %cst_14 {dimension_numbers = #tpu.dot_dimension_numbers<[1], [0], [0], [1], [0, 0, 1, 1], [], []>} : vector<16x256xbf16>, vector<256x32xbf16>, vector<16x32xf32> -> vector<16x32xf32>
    %c0_15 = arith.constant 0 : index
    %c0_16 = arith.constant 0 : index
    %19 = vector.load %arg7[%c0_15, %c0_16] : memref<1x32xf32, #tpu.memory_space<vmem>>, vector<1x32xf32>
    %20 = vector.broadcast %19 : vector<1x32xf32> to vector<16x32xf32>
    %21 = arith.addf %18, %20 : vector<16x32xf32>
    %22 = arith.truncf %21 : vector<16x32xf32> to vector<16x32xbf16>
    %23 = arith.mulf %21, %21 : vector<16x32xf32>
    %cst_17 = arith.constant dense<0.000000e+00> : vector<16xf32>
    %24 = vector.multi_reduction <add>, %23, %cst_17 [1] : vector<16x32xf32> to vector<16xf32>
    %25 = vector.shape_cast %24 : vector<16xf32> to vector<16x1xf32>
    %c0_18 = arith.constant 0 : index
    %c0_19 = arith.constant 0 : index
    %26 = vector.load %arg8[%c0_18, %c0_19] : memref<32x128xbf16, #tpu.memory_space<vmem>>, vector<32x128xbf16>
    %cst_20 = arith.constant dense<0.000000e+00> : vector<16x128xf32>
    %27 = tpu.matmul %22, %26, %cst_20 {dimension_numbers = #tpu.dot_dimension_numbers<[1], [0], [0], [1], [0, 0, 1, 1], [], []>} : vector<16x32xbf16>, vector<32x128xbf16>, vector<16x128xf32> -> vector<16x128xf32>
    %c0_21 = arith.constant 0 : index
    %c0_22 = arith.constant 0 : index
    %28 = vector.load %arg9[%c0_21, %c0_22] : memref<1x128xf32, #tpu.memory_space<vmem>>, vector<1x128xf32>
    %29 = vector.broadcast %25 : vector<16x1xf32> to vector<16x128xf32>
    %30 = vector.broadcast %28 : vector<1x128xf32> to vector<16x128xf32>
    %31 = arith.addf %29, %30 : vector<16x128xf32>
    %32 = arith.subf %31, %27 : vector<16x128xf32>
    %cst_23 = arith.constant 0.000000e+00 : f32
    %33 = vector.broadcast %cst_23 : f32 to vector<16x128xf32>
    %34 = arith.maximumf %32, %33 : vector<16x128xf32>
    %cst_24 = arith.constant 1.000000e+00 : f32
    %35 = vector.broadcast %cst_24 : f32 to vector<16x128xf32>
    %36 = arith.addf %35, %34 : vector<16x128xf32>
    %37 = tpu.reciprocal %36 {approx = true} : vector<16x128xf32> -> vector<16x128xf32>
    %38 = tpu.iota {dimensions = array<i32: 1>} : vector<16x128xi32>
    %c10_i32 = arith.constant 10 : i32
    %39 = vector.broadcast %c10_i32 : i32 to vector<16x128xi32>
    %40 = arith.cmpi slt, %38, %39 : vector<16x128xi32>
    %cst_25 = arith.constant 0.000000e+00 : f32
    %41 = vector.broadcast %cst_25 : f32 to vector<16x128xf32>
    %42 = arith.select %40, %37, %41 : vector<16x128xi1>, vector<16x128xf32>
    %cst_26 = arith.constant dense<0.000000e+00> : vector<16xf32>
    %43 = vector.multi_reduction <add>, %42, %cst_26 [1] : vector<16x128xf32> to vector<16xf32>
    %44 = vector.shape_cast %43 : vector<16xf32> to vector<16x1xf32>
    %45 = tpu.reciprocal %44 : vector<16x1xf32> -> vector<16x1xf32>
    %46 = vector.broadcast %45 : vector<16x1xf32> to vector<16x128xf32>
    %47 = arith.mulf %42, %46 : vector<16x128xf32>
    %c0_27 = arith.constant 0 : index
    %c0_28 = arith.constant 0 : index
    %48 = vector.load %arg17[%c0_27, %c0_28] : memref<16x128xf32, #tpu.memory_space<vmem>>, vector<16x128xf32>
    tpu.vector_store %arg17[%c0_27, %c0_28], %47 {strides = array<i32>} : memref<16x128xf32, #tpu.memory_space<vmem>>, vector<16x128xf32>,
    %c0_29 = arith.constant 0 : index
    %c0_30 = arith.constant 0 : index
    %49 = vector.load %arg10[%c0_29, %c0_30] : memref<32x256xbf16, #tpu.memory_space<vmem>>, vector<32x256xbf16>
    %cst_31 = arith.constant dense<0.000000e+00> : vector<16x256xf32>
    %50 = tpu.matmul %22, %49, %cst_31 {dimension_numbers = #tpu.dot_dimension_numbers<[1], [0], [0], [1], [0, 0, 1, 1], [], []>} : vector<16x32xbf16>, vector<32x256xbf16>, vector<16x256xf32> -> vector<16x256xf32>
    %c0_32 = arith.constant 0 : index
    %c0_33 = arith.constant 0 : index
    %51 = vector.load %arg11[%c0_32, %c0_33] : memref<1x256xf32, #tpu.memory_space<vmem>>, vector<1x256xf32>
    %52 = vector.broadcast %51 : vector<1x256xf32> to vector<16x256xf32>
    %53 = arith.addf %50, %52 : vector<16x256xf32>
    %cst_34 = arith.constant 0.000000e+00 : f32
    %54 = vector.broadcast %cst_34 : f32 to vector<16x256xf32>
    %55 = arith.maximumf %53, %54 : vector<16x256xf32>
    %56 = arith.truncf %55 : vector<16x256xf32> to vector<16x256xbf16>
    %c0_35 = arith.constant 0 : index
    %c0_36 = arith.constant 0 : index
    %57 = vector.load %arg12[%c0_35, %c0_36] : memref<256x512xbf16, #tpu.memory_space<vmem>>, vector<256x512xbf16>
    %cst_37 = arith.constant dense<0.000000e+00> : vector<16x512xf32>
    %58 = tpu.matmul %56, %57, %cst_37 {dimension_numbers = #tpu.dot_dimension_numbers<[1], [0], [0], [1], [0, 0, 1, 1], [], []>} : vector<16x256xbf16>, vector<256x512xbf16>, vector<16x512xf32> -> vector<16x512xf32>
    %c0_38 = arith.constant 0 : index
    %c0_39 = arith.constant 0 : index
    %59 = vector.load %arg13[%c0_38, %c0_39] : memref<1x512xf32, #tpu.memory_space<vmem>>, vector<1x512xf32>
    %60 = vector.broadcast %59 : vector<1x512xf32> to vector<16x512xf32>
    %61 = arith.addf %58, %60 : vector<16x512xf32>
    %cst_40 = arith.constant 0.000000e+00 : f32
    %62 = vector.broadcast %cst_40 : f32 to vector<16x512xf32>
    %63 = arith.maximumf %61, %62 : vector<16x512xf32>
    %64 = arith.truncf %63 : vector<16x512xf32> to vector<16x512xbf16>
    %c0_41 = arith.constant 0 : index
    %c0_42 = arith.constant 0 : index
    %65 = vector.load %arg14[%c0_41, %c0_42] : memref<512x1024xbf16, #tpu.memory_space<vmem>>, vector<512x1024xbf16>
    %cst_43 = arith.constant dense<0.000000e+00> : vector<16x1024xf32>
    %66 = tpu.matmul %64, %65, %cst_43 {dimension_numbers = #tpu.dot_dimension_numbers<[1], [0], [0], [1], [0, 0, 1, 1], [], []>} : vector<16x512xbf16>, vector<512x1024xbf16>, vector<16x1024xf32> -> vector<16x1024xf32>
    %c0_44 = arith.constant 0 : index
    %c0_45 = arith.constant 0 : index
    %67 = vector.load %arg15[%c0_44, %c0_45] : memref<1x1024xf32, #tpu.memory_space<vmem>>, vector<1x1024xf32>
    %68 = vector.broadcast %67 : vector<1x1024xf32> to vector<16x1024xf32>
    %69 = arith.addf %66, %68 : vector<16x1024xf32>
    %c0_46 = arith.constant 0 : index
    %c0_47 = arith.constant 0 : index
    %70 = vector.load %arg16[%c0_46, %c0_47] : memref<16x1024xf32, #tpu.memory_space<vmem>>, vector<16x1024xf32>
    tpu.vector_store %arg16[%c0_46, %c0_47], %69 {strides = array<i32>} : memref<16x1024xf32, #tpu.memory_space<vmem>>, vector<16x1024xf32>,
    return
  }
  func.func @transform_0(%arg0: i32) -> (i32, i32) {
    %c0_i32 = arith.constant 0 : i32
    %c0_i32_0 = arith.constant 0 : i32
    return %arg0, %c0_i32 : i32, i32
  }
  func.func @transform_1(%arg0: i32) -> (i32, i32) {
    %c0_i32 = arith.constant 0 : i32
    %c0_i32_0 = arith.constant 0 : i32
    %c0_i32_1 = arith.constant 0 : i32
    return %c0_i32, %c0_i32_0 : i32, i32
  }
  func.func @transform_2(%arg0: i32) -> (i32, i32) {
    %c0_i32 = arith.constant 0 : i32
    %c0_i32_0 = arith.constant 0 : i32
    %c0_i32_1 = arith.constant 0 : i32
    return %c0_i32, %c0_i32_0 : i32, i32
  }
  func.func @transform_3(%arg0: i32) -> (i32, i32) {
    %c0_i32 = arith.constant 0 : i32
    %c0_i32_0 = arith.constant 0 : i32
    %c0_i32_1 = arith.constant 0 : i32
    return %c0_i32, %c0_i32_0 : i32, i32
  }
  func.func @transform_4(%arg0: i32) -> (i32, i32) {
    %c0_i32 = arith.constant 0 : i32
    %c0_i32_0 = arith.constant 0 : i32
    %c0_i32_1 = arith.constant 0 : i32
    return %c0_i32, %c0_i32_0 : i32, i32
  }
  func.func @transform_5(%arg0: i32) -> (i32, i32) {
    %c0_i32 = arith.constant 0 : i32
    %c0_i32_0 = arith.constant 0 : i32
    %c0_i32_1 = arith.constant 0 : i32
    return %c0_i32, %c0_i32_0 : i32, i32
  }
  func.func @transform_6(%arg0: i32) -> (i32, i32) {
    %c0_i32 = arith.constant 0 : i32
    %c0_i32_0 = arith.constant 0 : i32
    %c0_i32_1 = arith.constant 0 : i32
    return %c0_i32, %c0_i32_0 : i32, i32
  }
  func.func @transform_7(%arg0: i32) -> (i32, i32) {
    %c0_i32 = arith.constant 0 : i32
    %c0_i32_0 = arith.constant 0 : i32
    %c0_i32_1 = arith.constant 0 : i32
    return %c0_i32, %c0_i32_0 : i32, i32
  }
  func.func @transform_8(%arg0: i32) -> (i32, i32) {
    %c0_i32 = arith.constant 0 : i32
    %c0_i32_0 = arith.constant 0 : i32
    %c0_i32_1 = arith.constant 0 : i32
    return %c0_i32, %c0_i32_0 : i32, i32
  }
  func.func @transform_9(%arg0: i32) -> (i32, i32) {
    %c0_i32 = arith.constant 0 : i32
    %c0_i32_0 = arith.constant 0 : i32
    %c0_i32_1 = arith.constant 0 : i32
    return %c0_i32, %c0_i32_0 : i32, i32
  }
  func.func @transform_10(%arg0: i32) -> (i32, i32) {
    %c0_i32 = arith.constant 0 : i32
    %c0_i32_0 = arith.constant 0 : i32
    %c0_i32_1 = arith.constant 0 : i32
    return %c0_i32, %c0_i32_0 : i32, i32
  }
  func.func @transform_11(%arg0: i32) -> (i32, i32) {
    %c0_i32 = arith.constant 0 : i32
    %c0_i32_0 = arith.constant 0 : i32
    %c0_i32_1 = arith.constant 0 : i32
    return %c0_i32, %c0_i32_0 : i32, i32
  }
  func.func @transform_12(%arg0: i32) -> (i32, i32) {
    %c0_i32 = arith.constant 0 : i32
    %c0_i32_0 = arith.constant 0 : i32
    %c0_i32_1 = arith.constant 0 : i32
    return %c0_i32, %c0_i32_0 : i32, i32
  }
  func.func @transform_13(%arg0: i32) -> (i32, i32) {
    %c0_i32 = arith.constant 0 : i32
    %c0_i32_0 = arith.constant 0 : i32
    %c0_i32_1 = arith.constant 0 : i32
    return %c0_i32, %c0_i32_0 : i32, i32
  }
  func.func @transform_14(%arg0: i32) -> (i32, i32) {
    %c0_i32 = arith.constant 0 : i32
    %c0_i32_0 = arith.constant 0 : i32
    %c0_i32_1 = arith.constant 0 : i32
    return %c0_i32, %c0_i32_0 : i32, i32
  }
  func.func @transform_15(%arg0: i32) -> (i32, i32) {
    %c0_i32 = arith.constant 0 : i32
    %c0_i32_0 = arith.constant 0 : i32
    return %arg0, %c0_i32 : i32, i32
  }
  func.func @transform_16(%arg0: i32) -> (i32, i32) {
    %c0_i32 = arith.constant 0 : i32
    %c0_i32_0 = arith.constant 0 : i32
    return %arg0, %c0_i32 : i32, i32
  }
}

</mosaic_0001>

<bundles_post_ra>
// kernel: tpu_custom_call.1
= control target key start
LH: loop header
LB: loop body
LE: loop exit
PB: predicated region body
PF: predicated region fallthrough
CT: control target
= control target key end

     0   :  { %6 = vsyncpa [#allocation3], 0  ;;  %s125_s0 = inlined_call_operand.hbm [shape: f32[8,128], index: 0, kind: input, shape index: {}]   ;;  %s126_s1 = inlined_call_operand.hbm [shape: f32[8,128], index: 1, kind: output, shape index: {}]  }
   0x1   :  { %7 = vsyncpa [#allocation4], 0  ;;  %s89_s6 = smov [#allocation2]   ;;  %s41_s10 = scalar_lea.hbm %s125_s0, 128 }
   0x2   :  { %s14_s7 = sshll.u32 %s89_s6, 4  ;;  %p42_p0 = scmp.ne.s32.totalorder %s125_s0, %s41_s10  ;;  %s15_s7 = int_to_ptr.vmem [resolvable:$true] %s14_s7 }
   0x3   :  { %p45_p1 = scmp.lt.u32.totalorder %s41_s10, %s125_s0 }
   0x5   :  { %p47_p2 = pnand %p45_p1, %p42_p0 }
   0x7   :  { %50 = shalt.err (!%p47_p2)
}
   0x8   :  { %s51_s15 = scalar_lea.vmem %s15_s7, 128  ;;  %p56_p4 = scmp.lt.s32.totalorder %s15_s7, %s15_s7 }
   0x9   :  { %p52_p3 = scmp.ne.s32.totalorder %s15_s7, %s51_s15  ;;  %p57_p5 = scmp.lt.s32.totalorder %s51_s15, %s51_s15 }
   0xb   :  { %p58_p6 = por %p57_p5, %p56_p4 }
   0xd   :  { %p59_p7 = pnand %p58_p6, %p52_p3 }
   0xf   :  { %62 = shalt.err (!%p59_p7)
}
  0x10   :  { %17 = dma.hbm_to_vmem [thread:$0]  %s125_s0, 128, %s15_s7, [#allocation3]  }
  0x11   :  { %85 = dma.done.wait [#allocation3], 128  }
  0x12   :  { %86 = vsyncadd [#allocation3], 4294967168  ;;  %s90_s18 = smov [#allocation5]   ;;  %v21_v0 = vld [vmem:[#allocation2] sm:$0xff] }
  0x13   :  { %s30_s19 = sshll.u32 %s90_s18, 4  ;;  %v22_v1 = vadd.f32 1.0, %v21_v0  ;;  %s31_s19 = int_to_ptr.vmem [resolvable:$true] %s30_s19 }
  0x14   :  { %s63_s20 = scalar_lea.vmem %s31_s19, 128  ;;  %p68_p9 = scmp.lt.s32.totalorder %s31_s19, %s31_s19 }
  0x15   :  { %23 = vst [vmem:[#allocation5] sm:$0xff] %v22_v1  ;;  %p64_p8 = scmp.ne.s32.totalorder %s31_s19, %s63_s20  ;;  %p69_p10 = scmp.lt.s32.totalorder %s63_s20, %s63_s20 }
  0x17   :  { %p70_p11 = por %p69_p10, %p68_p9 }
  0x19   :  { %p71_p12 = pnand %p70_p11, %p64_p8 }
  0x1b   :  { %74 = shalt.err (!%p71_p12)
}
  0x1c   :  { %s75_s23 = scalar_lea.hbm %s126_s1, 128 }
  0x1d   :  { %p76_p13 = scmp.ne.s32.totalorder %s126_s1, %s75_s23  ;;  %p79_p0 = scmp.lt.u32.totalorder %s75_s23, %s126_s1 }
  0x1f   :  { %p81_p1 = pnand %p79_p0, %p76_p13 }
  0x21   :  { %84 = shalt.err (!%p81_p1)
}
  0x22   :  { %33 = dma.vmem_to_hbm [thread:$0]  %s31_s19, 128, %s126_s1, [#allocation4]  }
  0x23   :  { %87 = dma.done.wait [#allocation4], 128  }
  0x24   :  { %88 = vsyncadd [#allocation4], 4294967168 }
  0x25   :  { %37 = vsyncpa [#allocation3], 1 }
  0x26   :  { %38 = vsyncpa [#allocation4], 1 }

// kernel: dcec_forward.1
= control target key start
LH: loop header
LB: loop body
LE: loop exit
PB: predicated region body
PF: predicated region fallthrough
CT: control target
= control target key end

     0   :  { %s8621_s0 = inlined_call_operand.vmem [shape: bf16[32,1024], index: 0, kind: input, shape index: {}]   ;;  %s8622_s1 = inlined_call_operand.hbm [shape: bf16[1024,512], index: 1, kind: input, shape index: {}]   ;;  %s8623_s2 = inlined_call_operand.vmem [shape: f32[1,512], index: 2, kind: input, shape index: {}]   ;;  %s8624_s3 = inlined_call_operand.vmem [shape: bf16[512,256], index: 3, kind: input, shape index: {}]   ;;  %s8625_s4 = inlined_call_operand.vmem [shape: f32[1,256], index: 4, kind: input, shape index: {}]   ;;  %s8626_s5 = inlined_call_operand.vmem [shape: bf16[256,32], index: 5, kind: input, shape index: {}]   ;;  %s8627_s6 = inlined_call_operand.hbm [shape: f32[1,32], index: 6, kind: input, shape index: {}]   ;;  %s8628_s7 = inlined_call_operand.vmem [shape: bf16[32,128], index: 7, kind: input, shape index: {}]   ;;  %s8629_s8 = inlined_call_operand.hbm [shape: f32[1,128], index: 8, kind: input, shape index: {}]   ;;  %s8630_s9 = inlined_call_operand.vmem [shape: bf16[32,256], index: 9, kind: input, shape index: {}]   ;;  %s8631_s10 = inlined_call_operand.hbm [shape: f32[1,256], index: 10, kind: input, shape index: {}]   ;;  %s8632_s11 = inlined_call_operand.hbm [shape: bf16[256,512], index: 11, kind: input, shape index: {}]   ;;  %s8633_s12 = inlined_call_operand.hbm [shape: f32[1,512], index: 12, kind: input, shape index: {}]   ;;  %s8634_s13 = inlined_call_operand.hbm [shape: bf16[512,1024], index: 13, kind: input, shape index: {}]   ;;  %s8635_s14 = inlined_call_operand.hbm [shape: f32[1,1024], index: 14, kind: input, shape index: {}]   ;;  %s8636_s15 = inlined_call_operand.vmem [shape: f32[32,1024], index: 15, kind: output, shape index: {0}]   ;;  %s8637_s16 = inlined_call_operand.vmem [shape: f32[32,128], index: 16, kind: output, shape index: {1}]  }
   0x1   :  { %8643 = sst [smem:[#allocation20_spill]] %s8621_s0 }
   0x2   :  { %8644 = sst [smem:[#allocation21_spill]] %s8627_s6 }
   0x3   :  { %8645 = sst [smem:[#allocation22_spill]] %s8630_s9 }
   0x4   :  { %8646 = sst [smem:[#allocation23_spill]] %s8631_s10 }
   0x5   :  { %8647 = sst [smem:[#allocation24_spill]] %s8633_s12 }
   0x6   :  { %8648 = sst [smem:[#allocation25_spill]] %s8636_s15 }
   0x7   :  { %8649 = sst [smem:[#allocation26_spill]] %s8637_s16 }
   0x8   :  { %22 = vsyncpa [#allocation3], 0 }
   0x9   :  { %23 = vsyncpa [#allocation5], 0 }
   0xa   :  { %24 = vsyncpa [#allocation8], 0 }
   0xb   :  { %25 = vsyncpa [#allocation11], 0 }
   0xc   :  { %26 = vsyncpa [#allocation14], 0  ;;  %s7946_s21 = smov 0  }
   0xd LB: > { %s7846_s22 = smov [#allocation4]   ;;  %s8638_s24 = sadd.s32 4294967295, %s7844_s21   ;;  %s7844_s21 = sphi %s7946_s21, %s32_s21  }
   0xe   : > { %s447_s23 = sshll.u32 %s7846_s22, 4  ;;  %p6080_p0 = scmp.ge.s32.totalorder %s7844_s21, 1  ;;  %s7960_s23 = int_to_ptr.vmem [resolvable:$true] %s447_s23 }
   0xf   : > { %p409_p1 = scmp.lt.s32.totalorder %s7844_s21, 3  ;;  %p7956_p2 = scmp.eq.s32.totalorder %s8638_s24, 0 }
  0x10   : > { %s7847_s27 = smov [#allocation7]   ;;  %s7848_s29 = smov [#allocation10]  }
  0x11   : > { %s8650_s25 = scalar_select %p7956_p2, 1, 0 }
  0x12   : > { %p7962_p3 = pnand %p6080_p0, %p409_p1  ;;  %s475_s28 = sshll.u32 %s7847_s27, 4  ;;  %s7968_s28 = int_to_ptr.vmem [resolvable:$true] %s475_s28 }
  0x13   : > { %s499_s30 = sshll.u32 %s7848_s29, 4  ;;  %s7849_s17 = smov [#allocation2]   ;;  %s7976_s30 = int_to_ptr.vmem [resolvable:$true] %s499_s30 }
  0x14   : > { %s8651_s26 = scalar_select %p7962_p3, 1, 0 }
  0x15   : > { %p6922_p4 = pneg %p7962_p3  ;;  %s421_s18 = sshll.u32 %s7849_s17, 4  ;;  %s7978_s18 = int_to_ptr.vmem [resolvable:$true] %s421_s18 }
  0x16   : > { %s8653_s6 = sld [smem:[#allocation21_spill]] }
  0x17   : > { %p7972_p5 = pnand %p7956_p2, %p6922_p4 }
  0x19   : > { %p7988_p7 = pneg %p7972_p5 }
  0x1c   : > { %s7594_s22 = scalar_lea.hbm %s8653_s6, 16 }
  0x1d   : > { %p7595_p6 = scmp.ne.s32.totalorder %s8653_s6, %s7594_s22  ;;  %p7601_p10 = scmp.lt.u32.totalorder %s7594_s22, %s8653_s6 }
  0x1f   : > { %p7597_p8 = pnand %p7988_p7, %p7595_p6 }
  0x21   : > { %p7598_p9 = pneg %p7597_p8 }
  0x23   : > { %p7603_p11 = pnand %p7601_p10, %p7598_p9 }
  0x25   : > { %7606 = shalt.err (!%p7603_p11)
}
  0x26   : > { %s7607_s24 = scalar_lea.vmem %s7960_s23, 16  ;;  %s7614_s19 = scalar_lea.vmem %s7960_s23, 32 }
  0x27   : > { %p7608_p12 = scmp.ne.s32.totalorder %s7960_s23, %s7607_s24  ;;  %p7615_p1 = scmp.lt.s32.totalorder %s7960_s23, %s7960_s23 }
  0x28   : > { %p7616_p4 = scmp.lt.s32.totalorder %s7614_s19, %s7607_s24 }
  0x29   : > { %p7610_p13 = pnand %p7608_p12, %p7988_p7 }
  0x2a   : > { %p7617_p6 = por %p7616_p4, %p7615_p1 }
  0x2b   : > { %p7611_p0 = pneg %p7610_p13 }
  0x2d   : > { %p7618_p8 = pnand %p7617_p6, %p7611_p0 }
  0x2f   : > { %7621 = shalt.err (!%p7618_p8)
}
  0x30   : > { %6928 = dma.hbm_to_vmem [thread:$0]  (!%p7972_p5), %s8653_s6, 16, %s7960_s23, [#allocation5]  }
  0x31   : > { %s8655_s10 = sld [smem:[#allocation23_spill]] }
  0x37   : > { %s7622_s17 = scalar_lea.hbm %s8655_s10, 32 }
  0x38   : > { %p7623_p9 = scmp.ne.s32.totalorder %s8655_s10, %s7622_s17  ;;  %p7629_p12 = scmp.lt.u32.totalorder %s7622_s17, %s8655_s10 }
  0x3a   : > { %p7625_p10 = pnand %p7623_p9, %p7988_p7 }
  0x3c   : > { %p7626_p11 = pneg %p7625_p10 }
  0x3e   : > { %p7631_p13 = pnand %p7629_p12, %p7626_p11 }
  0x40   : > { %7634 = shalt.err (!%p7631_p13)
}
  0x41   : > { %s7635_s23 = scalar_lea.vmem %s7968_s28, 32  ;;  %p7643_p6 = scmp.lt.s32.totalorder %s7968_s28, %s7968_s28 }
  0x42   : > { %p7636_p0 = scmp.ne.s32.totalorder %s7968_s28, %s7635_s23  ;;  %p7644_p8 = scmp.lt.s32.totalorder %s7635_s23, %s7635_s23 }
  0x44   : > { %p7638_p1 = pnand %p7636_p0, %p7988_p7  ;;  %p7645_p9 = por %p7644_p8, %p7643_p6 }
  0x46   : > { %p7639_p4 = pneg %p7638_p1 }
  0x48   : > { %p7646_p10 = pnand %p7645_p9, %p7639_p4 }
  0x4a   : > { %7649 = shalt.err (!%p7646_p10)
}
  0x4b   : > { %6934 = dma.hbm_to_vmem [thread:$0]  (!%p7972_p5), %s8655_s10, 32, %s7968_s28, [#allocation8]  }
  0x4c   : > { %s8656_s12 = sld [smem:[#allocation24_spill]] }
  0x52   : > { %s7650_s22 = scalar_lea.hbm %s8656_s12, 64 }
  0x53   : > { %p7651_p11 = scmp.ne.s32.totalorder %s8656_s12, %s7650_s22  ;;  %p7657_p0 = scmp.lt.u32.totalorder %s7650_s22, %s8656_s12 }
  0x55   : > { %p7653_p12 = pnand %p7651_p11, %p7988_p7 }
  0x57   : > { %p7654_p13 = pneg %p7653_p12 }
  0x59   : > { %p7659_p1 = pnand %p7657_p0, %p7654_p13 }
  0x5b   : > { %7662 = shalt.err (!%p7659_p1)
}
  0x5c   : > { %s7663_s28 = scalar_lea.vmem %s7976_s30, 64  ;;  %p7671_p9 = scmp.lt.s32.totalorder %s7976_s30, %s7976_s30 }
  0x5d   : > { %p7664_p4 = scmp.ne.s32.totalorder %s7976_s30, %s7663_s28  ;;  %p7672_p10 = scmp.lt.s32.totalorder %s7663_s28, %s7663_s28 }
  0x5f   : > { %p7666_p6 = pnand %p7664_p4, %p7988_p7  ;;  %p7673_p11 = por %p7672_p10, %p7671_p9 }
  0x61   : > { %p7667_p8 = pneg %p7666_p6 }
  0x63   : > { %p7674_p12 = pnand %p7673_p11, %p7667_p8 }
  0x65   : > { %7677 = shalt.err (!%p7674_p12)
}
  0x66   : > { %6940 = dma.hbm_to_vmem [thread:$0]  (!%p7972_p5), %s8656_s12, 64, %s7976_s30, [#allocation11]  }
  0x67   : > { %s7678_s20 = scalar_lea.hbm %s8622_s1, 32768 }
  0x68   : > { %p7679_p13 = scmp.ne.s32.totalorder %s8622_s1, %s7678_s20  ;;  %p7685_p4 = scmp.lt.u32.totalorder %s7678_s20, %s8622_s1 }
  0x6a   : > { %p7681_p0 = pnand %p7679_p13, %p7988_p7 }
  0x6c   : > { %p7682_p1 = pneg %p7681_p0 }
  0x6e   : > { %p7687_p6 = pnand %p7685_p4, %p7682_p1 }
  0x70   : > { %7690 = shalt.err (!%p7687_p6)
}
  0x71   : > { %s7691_s30 = scalar_lea.vmem %s7978_s18, 32768  ;;  %p7699_p11 = scmp.lt.s32.totalorder %s7978_s18, %s7978_s18 }
  0x72   : > { %p7692_p8 = scmp.ne.s32.totalorder %s7978_s18, %s7691_s30  ;;  %p7700_p12 = scmp.lt.s32.totalorder %s7691_s30, %s7691_s30 }
  0x74   : > { %p7694_p9 = pnand %p7692_p8, %p7988_p7  ;;  %p7701_p13 = por %p7700_p12, %p7699_p11 }
  0x76   : > { %p7695_p10 = pneg %p7694_p9 }
  0x78   : > { %p7702_p0 = pnand %p7701_p13, %p7695_p10 }
  0x7a   : > { %7705 = shalt.err (!%p7702_p0)
}
  0x7b   : > { %s7850_s19 = smov 256   ;;  %s7851_s28 = smov 16  }
  0x7c   : > { %6925 = dma.hbm_to_vmem [thread:$0]  (!%p7972_p5), %s8622_s1, 32768, %s7978_s18, [#allocation3], %s7850_s19, %s7850_s19, %s7851_s28  }
  0x7d   : > { %s7852_s16 = smov [#allocation6]   ;;  %s7853_s20 = smov [#allocation9]  }
  0x7e   : > { %s461_s15 = sshll.u32 %s7852_s16, 4  ;;  %s485_s22 = sshll.u32 %s7853_s20, 4  ;;  %s462_s15 = int_to_ptr.vmem [resolvable:$true] %s461_s15  ;;  %s486_s22 = int_to_ptr.vmem [resolvable:$true] %s485_s22 }
  0x7f   : > { %s7706_s24 = scalar_lea.hbm %s8629_s8, 16 }
  0x80   : > { %p7707_p1 = scmp.ne.s32.totalorder %s8629_s8, %s7706_s24  ;;  %p7713_p8 = scmp.lt.u32.totalorder %s7706_s24, %s8629_s8 }
  0x82   : > { %p7709_p4 = pnand %p7707_p1, %p7988_p7 }
  0x84   : > { %p7710_p6 = pneg %p7709_p4 }
  0x86   : > { %p7715_p9 = pnand %p7713_p8, %p7710_p6 }
  0x88   : > { %7718 = shalt.err (!%p7715_p9)
}
  0x89   : > { %s7719_s18 = scalar_lea.vmem %s462_s15, 16  ;;  %s7726_s23 = scalar_lea.vmem %s462_s15, 32 }
  0x8a   : > { %p7720_p10 = scmp.ne.s32.totalorder %s462_s15, %s7719_s18  ;;  %p7727_p13 = scmp.lt.s32.totalorder %s462_s15, %s462_s15 }
  0x8b   : > { %p7728_p0 = scmp.lt.s32.totalorder %s7726_s23, %s7719_s18 }
  0x8c   : > { %p7722_p11 = pnand %p7720_p10, %p7988_p7 }
  0x8d   : > { %p7729_p2 = por %p7728_p0, %p7727_p13 }
  0x8e   : > { %p7723_p12 = pneg %p7722_p11 }
  0x90   : > { %p7730_p3 = pnand %p7729_p2, %p7723_p12 }
  0x92   : > { %7733 = shalt.err (!%p7730_p3)
}
  0x93   : > { %6931 = dma.hbm_to_vmem [thread:$0]  (!%p7972_p5), %s8629_s8, 16, %s462_s15, [#allocation5]  }
  0x94   : > { %s7734_s16 = scalar_lea.hbm %s8632_s11, 8192 }
  0x95   : > { %p7735_p1 = scmp.ne.s32.totalorder %s8632_s11, %s7734_s16  ;;  %p7741_p3 = scmp.lt.u32.totalorder %s7734_s16, %s8632_s11 }
  0x97   : > { %p7737_p4 = pnand %p7735_p1, %p7988_p7 }
  0x99   : > { %p7738_p2 = pneg %p7737_p4 }
  0x9b   : > { %p7743_p6 = pnand %p7741_p3, %p7738_p2 }
  0x9d   : > { %7746 = shalt.err (!%p7743_p6)
}
  0x9e   : > { %s7747_s30 = scalar_lea.vmem %s486_s22, 8192  ;;  %p7755_p11 = scmp.lt.s32.totalorder %s486_s22, %s486_s22 }
  0x9f   : > { %p7748_p8 = scmp.ne.s32.totalorder %s486_s22, %s7747_s30  ;;  %p7756_p12 = scmp.lt.s32.totalorder %s7747_s30, %s7747_s30 }
  0xa1   : > { %p7750_p9 = pnand %p7748_p8, %p7988_p7  ;;  %p7757_p13 = por %p7756_p12, %p7755_p11 }
  0xa3   : > { %p7751_p10 = pneg %p7750_p9 }
  0xa5   : > { %p7758_p0 = pnand %p7757_p13, %p7751_p10 }
  0xa7   : > { %7761 = shalt.err (!%p7758_p0)
}
  0xa8   : > { %6937 = dma.hbm_to_vmem [thread:$0]  (!%p7972_p5), %s8632_s11, 8192, %s486_s22, [#allocation8], %s7850_s19, %s7850_s19, %s7851_s28  }
  0xa9   : > { %s7854_s23 = smov [#allocation12]   ;;  %s7762_s12 = scalar_lea.hbm %s8634_s13, 32768 }
  0xaa   : > { %s509_s6 = sshll.u32 %s7854_s23, 4  ;;  %p7763_p1 = scmp.ne.s32.totalorder %s8634_s13, %s7762_s12  ;;  %s510_s6 = int_to_ptr.vmem [resolvable:$true] %s509_s6 }
  0xab   : > { %p7769_p3 = scmp.lt.u32.totalorder %s7762_s12, %s8634_s13 }
  0xac   : > { %p7765_p4 = pnand %p7763_p1, %p7988_p7 }
  0xae   : > { %p7766_p2 = pneg %p7765_p4 }
  0xb0   : > { %p7771_p6 = pnand %p7769_p3, %p7766_p2 }
  0xb2   : > { %7774 = shalt.err (!%p7771_p6)
}
  0xb3   : > { %s7775_s19 = scalar_lea.vmem %s510_s6, 32768  ;;  %p7783_p11 = scmp.lt.s32.totalorder %s510_s6, %s510_s6 }
  0xb4   : > { %p7776_p8 = scmp.ne.s32.totalorder %s510_s6, %s7775_s19  ;;  %p7784_p12 = scmp.lt.s32.totalorder %s7775_s19, %s7775_s19 }
  0xb6   : > { %p7778_p9 = pnand %p7776_p8, %p7988_p7  ;;  %p7785_p13 = por %p7784_p12, %p7783_p11 }
  0xb8   : > { %p7779_p10 = pneg %p7778_p9 }
  0xba   : > { %p7786_p0 = pnand %p7785_p13, %p7779_p10 }
  0xbc   : > { %7789 = shalt.err (!%p7786_p0)
}
  0xbd   : > { %s7855_s28 = smov 512   ;;  %s7856_s22 = smov 32  }
  0xbe   : > { %6943 = dma.hbm_to_vmem [thread:$0]  (!%p7972_p5), %s8634_s13, 32768, %s510_s6, [#allocation11], %s7855_s28, %s7855_s28, %s7856_s22  }
  0xbf   : > { %s7857_s15 = smov [#allocation13]   ;;  %s7790_s10 = scalar_lea.hbm %s8635_s14, 128 }
  0xc0   : > { %s523_s18 = sshll.u32 %s7857_s15, 4  ;;  %p7791_p1 = scmp.ne.s32.totalorder %s8635_s14, %s7790_s10  ;;  %s524_s18 = int_to_ptr.vmem [resolvable:$true] %s523_s18 }
  0xc1   : > { %p7797_p3 = scmp.lt.u32.totalorder %s7790_s10, %s8635_s14 }
  0xc2   : > { %p7793_p4 = pnand %p7791_p1, %p7988_p7 }
  0xc4   : > { %p7794_p2 = pneg %p7793_p4 }
  0xc6   : > { %p7799_p6 = pnand %p7797_p3, %p7794_p2 }
  0xc8   : > { %7802 = shalt.err (!%p7799_p6)
}
  0xc9   : > { %s7803_s6 = scalar_lea.vmem %s524_s18, 128  ;;  %p7811_p11 = scmp.lt.s32.totalorder %s524_s18, %s524_s18 }
  0xca   : > { %p7804_p8 = scmp.ne.s32.totalorder %s524_s18, %s7803_s6  ;;  %p7812_p12 = scmp.lt.s32.totalorder %s7803_s6, %s7803_s6 }
  0xcc   : > { %p7806_p9 = pnand %p7804_p8, %p7988_p7  ;;  %p7813_p13 = por %p7812_p12, %p7811_p11 }
  0xce   : > { %p7807_p10 = pneg %p7806_p9 }
  0xd0   : > { %p7814_p0 = pnand %p7813_p13, %p7807_p10 }
  0xd2   : > { %7817 = shalt.err (!%p7814_p0)
}
  0xd3   : > { %6946 = dma.hbm_to_vmem [thread:$0]  (!%p7972_p5), %s8635_s14, 128, %s524_s18, [#allocation14]  }
  0xd4   : > { %p8657_p1 = scmp.ne.s32.totalorder %s8651_s26, 0 }
  0xd5   : > { %p8658_p4 = scmp.ne.s32.totalorder (!%p8657_p1), %s8650_s25, 0 }
  0xd6   : > { %546 = sbr.rel (%p8657_p1) target bundleno = 2079 (0x81f), region = 80 }
  0xdd   : > { %7823 = dma.done.wait (%p8658_p4), [#allocation3], 32768  }
  0xde   : > { %7825 = vsyncadd (%p8658_p4), [#allocation3], 4294934528 }
  0xdf   : > { %7827 = dma.done.wait (%p8658_p4), [#allocation5], 32  }
  0xe0   : > { %7829 = vsyncadd (%p8658_p4), [#allocation5], 4294967264 }
  0xe1   : > { %7831 = dma.done.wait (%p8658_p4), [#allocation8], 8224  }
  0xe2   : > { %7833 = vsyncadd (%p8658_p4), [#allocation8], 4294959072 }
  0xe3   : > { %7835 = dma.done.wait (%p8658_p4), [#allocation11], 32832  }
  0xe4   : > { %7837 = vsyncadd (%p8658_p4), [#allocation11], 4294934464 }
  0xe5   : > { %7839 = dma.done.wait (%p8658_p4), [#allocation14], 128  }
  0xe6   : > { %7841 = vsyncadd (%p8658_p4), [#allocation14], 4294967168  ;;  %v6986_v0 = vld [vmem:[#allocation2 + $0x4] ss:$16 sps:$4 sm:$0xff]   ;;  %v6988_v1 = vld [vmem:[#allocation2 + $0xc] ss:$16 sps:$4 sm:$0xff]  }
  0xe7   : > { %2258 = vmatprep.subr.bf16.mxu0 %v6986_v0  ;;  %v6990_v2 = vld [vmem:[#allocation2] ss:$16 sps:$4 sm:$0xff]   ;;  %v6991_v3 = vld [vmem:[#allocation2 + $0x8] ss:$16 sps:$4 sm:$0xff]   ;;  %2430 = vmatprep.subr.bf16.mxu1 %v6988_v1  ;;  %v6992_v4 = vld [vmem:[#allocation2 + $0x24] ss:$16 sps:$4 sm:$0xff]  }
  0xe8   : > { %2259 = vmatpush1.bf16.msra.mxu0 %v6990_v2  ;;  %2431 = vmatpush1.bf16.msra.mxu1 %v6991_v3  ;;  %v6994_v5 = vld [vmem:[#allocation2 + $0x2c] ss:$16 sps:$4 sm:$0xff]   ;;  %v6996_v6 = vld [vmem:[#allocation2 + $0x20] ss:$16 sps:$4 sm:$0xff]   ;;  %v6997_v7 = vld [vmem:[#allocation2 + $0x28] ss:$16 sps:$4 sm:$0xff]  }
  0xe9   : > { %2260 = vmatprep.subr.bf16.mxu0 %v6992_v4  ;;  %2432 = vmatprep.subr.bf16.mxu1 %v6994_v5  ;;  %v6998_v8 = vld [vmem:[#allocation2 + $0x44] ss:$16 sps:$4 sm:$0xff]   ;;  %v7000_v9 = vld [vmem:[#allocation2 + $0x4c] ss:$16 sps:$4 sm:$0xff]   ;;  %v7002_v10 = vld [vmem:[#allocation2 + $0x40] ss:$16 sps:$4 sm:$0xff]  }
  0xea   : > { %v7003_v11 = vld [vmem:[#allocation2 + $0x48] ss:$16 sps:$4 sm:$0xff]   ;;  %v7004_v12 = vld [vmem:[#allocation2 + $0x64] ss:$16 sps:$4 sm:$0xff]   ;;  %v7006_v13 = vld [vmem:[#allocation2 + $0x6c] ss:$16 sps:$4 sm:$0xff]  }
  0xeb   : > { %v7008_v14 = vld [vmem:[#allocation2 + $0x60] ss:$16 sps:$4 sm:$0xff]   ;;  %v7009_v15 = vld [vmem:[#allocation2 + $0x68] ss:$16 sps:$4 sm:$0xff]   ;;  %v7010_v16 = vld [vmem:[#allocation2 + $0x84] ss:$16 sps:$4 sm:$0xff]  }
  0xec   : > { %2261 = vmatpush1.bf16.msra.mxu0 %v6996_v6  ;;  %2433 = vmatpush1.bf16.msra.mxu1 %v6997_v7  ;;  %v7012_v17 = vld [vmem:[#allocation2 + $0x8c] ss:$16 sps:$4 sm:$0xff]   ;;  %v7014_v18 = vld [vmem:[#allocation2 + $0x80] ss:$16 sps:$4 sm:$0xff]   ;;  %v7015_v19 = vld [vmem:[#allocation2 + $0x88] ss:$16 sps:$4 sm:$0xff]  }
  0xed   : > { %2262 = vmatprep.subr.bf16.mxu0 %v6998_v8  ;;  %2434 = vmatprep.subr.bf16.mxu1 %v7000_v9  ;;  %v7016_v20 = vld [vmem:[#allocation2 + $0xa4] ss:$16 sps:$4 sm:$0xff]   ;;  %v7018_v21 = vld [vmem:[#allocation2 + $0xac] ss:$16 sps:$4 sm:$0xff]   ;;  %v7020_v22 = vld [vmem:[#allocation2 + $0xa0] ss:$16 sps:$4 sm:$0xff]  }
  0xee   : > { %v7021_v23 = vld [vmem:[#allocation2 + $0xa8] ss:$16 sps:$4 sm:$0xff]   ;;  %v7022_v24 = vld [vmem:[#allocation2 + $0xc4] ss:$16 sps:$4 sm:$0xff]   ;;  %v7024_v25 = vld [vmem:[#allocation2 + $0xcc] ss:$16 sps:$4 sm:$0xff]  }
  0xef   : > { %v7026_v26 = vld [vmem:[#allocation2 + $0xc0] ss:$16 sps:$4 sm:$0xff]   ;;  %v7027_v27 = vld [vmem:[#allocation2 + $0xc8] ss:$16 sps:$4 sm:$0xff]   ;;  %v7028_v28 = vld [vmem:[#allocation2 + $0xe4] ss:$16 sps:$4 sm:$0xff]  }
  0xf0   : > { %2263 = vmatpush1.bf16.msra.mxu0 %v7002_v10  ;;  %2435 = vmatpush1.bf16.msra.mxu1 %v7003_v11  ;;  %v7030_v29 = vld [vmem:[#allocation2 + $0xec] ss:$16 sps:$4 sm:$0xff]   ;;  %s8659_s25 = sadd.s32 4294967295, %s7844_s21   ;;  %v7032_v30 = vld [vmem:[#allocation2 + $0xe0] ss:$16 sps:$4 sm:$0xff]   ;;  %s8660_s22 = sld [smem:[#allocation20_spill]] }
  0xf1   : > { %2264 = vmatprep.subr.bf16.mxu0 %v7004_v12  ;;  %2436 = vmatprep.subr.bf16.mxu1 %v7006_v13  ;;  %s6099_s26 = sshll.u32 %s8659_s25, 1  ;;  %v7033_v31 = vld [vmem:[#allocation2 + $0xe8] ss:$16 sps:$4 sm:$0xff]   ;;  %v7034_v32 = vld [vmem:[#allocation2 + $0x104] ss:$16 sps:$4 sm:$0xff]   ;;  %vm7859_vm0 = vmmov 0  }
  0xf2   : > { %p632_p5 = scmp.lt.s32.totalorder %s6099_s26, 3  ;;  %v7036_v33 = vld [vmem:[#allocation2 + $0x10c] ss:$16 sps:$4 sm:$0xff]   ;;  %v7038_v34 = vld [vmem:[#allocation2 + $0x100] ss:$16 sps:$4 sm:$0xff]   ;;  %vm3281_vm1 = vcmask 261120  }
  0xf3   : > { %v7039_v35 = vld [vmem:[#allocation2 + $0x108] ss:$16 sps:$4 sm:$0xff]   ;;  %v7040_v36 = vld [vmem:[#allocation2 + $0x124] ss:$16 sps:$4 sm:$0xff]   ;;  %v7042_v37 = vld [vmem:[#allocation2 + $0x12c] ss:$16 sps:$4 sm:$0xff]  }
  0xf4   : > { %2265 = vmatpush1.bf16.msra.mxu0 %v7008_v14  ;;  %2437 = vmatpush1.bf16.msra.mxu1 %v7009_v15  ;;  %s8665_s26 = smov (!%p632_p5, %s6099_s26), 3  ;;  %v7044_v38 = vld [vmem:[#allocation2 + $0x120] ss:$16 sps:$4 sm:$0xff]   ;;  %v7045_v39 = vld [vmem:[#allocation2 + $0x128] ss:$16 sps:$4 sm:$0xff]   ;;  %s8662_s27 = sld [smem:[#allocation26_spill]] }
  0xf5   : > { %2266 = vmatprep.subr.bf16.mxu0 %v7010_v16  ;;  %2438 = vmatprep.subr.bf16.mxu1 %v7012_v17  ;;  %v7046_v40 = vld [vmem:[#allocation2 + $0x144] ss:$16 sps:$4 sm:$0xff]   ;;  %s6783_s0 = sshll.u32 %s8665_s26, 5  ;;  %v7048_v41 = vld [vmem:[#allocation2 + $0x14c] ss:$16 sps:$4 sm:$0xff]   ;;  %s6106_s12 = sshll.u32 %s8665_s26, 3 }
  0xf6   : > { %v7050_v42 = vld [vmem:[#allocation2 + $0x140] ss:$16 sps:$4 sm:$0xff]   ;;  %v7051_v43 = vld [vmem:[#allocation2 + $0x148] ss:$16 sps:$4 sm:$0xff]   ;;  %s8187_s24 = scalar_lea.vmem %s8660_s22, %s6783_s0  ;;  %v7052_v44 = vld [vmem:[#allocation2 + $0x164] ss:$16 sps:$4 sm:$0xff]  }
  0xf7   : > { %v7054_v45 = vld [vmem:[#allocation2 + $0x16c] ss:$16 sps:$4 sm:$0xff]   ;;  %v652_v46 = vld [vmem:[%s8187_s24] sm:$0xff]  ;;  %v7057_v49 = vld [vmem:[#allocation2 + $0x168] ss:$16 sps:$4 sm:$0xff]   ;;  %s6784_s17 = sshll.u32 %s8665_s26, 6 }
  0xf8   : > { %2267 = vmatpush1.bf16.msra.mxu0 %v7014_v18  ;;  %2439 = vmatpush1.bf16.msra.mxu1 %v7015_v19  ;;  %v656_v47 = vld [vmem:[%s8187_s24 + $0x20] sm:$0xff]  ;;  %v7060_v52 = vld [vmem:[#allocation2 + $0x18c] ss:$16 sps:$4 sm:$0xff]   ;;  %v7063_v54 = vld [vmem:[#allocation2 + $0x188] ss:$16 sps:$4 sm:$0xff]   ;;  %s8663_s0 = sld [smem:[#allocation25_spill]] }
  0xf9   : > { %2268 = vmatprep.subr.bf16.mxu0 %v7016_v20  ;;  %2440 = vmatprep.subr.bf16.mxu1 %v7018_v21  ;;  %v7056_v48 = vld [vmem:[#allocation2 + $0x160] ss:$16 sps:$4 sm:$0xff]   ;;  %v6108_v50 = vcombine.high %v652_v46, %v656_v47  ;;  %v7058_v51 = vld [vmem:[#allocation2 + $0x184] ss:$16 sps:$4 sm:$0xff]   ;;  %v7066_v56 = vld [vmem:[#allocation2 + $0x1ac] ss:$16 sps:$4 sm:$0xff]   ;;  %v6107_v5 = vcombine.low %v652_v46, %v656_v47 }
  0xfa   : > { %v7062_v53 = vld [vmem:[#allocation2 + $0x180] ss:$16 sps:$4 sm:$0xff]   ;;  %v7064_v55 = vld [vmem:[#allocation2 + $0x1a4] ss:$16 sps:$4 sm:$0xff]   ;;  %v7069_v58 = vld [vmem:[#allocation2 + $0x1a8] ss:$16 sps:$4 sm:$0xff]   ;;  %s649_s6 = scalar_lea.vmem %s8662_s27, %s6106_s12 }
  0xfb   : > { %2290 = vmatprep.mubr.bf16.mxu0 %v6108_v50  ;;  %2462 = vmatprep.mubr.bf16.mxu1 %v6108_v50  ;;  %v7068_v57 = vld [vmem:[#allocation2 + $0x1a0] ss:$16 sps:$4 sm:$0xff]   ;;  %v7070_v59 = vld [vmem:[#allocation2 + $0x1c4] ss:$16 sps:$4 sm:$0xff]   ;;  %v7072_v60 = vld [vmem:[#allocation2 + $0x1cc] ss:$16 sps:$4 sm:$0xff]  }
  0xfc   : > { %2269 = vmatpush1.bf16.msra.mxu0 %v7020_v22  ;;  %2441 = vmatpush1.bf16.msra.mxu1 %v7021_v23  ;;  %v7074_v61 = vld [vmem:[#allocation2 + $0x1c0] ss:$16 sps:$4 sm:$0xff]   ;;  %v7075_v62 = vld [vmem:[#allocation2 + $0x1c8] ss:$16 sps:$4 sm:$0xff]   ;;  %v7076_v63 = vld [vmem:[#allocation2 + $0x1e4] ss:$16 sps:$4 sm:$0xff]  }
  0xfd   : > { %2270 = vmatprep.subr.bf16.mxu0 %v7022_v24  ;;  %2442 = vmatprep.subr.bf16.mxu1 %v7024_v25  ;;  %v7078_v0 = vld [vmem:[#allocation2 + $0x1ec] ss:$16 sps:$4 sm:$0xff]   ;;  %v7080_v1 = vld [vmem:[#allocation2 + $0x1e0] ss:$16 sps:$4 sm:$0xff]   ;;  %v7081_v2 = vld [vmem:[#allocation2 + $0x1e8] ss:$16 sps:$4 sm:$0xff]  }
  0xfe   : > { %v7084_v3 = vld [vmem:[#allocation2 + $0x204] ss:$16 sps:$4 sm:$0xff]   ;;  %v7087_v4 = vld [vmem:[#allocation2 + $0x20c] ss:$16 sps:$4 sm:$0xff]   ;;  %v7082_v6 = vld [vmem:[#allocation2 + $0x200] ss:$16 sps:$4 sm:$0xff]   ;;  %s8596_s29 = scalar_lea.vmem %s8663_s0, %s6784_s17 }
  0xff   : > { %v7085_v7 = vld [vmem:[#allocation2 + $0x208] ss:$16 sps:$4 sm:$0xff]   ;;  %v7090_v8 = vld [vmem:[#allocation2 + $0x224] ss:$16 sps:$4 sm:$0xff]   ;;  %v7093_v9 = vld [vmem:[#allocation2 + $0x22c] ss:$16 sps:$4 sm:$0xff]  }
 0x100   : > { %2271 = vmatpush1.bf16.msra.mxu0 %v7026_v26  ;;  %2443 = vmatpush1.bf16.msra.mxu1 %v7027_v27  ;;  %v7088_v10 = vld [vmem:[#allocation2 + $0x220] ss:$16 sps:$4 sm:$0xff]   ;;  %v7091_v11 = vld [vmem:[#allocation2 + $0x228] ss:$16 sps:$4 sm:$0xff]   ;;  %v7096_v12 = vld [vmem:[#allocation2 + $0x244] ss:$16 sps:$4 sm:$0xff]  }
 0x101   : > { %2272 = vmatprep.subr.bf16.mxu0 %v7028_v28  ;;  %2444 = vmatprep.subr.bf16.mxu1 %v7030_v29  ;;  %v7099_v13 = vld [vmem:[#allocation2 + $0x24c] ss:$16 sps:$4 sm:$0xff]   ;;  %v7094_v14 = vld [vmem:[#allocation2 + $0x240] ss:$16 sps:$4 sm:$0xff]   ;;  %v7097_v15 = vld [vmem:[#allocation2 + $0x248] ss:$16 sps:$4 sm:$0xff]  }
 0x102   : > { %v7102_v16 = vld [vmem:[#allocation2 + $0x264] ss:$16 sps:$4 sm:$0xff]   ;;  %v7105_v17 = vld [vmem:[#allocation2 + $0x26c] ss:$16 sps:$4 sm:$0xff]   ;;  %v7100_v18 = vld [vmem:[#allocation2 + $0x260] ss:$16 sps:$4 sm:$0xff]  }
 0x103   : > { %v7103_v19 = vld [vmem:[#allocation2 + $0x268] ss:$16 sps:$4 sm:$0xff]   ;;  %v7108_v20 = vld [vmem:[#allocation2 + $0x284] ss:$16 sps:$4 sm:$0xff]   ;;  %v7111_v21 = vld [vmem:[#allocation2 + $0x28c] ss:$16 sps:$4 sm:$0xff]  }
 0x104   : > { %2273 = vmatpush1.bf16.msra.mxu0 %v7032_v30  ;;  %2445 = vmatpush1.bf16.msra.mxu1 %v7033_v31  ;;  %v7106_v22 = vld [vmem:[#allocation2 + $0x280] ss:$16 sps:$4 sm:$0xff]   ;;  %v7109_v23 = vld [vmem:[#allocation2 + $0x288] ss:$16 sps:$4 sm:$0xff]   ;;  %v7114_v24 = vld [vmem:[#allocation2 + $0x2a4] ss:$16 sps:$4 sm:$0xff]  }
 0x105   : > { %2274 = vmatprep.subr.bf16.mxu0 %v7034_v32  ;;  %2446 = vmatprep.subr.bf16.mxu1 %v7036_v33  ;;  %v7117_v25 = vld [vmem:[#allocation2 + $0x2ac] ss:$16 sps:$4 sm:$0xff]   ;;  %v7112_v26 = vld [vmem:[#allocation2 + $0x2a0] ss:$16 sps:$4 sm:$0xff]   ;;  %v7115_v27 = vld [vmem:[#allocation2 + $0x2a8] ss:$16 sps:$4 sm:$0xff]  }
 0x106   : > { %v7120_v28 = vld [vmem:[#allocation2 + $0x2c4] ss:$16 sps:$4 sm:$0xff]   ;;  %v7123_v29 = vld [vmem:[#allocation2 + $0x2cc] ss:$16 sps:$4 sm:$0xff]   ;;  %v7118_v32 = vld [vmem:[#allocation2 + $0x2c0] ss:$16 sps:$4 sm:$0xff]  }
 0x107   : > { %v8192_v30 = vld [vmem:[%s8187_s24 + $0x8] sm:$0xff]  ;;  %v7144_v47 = vld [vmem:[#allocation2 + $0x344] ss:$16 sps:$4 sm:$0xff]  }
 0x108   : > { %2275 = vmatpush1.bf16.msra.mxu0 %v7038_v34  ;;  %2447 = vmatpush1.bf16.msra.mxu1 %v7039_v35  ;;  %v8195_v31 = vld [vmem:[%s8187_s24 + $0x28] sm:$0xff]  ;;  %v7126_v35 = vld [vmem:[#allocation2 + $0x2e4] ss:$16 sps:$4 sm:$0xff]  }
 0x109   : > { %2276 = vmatprep.subr.bf16.mxu0 %v7040_v36  ;;  %2448 = vmatprep.subr.bf16.mxu1 %v7042_v37  ;;  %v7121_v33 = vld [vmem:[#allocation2 + $0x2c8] ss:$16 sps:$4 sm:$0xff]   ;;  %v6110_v34 = vcombine.high %v8192_v30, %v8195_v31  ;;  %v7129_v36 = vld [vmem:[#allocation2 + $0x2ec] ss:$16 sps:$4 sm:$0xff]   ;;  %v7124_v37 = vld [vmem:[#allocation2 + $0x2e0] ss:$16 sps:$4 sm:$0xff]  }
 0x10a   : > { %v7139_v46 = vld [vmem:[#allocation2 + $0x328] ss:$16 sps:$4 sm:$0xff]  }
 0x10b   : > { %v7145_v50 = vld [vmem:[#allocation2 + $0x348] ss:$16 sps:$4 sm:$0xff]  }
 0x10c   : > { %2277 = vmatpush1.bf16.msra.mxu0 %v7044_v38  ;;  %2449 = vmatpush1.bf16.msra.mxu1 %v7045_v39  ;;  %v7127_v38 = vld [vmem:[#allocation2 + $0x2e8] ss:$16 sps:$4 sm:$0xff]   ;;  %v7132_v39 = vld [vmem:[#allocation2 + $0x304] ss:$16 sps:$4 sm:$0xff]  }
 0x10d   : > { %2278 = vmatprep.subr.bf16.mxu0 %v7046_v40  ;;  %2450 = vmatprep.subr.bf16.mxu1 %v7048_v41  ;;  %v7135_v40 = vld [vmem:[#allocation2 + $0x30c] ss:$16 sps:$4 sm:$0xff]   ;;  %v7130_v41 = vld [vmem:[#allocation2 + $0x300] ss:$16 sps:$4 sm:$0xff]  }
 0x110   : > { %2279 = vmatpush1.bf16.msra.mxu0 %v7050_v42  ;;  %2451 = vmatpush1.bf16.msra.mxu1 %v7051_v43  ;;  %v7133_v42 = vld [vmem:[#allocation2 + $0x308] ss:$16 sps:$4 sm:$0xff]   ;;  %v7138_v43 = vld [vmem:[#allocation2 + $0x324] ss:$16 sps:$4 sm:$0xff]  }
 0x111   : > { %2280 = vmatprep.subr.bf16.mxu0 %v7052_v44  ;;  %2452 = vmatprep.subr.bf16.mxu1 %v7054_v45  ;;  %v7141_v44 = vld [vmem:[#allocation2 + $0x32c] ss:$16 sps:$4 sm:$0xff]   ;;  %v7136_v45 = vld [vmem:[#allocation2 + $0x320] ss:$16 sps:$4 sm:$0xff]  }
 0x114   : > { %2281 = vmatpush1.bf16.msra.mxu0 %v7056_v48  ;;  %2453 = vmatpush1.bf16.msra.mxu1 %v7057_v49  ;;  %v7147_v48 = vld [vmem:[#allocation2 + $0x34c] ss:$16 sps:$4 sm:$0xff]   ;;  %v7142_v49 = vld [vmem:[#allocation2 + $0x340] ss:$16 sps:$4 sm:$0xff]  }
 0x115   : > { %2282 = vmatprep.subr.bf16.mxu0 %v7058_v51  ;;  %2454 = vmatprep.subr.bf16.mxu1 %v7060_v52  ;;  %v7150_v51 = vld [vmem:[#allocation2 + $0x364] ss:$16 sps:$4 sm:$0xff]   ;;  %v7153_v52 = vld [vmem:[#allocation2 + $0x36c] ss:$16 sps:$4 sm:$0xff]  }
 0x118   : > { %2283 = vmatpush1.bf16.msra.mxu0 %v7062_v53  ;;  %2455 = vmatpush1.bf16.msra.mxu1 %v7063_v54  ;;  %v7148_v53 = vld [vmem:[#allocation2 + $0x360] ss:$16 sps:$4 sm:$0xff]   ;;  %v7151_v54 = vld [vmem:[#allocation2 + $0x368] ss:$16 sps:$4 sm:$0xff]  }
 0x119   : > { %2284 = vmatprep.subr.bf16.mxu0 %v7064_v55  ;;  %2456 = vmatprep.subr.bf16.mxu1 %v7066_v56  ;;  %v7156_v55 = vld [vmem:[#allocation2 + $0x384] ss:$16 sps:$4 sm:$0xff]   ;;  %v7159_v56 = vld [vmem:[#allocation2 + $0x38c] ss:$16 sps:$4 sm:$0xff]  }
 0x11c   : > { %2285 = vmatpush1.bf16.msra.mxu0 %v7068_v57  ;;  %2457 = vmatpush1.bf16.msra.mxu1 %v7069_v58  ;;  %v7154_v57 = vld [vmem:[#allocation2 + $0x380] ss:$16 sps:$4 sm:$0xff]   ;;  %v7157_v58 = vld [vmem:[#allocation2 + $0x388] ss:$16 sps:$4 sm:$0xff]  }
 0x11d   : > { %2286 = vmatprep.subr.bf16.mxu0 %v7070_v59  ;;  %2458 = vmatprep.subr.bf16.mxu1 %v7072_v60  ;;  %v7162_v59 = vld [vmem:[#allocation2 + $0x3a4] ss:$16 sps:$4 sm:$0xff]   ;;  %v7165_v60 = vld [vmem:[#allocation2 + $0x3ac] ss:$16 sps:$4 sm:$0xff]  }
 0x120   : > { %2287 = vmatpush1.bf16.msra.mxu0 %v7074_v61  ;;  %2459 = vmatpush1.bf16.msra.mxu1 %v7075_v62  ;;  %v7160_v61 = vld [vmem:[#allocation2 + $0x3a0] ss:$16 sps:$4 sm:$0xff]   ;;  %v7163_v62 = vld [vmem:[#allocation2 + $0x3a8] ss:$16 sps:$4 sm:$0xff]  }
 0x121   : > { %2288 = vmatprep.subr.bf16.mxu0 %v7076_v63  ;;  %2460 = vmatprep.subr.bf16.mxu1 %v7078_v0  ;;  %v7168_v63 = vld [vmem:[#allocation2 + $0x3c4] ss:$16 sps:$4 sm:$0xff]   ;;  %v7171_v0 = vld [vmem:[#allocation2 + $0x3cc] ss:$16 sps:$4 sm:$0xff]  }
 0x124   : > { %2289 = vmatpush1.bf16.msra.mxu0 %v7080_v1  ;;  %2461 = vmatpush1.bf16.msra.mxu1 %v7081_v2  ;;  %v7166_v1 = vld [vmem:[#allocation2 + $0x3c0] ss:$16 sps:$4 sm:$0xff]   ;;  %v7169_v2 = vld [vmem:[#allocation2 + $0x3c8] ss:$16 sps:$4 sm:$0xff]  }
 0x125   : > { %2301 = vmatprep.subr.bf16.mxu0 %v7084_v3  ;;  %2473 = vmatprep.subr.bf16.mxu1 %v7087_v4  ;;  %v7174_v3 = vld [vmem:[#allocation2 + $0x3e4] ss:$16 sps:$4 sm:$0xff]   ;;  %v7177_v4 = vld [vmem:[#allocation2 + $0x3ec] ss:$16 sps:$4 sm:$0xff]  }
 0x127   : > { %2291 = vmatmul.mubr.bf16.vlgmr.msra.gmra.mrb[0].mxu0 %v6107_v5  ;;  %2463 = vmatmul.mubr.bf16.vlgmr.msra.gmra.mrb[0].mxu1 %v6107_v5  ;;  %v7172_v5 = vld [vmem:[#allocation2 + $0x3e0] ss:$16 sps:$4 sm:$0xff]  }
 0x128   : > { %2302 = vmatpush1.bf16.msra.mxu0 %v7082_v6  ;;  %2474 = vmatpush1.bf16.msra.mxu1 %v7085_v7  ;;  %v7175_v6 = vld [vmem:[#allocation2 + $0x3e8] ss:$16 sps:$4 sm:$0xff]   ;;  %v7180_v7 = vld [vmem:[#allocation2 + $0x404] ss:$16 sps:$4 sm:$0xff]  }
 0x129   : > { %2303 = vmatprep.subr.bf16.mxu0 %v7090_v8  ;;  %2475 = vmatprep.subr.bf16.mxu1 %v7093_v9  ;;  %v7183_v8 = vld [vmem:[#allocation2 + $0x40c] ss:$16 sps:$4 sm:$0xff]   ;;  %v6109_v9 = vcombine.low %v8192_v30, %v8195_v31  ;;  %v7205_v30 = vld [vmem:[#allocation2 + $0x488] ss:$16 sps:$4 sm:$0xff]   ;;  %v7210_v31 = vld [vmem:[#allocation2 + $0x4a4] ss:$16 sps:$4 sm:$0xff]  }
 0x12a   : > { %2333 = vmatprep.mubr.bf16.mxu0 %v6110_v34  ;;  %2505 = vmatprep.mubr.bf16.mxu1 %v6110_v34  ;;  %v7211_v34 = vld [vmem:[#allocation2 + $0x4a8] ss:$16 sps:$4 sm:$0xff]  }
 0x12c   : > { %2304 = vmatpush1.bf16.msra.mxu0 %v7088_v10  ;;  %2476 = vmatpush1.bf16.msra.mxu1 %v7091_v11  ;;  %v7178_v10 = vld [vmem:[#allocation2 + $0x400] ss:$16 sps:$4 sm:$0xff]   ;;  %v7181_v11 = vld [vmem:[#allocation2 + $0x408] ss:$16 sps:$4 sm:$0xff]  }
 0x12d   : > { %2305 = vmatprep.subr.bf16.mxu0 %v7096_v12  ;;  %2477 = vmatprep.subr.bf16.mxu1 %v7099_v13  ;;  %v7186_v12 = vld [vmem:[#allocation2 + $0x424] ss:$16 sps:$4 sm:$0xff]   ;;  %v7189_v13 = vld [vmem:[#allocation2 + $0x42c] ss:$16 sps:$4 sm:$0xff]  }
 0x130   : > { %2306 = vmatpush1.bf16.msra.mxu0 %v7094_v14  ;;  %2478 = vmatpush1.bf16.msra.mxu1 %v7097_v15  ;;  %v8202_v14 = vld [vmem:[%s8187_s24 + $0x10] sm:$0xff] }
 0x131   : > { %2307 = vmatprep.subr.bf16.mxu0 %v7102_v16  ;;  %2479 = vmatprep.subr.bf16.mxu1 %v7105_v17  ;;  %v8205_v15 = vld [vmem:[%s8187_s24 + $0x30] sm:$0xff] }
 0x132   : > { %v6112_v16 = vcombine.high %v8202_v14, %v8205_v15  ;;  %v7184_v17 = vld [vmem:[#allocation2 + $0x420] ss:$16 sps:$4 sm:$0xff]  }
 0x134   : > { %2308 = vmatpush1.bf16.msra.mxu0 %v7100_v18  ;;  %2480 = vmatpush1.bf16.msra.mxu1 %v7103_v19  ;;  %v7187_v18 = vld [vmem:[#allocation2 + $0x428] ss:$16 sps:$4 sm:$0xff]   ;;  %v7192_v19 = vld [vmem:[#allocation2 + $0x444] ss:$16 sps:$4 sm:$0xff]  }
 0x135   : > { %2309 = vmatprep.subr.bf16.mxu0 %v7108_v20  ;;  %2481 = vmatprep.subr.bf16.mxu1 %v7111_v21  ;;  %v7195_v20 = vld [vmem:[#allocation2 + $0x44c] ss:$16 sps:$4 sm:$0xff]   ;;  %v7190_v21 = vld [vmem:[#allocation2 + $0x440] ss:$16 sps:$4 sm:$0xff]  }
 0x138   : > { %2310 = vmatpush1.bf16.msra.mxu0 %v7106_v22  ;;  %2482 = vmatpush1.bf16.msra.mxu1 %v7109_v23  ;;  %v7193_v22 = vld [vmem:[#allocation2 + $0x448] ss:$16 sps:$4 sm:$0xff]   ;;  %v7198_v23 = vld [vmem:[#allocation2 + $0x464] ss:$16 sps:$4 sm:$0xff]  }
 0x139   : > { %2311 = vmatprep.subr.bf16.mxu0 %v7114_v24  ;;  %2483 = vmatprep.subr.bf16.mxu1 %v7117_v25  ;;  %v7201_v24 = vld [vmem:[#allocation2 + $0x46c] ss:$16 sps:$4 sm:$0xff]   ;;  %v7196_v25 = vld [vmem:[#allocation2 + $0x460] ss:$16 sps:$4 sm:$0xff]  }
 0x13c   : > { %2312 = vmatpush1.bf16.msra.mxu0 %v7112_v26  ;;  %2484 = vmatpush1.bf16.msra.mxu1 %v7115_v27  ;;  %v7199_v26 = vld [vmem:[#allocation2 + $0x468] ss:$16 sps:$4 sm:$0xff]   ;;  %v7204_v27 = vld [vmem:[#allocation2 + $0x484] ss:$16 sps:$4 sm:$0xff]  }
 0x13d   : > { %2313 = vmatprep.subr.bf16.mxu0 %v7120_v28  ;;  %2485 = vmatprep.subr.bf16.mxu1 %v7123_v29  ;;  %v7207_v28 = vld [vmem:[#allocation2 + $0x48c] ss:$16 sps:$4 sm:$0xff]   ;;  %v7202_v29 = vld [vmem:[#allocation2 + $0x480] ss:$16 sps:$4 sm:$0xff]  }
 0x140   : > { %2314 = vmatpush1.bf16.msra.mxu0 %v7118_v32  ;;  %2486 = vmatpush1.bf16.msra.mxu1 %v7121_v33  ;;  %v7213_v32 = vld [vmem:[#allocation2 + $0x4ac] ss:$16 sps:$4 sm:$0xff]   ;;  %v7208_v33 = vld [vmem:[#allocation2 + $0x4a0] ss:$16 sps:$4 sm:$0xff]  }
 0x141   : > { %2315 = vmatprep.subr.bf16.mxu0 %v7126_v35  ;;  %2487 = vmatprep.subr.bf16.mxu1 %v7129_v36  ;;  %v7216_v35 = vld [vmem:[#allocation2 + $0x4c4] ss:$16 sps:$4 sm:$0xff]   ;;  %v7219_v36 = vld [vmem:[#allocation2 + $0x4cc] ss:$16 sps:$4 sm:$0xff]  }
 0x144   : > { %2316 = vmatpush1.bf16.msra.mxu0 %v7124_v37  ;;  %2488 = vmatpush1.bf16.msra.mxu1 %v7127_v38  ;;  %v7214_v37 = vld [vmem:[#allocation2 + $0x4c0] ss:$16 sps:$4 sm:$0xff]   ;;  %v7217_v38 = vld [vmem:[#allocation2 + $0x4c8] ss:$16 sps:$4 sm:$0xff]  }
 0x145   : > { %2317 = vmatprep.subr.bf16.mxu0 %v7132_v39  ;;  %2489 = vmatprep.subr.bf16.mxu1 %v7135_v40  ;;  %v7222_v39 = vld [vmem:[#allocation2 + $0x4e4] ss:$16 sps:$4 sm:$0xff]   ;;  %v7225_v40 = vld [vmem:[#allocation2 + $0x4ec] ss:$16 sps:$4 sm:$0xff]  }
 0x148   : > { %2318 = vmatpush1.bf16.msra.mxu0 %v7130_v41  ;;  %2490 = vmatpush1.bf16.msra.mxu1 %v7133_v42  ;;  %v7220_v41 = vld [vmem:[#allocation2 + $0x4e0] ss:$16 sps:$4 sm:$0xff]   ;;  %v7223_v42 = vld [vmem:[#allocation2 + $0x4e8] ss:$16 sps:$4 sm:$0xff]  }
 0x149   : > { %2319 = vmatprep.subr.bf16.mxu0 %v7138_v43  ;;  %2491 = vmatprep.subr.bf16.mxu1 %v7141_v44  ;;  %v7228_v43 = vld [vmem:[#allocation2 + $0x504] ss:$16 sps:$4 sm:$0xff]   ;;  %v7231_v44 = vld [vmem:[#allocation2 + $0x50c] ss:$16 sps:$4 sm:$0xff]  }
 0x14c   : > { %2320 = vmatpush1.bf16.msra.mxu0 %v7136_v45  ;;  %2492 = vmatpush1.bf16.msra.mxu1 %v7139_v46  ;;  %v7226_v45 = vld [vmem:[#allocation2 + $0x500] ss:$16 sps:$4 sm:$0xff]   ;;  %v7229_v46 = vld [vmem:[#allocation2 + $0x508] ss:$16 sps:$4 sm:$0xff]  }
 0x14d   : > { %2321 = vmatprep.subr.bf16.mxu0 %v7144_v47  ;;  %2493 = vmatprep.subr.bf16.mxu1 %v7147_v48  ;;  %v7234_v47 = vld [vmem:[#allocation2 + $0x524] ss:$16 sps:$4 sm:$0xff]   ;;  %v7237_v48 = vld [vmem:[#allocation2 + $0x52c] ss:$16 sps:$4 sm:$0xff]  }
 0x150   : > { %2322 = vmatpush1.bf16.msra.mxu0 %v7142_v49  ;;  %2494 = vmatpush1.bf16.msra.mxu1 %v7145_v50  ;;  %v7232_v49 = vld [vmem:[#allocation2 + $0x520] ss:$16 sps:$4 sm:$0xff]   ;;  %v7235_v50 = vld [vmem:[#allocation2 + $0x528] ss:$16 sps:$4 sm:$0xff]  }
 0x151   : > { %2323 = vmatprep.subr.bf16.mxu0 %v7150_v51  ;;  %2495 = vmatprep.subr.bf16.mxu1 %v7153_v52  ;;  %v7240_v51 = vld [vmem:[#allocation2 + $0x544] ss:$16 sps:$4 sm:$0xff]   ;;  %v7243_v52 = vld [vmem:[#allocation2 + $0x54c] ss:$16 sps:$4 sm:$0xff]  }
 0x154   : > { %2324 = vmatpush1.bf16.msra.mxu0 %v7148_v53  ;;  %2496 = vmatpush1.bf16.msra.mxu1 %v7151_v54  ;;  %v7238_v53 = vld [vmem:[#allocation2 + $0x540] ss:$16 sps:$4 sm:$0xff]   ;;  %v7241_v54 = vld [vmem:[#allocation2 + $0x548] ss:$16 sps:$4 sm:$0xff]  }
 0x155   : > { %2325 = vmatprep.subr.bf16.mxu0 %v7156_v55  ;;  %2497 = vmatprep.subr.bf16.mxu1 %v7159_v56  ;;  %v7246_v55 = vld [vmem:[#allocation2 + $0x564] ss:$16 sps:$4 sm:$0xff]   ;;  %v7249_v56 = vld [vmem:[#allocation2 + $0x56c] ss:$16 sps:$4 sm:$0xff]  }
 0x158   : > { %2326 = vmatpush1.bf16.msra.mxu0 %v7154_v57  ;;  %2498 = vmatpush1.bf16.msra.mxu1 %v7157_v58  ;;  %v7244_v57 = vld [vmem:[#allocation2 + $0x560] ss:$16 sps:$4 sm:$0xff]   ;;  %v7247_v58 = vld [vmem:[#allocation2 + $0x568] ss:$16 sps:$4 sm:$0xff]  }
 0x159   : > { %2327 = vmatprep.subr.bf16.mxu0 %v7162_v59  ;;  %2499 = vmatprep.subr.bf16.mxu1 %v7165_v60  ;;  %v7252_v59 = vld [vmem:[#allocation2 + $0x584] ss:$16 sps:$4 sm:$0xff]   ;;  %v7255_v60 = vld [vmem:[#allocation2 + $0x58c] ss:$16 sps:$4 sm:$0xff]  }
 0x15c   : > { %2328 = vmatpush1.bf16.msra.mxu0 %v7160_v61  ;;  %2500 = vmatpush1.bf16.msra.mxu1 %v7163_v62  ;;  %v7250_v61 = vld [vmem:[#allocation2 + $0x580] ss:$16 sps:$4 sm:$0xff]   ;;  %v7253_v62 = vld [vmem:[#allocation2 + $0x588] ss:$16 sps:$4 sm:$0xff]  }
 0x15d   : > { %2329 = vmatprep.subr.bf16.mxu0 %v7168_v63  ;;  %2501 = vmatprep.subr.bf16.mxu1 %v7171_v0  ;;  %v7258_v63 = vld [vmem:[#allocation2 + $0x5a4] ss:$16 sps:$4 sm:$0xff]   ;;  %v7261_v0 = vld [vmem:[#allocation2 + $0x5ac] ss:$16 sps:$4 sm:$0xff]  }
 0x160   : > { %2330 = vmatpush1.bf16.msra.mxu0 %v7166_v1  ;;  %2502 = vmatpush1.bf16.msra.mxu1 %v7169_v2  ;;  %v7256_v1 = vld [vmem:[#allocation2 + $0x5a0] ss:$16 sps:$4 sm:$0xff]   ;;  %v7259_v2 = vld [vmem:[#allocation2 + $0x5a8] ss:$16 sps:$4 sm:$0xff]  }
 0x161   : > { %2331 = vmatprep.subr.bf16.mxu0 %v7174_v3  ;;  %2503 = vmatprep.subr.bf16.mxu1 %v7177_v4  ;;  %v7264_v3 = vld [vmem:[#allocation2 + $0x5c4] ss:$16 sps:$4 sm:$0xff]   ;;  %v7267_v4 = vld [vmem:[#allocation2 + $0x5cc] ss:$16 sps:$4 sm:$0xff]  }
 0x164   : > { %2332 = vmatpush1.bf16.msra.mxu0 %v7172_v5  ;;  %2504 = vmatpush1.bf16.msra.mxu1 %v7175_v6  ;;  %v7262_v5 = vld [vmem:[#allocation2 + $0x5c0] ss:$16 sps:$4 sm:$0xff]   ;;  %v7265_v6 = vld [vmem:[#allocation2 + $0x5c8] ss:$16 sps:$4 sm:$0xff]  }
 0x165   : > { %2344 = vmatprep.subr.bf16.mxu0 %v7180_v7  ;;  %2516 = vmatprep.subr.bf16.mxu1 %v7183_v8  ;;  %v7270_v7 = vld [vmem:[#allocation2 + $0x5e4] ss:$16 sps:$4 sm:$0xff]   ;;  %v7273_v8 = vld [vmem:[#allocation2 + $0x5ec] ss:$16 sps:$4 sm:$0xff]  }
 0x167   : > { %2334 = vmatmul.mubr.bf16.vlgmr.msra.gmra.mrb[0].mxu0 %v6109_v9  ;;  %2506 = vmatmul.mubr.bf16.vlgmr.msra.gmra.mrb[0].mxu1 %v6109_v9  ;;  %v7268_v9 = vld [vmem:[#allocation2 + $0x5e0] ss:$16 sps:$4 sm:$0xff]  }
 0x168   : > { %2345 = vmatpush1.bf16.msra.mxu0 %v7178_v10  ;;  %2517 = vmatpush1.bf16.msra.mxu1 %v7181_v11  ;;  %v7271_v10 = vld [vmem:[#allocation2 + $0x5e8] ss:$16 sps:$4 sm:$0xff]   ;;  %v7276_v11 = vld [vmem:[#allocation2 + $0x604] ss:$16 sps:$4 sm:$0xff]  }
 0x169   : > { %2346 = vmatprep.subr.bf16.mxu0 %v7186_v12  ;;  %2518 = vmatprep.subr.bf16.mxu1 %v7189_v13  ;;  %v7279_v12 = vld [vmem:[#allocation2 + $0x60c] ss:$16 sps:$4 sm:$0xff]   ;;  %v7274_v13 = vld [vmem:[#allocation2 + $0x600] ss:$16 sps:$4 sm:$0xff]  }
 0x16a   : > { %2376 = vmatprep.mubr.bf16.mxu0 %v6112_v16  ;;  %2548 = vmatprep.mubr.bf16.mxu1 %v6112_v16  ;;  %v7277_v16 = vld [vmem:[#allocation2 + $0x608] ss:$16 sps:$4 sm:$0xff]  }
 0x16c   : > { %2347 = vmatpush1.bf16.msra.mxu0 %v7184_v17  ;;  %2519 = vmatpush1.bf16.msra.mxu1 %v7187_v18  ;;  %v6111_v17 = vcombine.low %v8202_v14, %v8205_v15  ;;  %v7282_v18 = vld [vmem:[#allocation2 + $0x624] ss:$16 sps:$4 sm:$0xff]   ;;  %v7286_v14 = vld [vmem:[#allocation2 + $0x640] ss:$16 sps:$4 sm:$0xff]   ;;  %v7289_v15 = vld [vmem:[#allocation2 + $0x648] ss:$16 sps:$4 sm:$0xff]  }
 0x16d   : > { %2348 = vmatprep.subr.bf16.mxu0 %v7192_v19  ;;  %2520 = vmatprep.subr.bf16.mxu1 %v7195_v20  ;;  %v8212_v19 = vld [vmem:[%s8187_s24 + $0x18] sm:$0xff] }
 0x16e   : > { %v8215_v20 = vld [vmem:[%s8187_s24 + $0x38] sm:$0xff]  ;;  %s8661_s24 = sld [smem:[#allocation22_spill]] }
 0x170   : > { %2349 = vmatpush1.bf16.msra.mxu0 %v7190_v21  ;;  %2521 = vmatpush1.bf16.msra.mxu1 %v7193_v22  ;;  %v7285_v21 = vld [vmem:[#allocation2 + $0x62c] ss:$16 sps:$4 sm:$0xff]   ;;  %v7280_v22 = vld [vmem:[#allocation2 + $0x620] ss:$16 sps:$4 sm:$0xff]  }
 0x171   : > { %2350 = vmatprep.subr.bf16.mxu0 %v7198_v23  ;;  %2522 = vmatprep.subr.bf16.mxu1 %v7201_v24  ;;  %v7283_v23 = vld [vmem:[#allocation2 + $0x628] ss:$16 sps:$4 sm:$0xff]   ;;  %v6114_v24 = vcombine.high %v8212_v19, %v8215_v20 }
 0x174   : > { %2351 = vmatpush1.bf16.msra.mxu0 %v7196_v25  ;;  %2523 = vmatpush1.bf16.msra.mxu1 %v7199_v26  ;;  %v7288_v25 = vld [vmem:[#allocation2 + $0x644] ss:$16 sps:$4 sm:$0xff]   ;;  %v7291_v26 = vld [vmem:[#allocation2 + $0x64c] ss:$16 sps:$4 sm:$0xff]  }
 0x175   : > { %2352 = vmatprep.subr.bf16.mxu0 %v7204_v27  ;;  %2524 = vmatprep.subr.bf16.mxu1 %v7207_v28  ;;  %v7294_v27 = vld [vmem:[#allocation2 + $0x664] ss:$16 sps:$4 sm:$0xff]   ;;  %v7297_v28 = vld [vmem:[#allocation2 + $0x66c] ss:$16 sps:$4 sm:$0xff]  }
 0x178   : > { %2353 = vmatpush1.bf16.msra.mxu0 %v7202_v29  ;;  %2525 = vmatpush1.bf16.msra.mxu1 %v7205_v30  ;;  %v7292_v29 = vld [vmem:[#allocation2 + $0x660] ss:$16 sps:$4 sm:$0xff]   ;;  %v7295_v30 = vld [vmem:[#allocation2 + $0x668] ss:$16 sps:$4 sm:$0xff]  }
 0x179   : > { %2354 = vmatprep.subr.bf16.mxu0 %v7210_v31  ;;  %2526 = vmatprep.subr.bf16.mxu1 %v7213_v32  ;;  %v7300_v31 = vld [vmem:[#allocation2 + $0x684] ss:$16 sps:$4 sm:$0xff]   ;;  %v7303_v32 = vld [vmem:[#allocation2 + $0x68c] ss:$16 sps:$4 sm:$0xff]  }
 0x17c   : > { %2355 = vmatpush1.bf16.msra.mxu0 %v7208_v33  ;;  %2527 = vmatpush1.bf16.msra.mxu1 %v7211_v34  ;;  %v7298_v33 = vld [vmem:[#allocation2 + $0x680] ss:$16 sps:$4 sm:$0xff]   ;;  %v7301_v34 = vld [vmem:[#allocation2 + $0x688] ss:$16 sps:$4 sm:$0xff]  }
 0x17d   : > { %2356 = vmatprep.subr.bf16.mxu0 %v7216_v35  ;;  %2528 = vmatprep.subr.bf16.mxu1 %v7219_v36  ;;  %v7306_v35 = vld [vmem:[#allocation2 + $0x6a4] ss:$16 sps:$4 sm:$0xff]   ;;  %v7309_v36 = vld [vmem:[#allocation2 + $0x6ac] ss:$16 sps:$4 sm:$0xff]  }
 0x180   : > { %2357 = vmatpush1.bf16.msra.mxu0 %v7214_v37  ;;  %2529 = vmatpush1.bf16.msra.mxu1 %v7217_v38  ;;  %v7304_v37 = vld [vmem:[#allocation2 + $0x6a0] ss:$16 sps:$4 sm:$0xff]   ;;  %v7307_v38 = vld [vmem:[#allocation2 + $0x6a8] ss:$16 sps:$4 sm:$0xff]  }
 0x181   : > { %2358 = vmatprep.subr.bf16.mxu0 %v7222_v39  ;;  %2530 = vmatprep.subr.bf16.mxu1 %v7225_v40  ;;  %v7312_v39 = vld [vmem:[#allocation2 + $0x6c4] ss:$16 sps:$4 sm:$0xff]   ;;  %v7315_v40 = vld [vmem:[#allocation2 + $0x6cc] ss:$16 sps:$4 sm:$0xff]  }
 0x184   : > { %2359 = vmatpush1.bf16.msra.mxu0 %v7220_v41  ;;  %2531 = vmatpush1.bf16.msra.mxu1 %v7223_v42  ;;  %v7310_v41 = vld [vmem:[#allocation2 + $0x6c0] ss:$16 sps:$4 sm:$0xff]   ;;  %v7313_v42 = vld [vmem:[#allocation2 + $0x6c8] ss:$16 sps:$4 sm:$0xff]  }
 0x185   : > { %2360 = vmatprep.subr.bf16.mxu0 %v7228_v43  ;;  %2532 = vmatprep.subr.bf16.mxu1 %v7231_v44  ;;  %v7318_v43 = vld [vmem:[#allocation2 + $0x6e4] ss:$16 sps:$4 sm:$0xff]   ;;  %v7321_v44 = vld [vmem:[#allocation2 + $0x6ec] ss:$16 sps:$4 sm:$0xff]  }
 0x188   : > { %2361 = vmatpush1.bf16.msra.mxu0 %v7226_v45  ;;  %2533 = vmatpush1.bf16.msra.mxu1 %v7229_v46  ;;  %v7316_v45 = vld [vmem:[#allocation2 + $0x6e0] ss:$16 sps:$4 sm:$0xff]   ;;  %v7319_v46 = vld [vmem:[#allocation2 + $0x6e8] ss:$16 sps:$4 sm:$0xff]  }
 0x189   : > { %2362 = vmatprep.subr.bf16.mxu0 %v7234_v47  ;;  %2534 = vmatprep.subr.bf16.mxu1 %v7237_v48  ;;  %v7324_v47 = vld [vmem:[#allocation2 + $0x704] ss:$16 sps:$4 sm:$0xff]   ;;  %v7327_v48 = vld [vmem:[#allocation2 + $0x70c] ss:$16 sps:$4 sm:$0xff]  }
 0x18c   : > { %2363 = vmatpush1.bf16.msra.mxu0 %v7232_v49  ;;  %2535 = vmatpush1.bf16.msra.mxu1 %v7235_v50  ;;  %v7322_v49 = vld [vmem:[#allocation2 + $0x700] ss:$16 sps:$4 sm:$0xff]   ;;  %v7325_v50 = vld [vmem:[#allocation2 + $0x708] ss:$16 sps:$4 sm:$0xff]  }
 0x18d   : > { %2364 = vmatprep.subr.bf16.mxu0 %v7240_v51  ;;  %2536 = vmatprep.subr.bf16.mxu1 %v7243_v52  ;;  %v7330_v51 = vld [vmem:[#allocation2 + $0x724] ss:$16 sps:$4 sm:$0xff]   ;;  %v7333_v52 = vld [vmem:[#allocation2 + $0x72c] ss:$16 sps:$4 sm:$0xff]  }
 0x190   : > { %2365 = vmatpush1.bf16.msra.mxu0 %v7238_v53  ;;  %2537 = vmatpush1.bf16.msra.mxu1 %v7241_v54  ;;  %v7328_v53 = vld [vmem:[#allocation2 + $0x720] ss:$16 sps:$4 sm:$0xff]   ;;  %v7331_v54 = vld [vmem:[#allocation2 + $0x728] ss:$16 sps:$4 sm:$0xff]  }
 0x191   : > { %2366 = vmatprep.subr.bf16.mxu0 %v7246_v55  ;;  %2538 = vmatprep.subr.bf16.mxu1 %v7249_v56  ;;  %v7336_v55 = vld [vmem:[#allocation2 + $0x744] ss:$16 sps:$4 sm:$0xff]   ;;  %v7339_v56 = vld [vmem:[#allocation2 + $0x74c] ss:$16 sps:$4 sm:$0xff]  }
 0x194   : > { %2367 = vmatpush1.bf16.msra.mxu0 %v7244_v57  ;;  %2539 = vmatpush1.bf16.msra.mxu1 %v7247_v58  ;;  %v7334_v57 = vld [vmem:[#allocation2 + $0x740] ss:$16 sps:$4 sm:$0xff]   ;;  %v7337_v58 = vld [vmem:[#allocation2 + $0x748] ss:$16 sps:$4 sm:$0xff]  }
 0x195   : > { %2368 = vmatprep.subr.bf16.mxu0 %v7252_v59  ;;  %2540 = vmatprep.subr.bf16.mxu1 %v7255_v60  ;;  %v7342_v59 = vld [vmem:[#allocation2 + $0x764] ss:$16 sps:$4 sm:$0xff]   ;;  %v7345_v60 = vld [vmem:[#allocation2 + $0x76c] ss:$16 sps:$4 sm:$0xff]  }
 0x198   : > { %2369 = vmatpush1.bf16.msra.mxu0 %v7250_v61  ;;  %2541 = vmatpush1.bf16.msra.mxu1 %v7253_v62  ;;  %v7340_v61 = vld [vmem:[#allocation2 + $0x760] ss:$16 sps:$4 sm:$0xff]   ;;  %v7343_v62 = vld [vmem:[#allocation2 + $0x768] ss:$16 sps:$4 sm:$0xff]  }
 0x199   : > { %2370 = vmatprep.subr.bf16.mxu0 %v7258_v63  ;;  %2542 = vmatprep.subr.bf16.mxu1 %v7261_v0  ;;  %v7348_v63 = vld [vmem:[#allocation2 + $0x784] ss:$16 sps:$4 sm:$0xff]   ;;  %v7351_v0 = vld [vmem:[#allocation2 + $0x78c] ss:$16 sps:$4 sm:$0xff]  }
 0x19c   : > { %2371 = vmatpush1.bf16.msra.mxu0 %v7256_v1  ;;  %2543 = vmatpush1.bf16.msra.mxu1 %v7259_v2  ;;  %v7346_v1 = vld [vmem:[#allocation2 + $0x780] ss:$16 sps:$4 sm:$0xff]   ;;  %v7349_v2 = vld [vmem:[#allocation2 + $0x788] ss:$16 sps:$4 sm:$0xff]  }
 0x19d   : > { %2372 = vmatprep.subr.bf16.mxu0 %v7264_v3  ;;  %2544 = vmatprep.subr.bf16.mxu1 %v7267_v4  ;;  %v7354_v3 = vld [vmem:[#allocation2 + $0x7a4] ss:$16 sps:$4 sm:$0xff]   ;;  %v7357_v4 = vld [vmem:[#allocation2 + $0x7ac] ss:$16 sps:$4 sm:$0xff]  }
 0x1a0   : > { %2373 = vmatpush1.bf16.msra.mxu0 %v7262_v5  ;;  %2545 = vmatpush1.bf16.msra.mxu1 %v7265_v6  ;;  %v7352_v5 = vld [vmem:[#allocation2 + $0x7a0] ss:$16 sps:$4 sm:$0xff]   ;;  %v7355_v6 = vld [vmem:[#allocation2 + $0x7a8] ss:$16 sps:$4 sm:$0xff]  }
 0x1a1   : > { %2374 = vmatprep.subr.bf16.mxu0 %v7270_v7  ;;  %2546 = vmatprep.subr.bf16.mxu1 %v7273_v8  ;;  %v7360_v7 = vld [vmem:[#allocation2 + $0x7c4] ss:$16 sps:$4 sm:$0xff]   ;;  %v7363_v8 = vld [vmem:[#allocation2 + $0x7cc] ss:$16 sps:$4 sm:$0xff]  }
 0x1a4   : > { %2375 = vmatpush1.bf16.msra.mxu0 %v7268_v9  ;;  %2547 = vmatpush1.bf16.msra.mxu1 %v7271_v10  ;;  %v7358_v9 = vld [vmem:[#allocation2 + $0x7c0] ss:$16 sps:$4 sm:$0xff]   ;;  %v7361_v10 = vld [vmem:[#allocation2 + $0x7c8] ss:$16 sps:$4 sm:$0xff]  }
 0x1a5   : > { %2387 = vmatprep.subr.bf16.mxu0 %v7276_v11  ;;  %2559 = vmatprep.subr.bf16.mxu1 %v7279_v12  ;;  %v7366_v11 = vld [vmem:[#allocation2 + $0x7e4] ss:$16 sps:$4 sm:$0xff]   ;;  %v7369_v12 = vld [vmem:[#allocation2 + $0x7ec] ss:$16 sps:$4 sm:$0xff]  }
 0x1a7   : > { %2377 = vmatmul.mubr.bf16.vlgmr.msra.gmra.mrb[0].mxu0 %v6111_v17  ;;  %2549 = vmatmul.mubr.bf16.vlgmr.msra.gmra.mrb[0].mxu1 %v6111_v17  ;;  %v7372_v17 = vld [vmem:[%s8624_s3 + $0x4] ss:$8 sps:$4 sm:$0xff]  }
 0x1a8   : > { %2388 = vmatpush1.bf16.msra.mxu0 %v7274_v13  ;;  %2560 = vmatpush1.bf16.msra.mxu1 %v7277_v16  ;;  %v7364_v13 = vld [vmem:[#allocation2 + $0x7e0] ss:$16 sps:$4 sm:$0xff]   ;;  %v7367_v16 = vld [vmem:[#allocation2 + $0x7e8] ss:$16 sps:$4 sm:$0xff]  }
 0x1a9   : > { %2389 = vmatprep.subr.bf16.mxu0 %v7282_v18  ;;  %2561 = vmatprep.subr.bf16.mxu1 %v7285_v21  ;;  %v6113_v18 = vcombine.low %v8212_v19, %v8215_v20  ;;  %v7370_v21 = vld [vmem:[%s8624_s3] ss:$8 sps:$4 sm:$0xff]   ;;  %v7378_v19 = vld [vmem:[%s8624_s3 + $0x24] ss:$8 sps:$4 sm:$0xff]  }
 0x1aa   : > { %2419 = vmatprep.mubr.bf16.mxu0 %v6114_v24  ;;  %2591 = vmatprep.mubr.bf16.mxu1 %v6114_v24  ;;  %v7376_v20 = vld [vmem:[%s8624_s3 + $0x20] ss:$8 sps:$4 sm:$0xff]   ;;  %v7381_v24 = vld [vmem:[%s8624_s3 + $0x34] ss:$8 sps:$4 sm:$0xff]  }
 0x1ac   : > { %2390 = vmatpush1.bf16.msra.mxu0 %v7280_v22  ;;  %2562 = vmatpush1.bf16.msra.mxu1 %v7283_v23  ;;  %v7375_v22 = vld [vmem:[%s8624_s3 + $0x14] ss:$8 sps:$4 sm:$0xff]   ;;  %v7373_v23 = vld [vmem:[%s8624_s3 + $0x10] ss:$8 sps:$4 sm:$0xff]  }
 0x1ad   : > { %2391 = vmatprep.subr.bf16.mxu0 %v7288_v25  ;;  %2563 = vmatprep.subr.bf16.mxu1 %v7291_v26  ;;  %v7379_v25 = vld [vmem:[%s8624_s3 + $0x30] ss:$8 sps:$4 sm:$0xff]   ;;  %v7384_v26 = vld [vmem:[%s8624_s3 + $0x44] ss:$8 sps:$4 sm:$0xff]  }
 0x1b0   : > { %2392 = vmatpush1.bf16.msra.mxu0 %v7286_v14  ;;  %2564 = vmatpush1.bf16.msra.mxu1 %v7289_v15  ;;  %v7382_v14 = vld [vmem:[%s8624_s3 + $0x40] ss:$8 sps:$4 sm:$0xff]   ;;  %v7387_v15 = vld [vmem:[%s8624_s3 + $0x54] ss:$8 sps:$4 sm:$0xff]  }
 0x1b1   : > { %2393 = vmatprep.subr.bf16.mxu0 %v7294_v27  ;;  %2565 = vmatprep.subr.bf16.mxu1 %v7297_v28  ;;  %v7385_v27 = vld [vmem:[%s8624_s3 + $0x50] ss:$8 sps:$4 sm:$0xff]   ;;  %v7390_v28 = vld [vmem:[%s8624_s3 + $0x64] ss:$8 sps:$4 sm:$0xff]  }
 0x1b4   : > { %2394 = vmatpush1.bf16.msra.mxu0 %v7292_v29  ;;  %2566 = vmatpush1.bf16.msra.mxu1 %v7295_v30  ;;  %v7388_v29 = vld [vmem:[%s8624_s3 + $0x60] ss:$8 sps:$4 sm:$0xff]   ;;  %v7393_v30 = vld [vmem:[%s8624_s3 + $0x74] ss:$8 sps:$4 sm:$0xff]  }
 0x1b5   : > { %2395 = vmatprep.subr.bf16.mxu0 %v7300_v31  ;;  %2567 = vmatprep.subr.bf16.mxu1 %v7303_v32  ;;  %v7391_v31 = vld [vmem:[%s8624_s3 + $0x70] ss:$8 sps:$4 sm:$0xff]   ;;  %v7396_v32 = vld [vmem:[%s8624_s3 + $0x84] ss:$8 sps:$4 sm:$0xff]  }
 0x1b8   : > { %2396 = vmatpush1.bf16.msra.mxu0 %v7298_v33  ;;  %2568 = vmatpush1.bf16.msra.mxu1 %v7301_v34  ;;  %v7394_v33 = vld [vmem:[%s8624_s3 + $0x80] ss:$8 sps:$4 sm:$0xff]   ;;  %v7399_v34 = vld [vmem:[%s8624_s3 + $0x94] ss:$8 sps:$4 sm:$0xff]  }
 0x1b9   : > { %2397 = vmatprep.subr.bf16.mxu0 %v7306_v35  ;;  %2569 = vmatprep.subr.bf16.mxu1 %v7309_v36  ;;  %v7397_v35 = vld [vmem:[%s8624_s3 + $0x90] ss:$8 sps:$4 sm:$0xff]   ;;  %v7402_v36 = vld [vmem:[%s8624_s3 + $0xa4] ss:$8 sps:$4 sm:$0xff]  }
 0x1bc   : > { %2398 = vmatpush1.bf16.msra.mxu0 %v7304_v37  ;;  %2570 = vmatpush1.bf16.msra.mxu1 %v7307_v38  ;;  %v7400_v37 = vld [vmem:[%s8624_s3 + $0xa0] ss:$8 sps:$4 sm:$0xff]   ;;  %v7405_v38 = vld [vmem:[%s8624_s3 + $0xb4] ss:$8 sps:$4 sm:$0xff]  }
 0x1bd   : > { %2399 = vmatprep.subr.bf16.mxu0 %v7312_v39  ;;  %2571 = vmatprep.subr.bf16.mxu1 %v7315_v40  ;;  %v7403_v39 = vld [vmem:[%s8624_s3 + $0xb0] ss:$8 sps:$4 sm:$0xff]   ;;  %v7408_v40 = vld [vmem:[%s8624_s3 + $0xc4] ss:$8 sps:$4 sm:$0xff]  }
 0x1c0   : > { %2400 = vmatpush1.bf16.msra.mxu0 %v7310_v41  ;;  %2572 = vmatpush1.bf16.msra.mxu1 %v7313_v42  ;;  %v7406_v41 = vld [vmem:[%s8624_s3 + $0xc0] ss:$8 sps:$4 sm:$0xff]   ;;  %v7411_v42 = vld [vmem:[%s8624_s3 + $0xd4] ss:$8 sps:$4 sm:$0xff]  }
 0x1c1   : > { %2401 = vmatprep.subr.bf16.mxu0 %v7318_v43  ;;  %2573 = vmatprep.subr.bf16.mxu1 %v7321_v44  ;;  %v7409_v43 = vld [vmem:[%s8624_s3 + $0xd0] ss:$8 sps:$4 sm:$0xff]   ;;  %v7414_v44 = vld [vmem:[%s8624_s3 + $0xe4] ss:$8 sps:$4 sm:$0xff]  }
 0x1c4   : > { %2402 = vmatpush1.bf16.msra.mxu0 %v7316_v45  ;;  %2574 = vmatpush1.bf16.msra.mxu1 %v7319_v46  ;;  %v7412_v45 = vld [vmem:[%s8624_s3 + $0xe0] ss:$8 sps:$4 sm:$0xff]   ;;  %v7417_v46 = vld [vmem:[%s8624_s3 + $0xf4] ss:$8 sps:$4 sm:$0xff]  }
 0x1c5   : > { %2403 = vmatprep.subr.bf16.mxu0 %v7324_v47  ;;  %2575 = vmatprep.subr.bf16.mxu1 %v7327_v48  ;;  %v7415_v47 = vld [vmem:[%s8624_s3 + $0xf0] ss:$8 sps:$4 sm:$0xff]   ;;  %v7420_v48 = vld [vmem:[%s8624_s3 + $0x104] ss:$8 sps:$4 sm:$0xff]  }
 0x1c8   : > { %2404 = vmatpush1.bf16.msra.mxu0 %v7322_v49  ;;  %2576 = vmatpush1.bf16.msra.mxu1 %v7325_v50  ;;  %v918_v49 = vlaneseq }
 0x1c9   : > { %2405 = vmatprep.subr.bf16.mxu0 %v7330_v51  ;;  %2577 = vmatprep.subr.bf16.mxu1 %v7333_v52 }
 0x1ca   : > { %v8321_v50 = vshrl.u32 %v918_v49, 7 }
 0x1cc   : > { %2406 = vmatpush1.bf16.msra.mxu0 %v7328_v53  ;;  %2578 = vmatpush1.bf16.msra.mxu1 %v7331_v54  ;;  %v8324_v51 = vsub.s32 0, %v8321_v50  ;;  %v8327_v52 = vsub.s32 2, %v8321_v50  ;;  %v916_v53 = vld [vmem:[%s8623_s2] sm:$0xf]  ;;  %v8333_v54 = vsub.s32 1, %v8321_v50 }
 0x1cd   : > { %2407 = vmatprep.subr.bf16.mxu0 %v7336_v55  ;;  %2579 = vmatprep.subr.bf16.mxu1 %v7339_v56  ;;  %v8336_v55 = vsub.s32 3, %v8321_v50 }
 0x1ce   : > { %v921_v56 = vrot.slane %v916_v53, %v8324_v51 }
 0x1d0   : > { %2408 = vmatpush1.bf16.msra.mxu0 %v7334_v57  ;;  %2580 = vmatpush1.bf16.msra.mxu1 %v7337_v58  ;;  %v929_v57 = vrot.slane %v916_v53, %v8327_v52  ;;  %v925_v58 = vrot.slane %v916_v53, %v8333_v54 }
 0x1d1   : > { %2409 = vmatprep.subr.bf16.mxu0 %v7342_v59  ;;  %2581 = vmatprep.subr.bf16.mxu1 %v7345_v60  ;;  %v933_v59 = vrot.slane %v916_v53, %v8336_v55  ;;  %v7459_v53 = vld [vmem:[%s8624_s3 + $0x1d4] ss:$8 sps:$4 sm:$0xff]  }
 0x1d4   : > { %2410 = vmatpush1.bf16.msra.mxu0 %v7340_v61  ;;  %2582 = vmatpush1.bf16.msra.mxu1 %v7343_v62 }
 0x1d5   : > { %2411 = vmatprep.subr.bf16.mxu0 %v7348_v63  ;;  %2583 = vmatprep.subr.bf16.mxu1 %v7351_v0 }
 0x1d8   : > { %2412 = vmatpush1.bf16.msra.mxu0 %v7346_v1  ;;  %2584 = vmatpush1.bf16.msra.mxu1 %v7349_v2 }
 0x1d9   : > { %2413 = vmatprep.subr.bf16.mxu0 %v7354_v3  ;;  %2585 = vmatprep.subr.bf16.mxu1 %v7357_v4 }
 0x1dc   : > { %2414 = vmatpush1.bf16.msra.mxu0 %v7352_v5  ;;  %2586 = vmatpush1.bf16.msra.mxu1 %v7355_v6 }
 0x1dd   : > { %2415 = vmatprep.subr.bf16.mxu0 %v7360_v7  ;;  %2587 = vmatprep.subr.bf16.mxu1 %v7363_v8 }
 0x1e0   : > { %2416 = vmatpush1.bf16.msra.mxu0 %v7358_v9  ;;  %2588 = vmatpush1.bf16.msra.mxu1 %v7361_v10 }
 0x1e1   : > { %2417 = vmatprep.subr.bf16.mxu0 %v7366_v11  ;;  %2589 = vmatprep.subr.bf16.mxu1 %v7369_v12 }
 0x1e4   : > { %2418 = vmatpush1.bf16.msra.mxu0 %v7364_v13  ;;  %2590 = vmatpush1.bf16.msra.mxu1 %v7367_v16 }
 0x1e5   : > { %3010 = vmatprep.subr.bf16.mxu0 %v7372_v17 }
 0x1e7   : > { %2420 = vmatmul.mubr.bf16.vlgmr.msra.gmra.mrb[0].mxu0 %v6113_v18  ;;  %2592 = vmatmul.mubr.bf16.vlgmr.msra.gmra.mrb[0].mxu1 %v6113_v18 }
 0x1e8   : > { %3011 = vmatpush1.bf16.msra.mxu0 %v7370_v21 }
 0x1e9   : > { %3012 = vmatprep.subr.bf16.mxu0 %v7375_v22 }
 0x1ec   : > { %3013 = vmatpush1.bf16.msra.mxu0 %v7373_v23 }
 0x1ed   : > { %3014 = vmatprep.subr.bf16.mxu0 %v7378_v19 }
 0x1f0   : > { %3015 = vmatpush1.bf16.msra.mxu0 %v7376_v20 }
 0x1f1   : > { %3016 = vmatprep.subr.bf16.mxu0 %v7381_v24 }
 0x1f4   : > { %3017 = vmatpush1.bf16.msra.mxu0 %v7379_v25 }
 0x1f5   : > { %3018 = vmatprep.subr.bf16.mxu0 %v7384_v26  ;;  %v7418_v26 = vld [vmem:[%s8624_s3 + $0x100] ss:$8 sps:$4 sm:$0xff]  }
 0x1f8   : > { %3019 = vmatpush1.bf16.msra.mxu0 %v7382_v14  ;;  %v7423_v14 = vld [vmem:[%s8624_s3 + $0x114] ss:$8 sps:$4 sm:$0xff]  }
 0x1f9   : > { %3020 = vmatprep.subr.bf16.mxu0 %v7387_v15  ;;  %v7421_v15 = vld [vmem:[%s8624_s3 + $0x110] ss:$8 sps:$4 sm:$0xff]  }
 0x1fc   : > { %3021 = vmatpush1.bf16.msra.mxu0 %v7385_v27  ;;  %v7426_v27 = vld [vmem:[%s8624_s3 + $0x124] ss:$8 sps:$4 sm:$0xff]  }
 0x1fd   : > { %3022 = vmatprep.subr.bf16.mxu0 %v7390_v28  ;;  %v7424_v28 = vld [vmem:[%s8624_s3 + $0x120] ss:$8 sps:$4 sm:$0xff]  }
 0x200   : > { %3023 = vmatpush1.bf16.msra.mxu0 %v7388_v29  ;;  %v7429_v29 = vld [vmem:[%s8624_s3 + $0x134] ss:$8 sps:$4 sm:$0xff]  }
 0x201   : > { %3024 = vmatprep.subr.bf16.mxu0 %v7393_v30  ;;  %v7427_v30 = vld [vmem:[%s8624_s3 + $0x130] ss:$8 sps:$4 sm:$0xff]  }
 0x204   : > { %3025 = vmatpush1.bf16.msra.mxu0 %v7391_v31  ;;  %v7432_v31 = vld [vmem:[%s8624_s3 + $0x144] ss:$8 sps:$4 sm:$0xff]  }
 0x205   : > { %3026 = vmatprep.subr.bf16.mxu0 %v7396_v32  ;;  %v7430_v32 = vld [vmem:[%s8624_s3 + $0x140] ss:$8 sps:$4 sm:$0xff]  }
 0x208   : > { %3027 = vmatpush1.bf16.msra.mxu0 %v7394_v33  ;;  %v7435_v33 = vld [vmem:[%s8624_s3 + $0x154] ss:$8 sps:$4 sm:$0xff]  }
 0x209   : > { %3028 = vmatprep.subr.bf16.mxu0 %v7399_v34  ;;  %v7433_v34 = vld [vmem:[%s8624_s3 + $0x150] ss:$8 sps:$4 sm:$0xff]  }
 0x20c   : > { %3029 = vmatpush1.bf16.msra.mxu0 %v7397_v35  ;;  %v7438_v35 = vld [vmem:[%s8624_s3 + $0x164] ss:$8 sps:$4 sm:$0xff]  }
 0x20d   : > { %3030 = vmatprep.subr.bf16.mxu0 %v7402_v36  ;;  %v7436_v36 = vld [vmem:[%s8624_s3 + $0x160] ss:$8 sps:$4 sm:$0xff]  }
 0x210   : > { %3031 = vmatpush1.bf16.msra.mxu0 %v7400_v37  ;;  %v7441_v37 = vld [vmem:[%s8624_s3 + $0x174] ss:$8 sps:$4 sm:$0xff]  }
 0x211   : > { %3032 = vmatprep.subr.bf16.mxu0 %v7405_v38  ;;  %v7439_v38 = vld [vmem:[%s8624_s3 + $0x170] ss:$8 sps:$4 sm:$0xff]  }
 0x214   : > { %3033 = vmatpush1.bf16.msra.mxu0 %v7403_v39  ;;  %v7444_v39 = vld [vmem:[%s8624_s3 + $0x184] ss:$8 sps:$4 sm:$0xff]  }
 0x215   : > { %3034 = vmatprep.subr.bf16.mxu0 %v7408_v40  ;;  %v7442_v40 = vld [vmem:[%s8624_s3 + $0x180] ss:$8 sps:$4 sm:$0xff]  }
 0x218   : > { %3035 = vmatpush1.bf16.msra.mxu0 %v7406_v41  ;;  %v7447_v41 = vld [vmem:[%s8624_s3 + $0x194] ss:$8 sps:$4 sm:$0xff]  }
 0x219   : > { %3036 = vmatprep.subr.bf16.mxu0 %v7411_v42  ;;  %v7445_v42 = vld [vmem:[%s8624_s3 + $0x190] ss:$8 sps:$4 sm:$0xff]  }
 0x21c   : > { %3037 = vmatpush1.bf16.msra.mxu0 %v7409_v43  ;;  %v7450_v43 = vld [vmem:[%s8624_s3 + $0x1a4] ss:$8 sps:$4 sm:$0xff]  }
 0x21d   : > { %3038 = vmatprep.subr.bf16.mxu0 %v7414_v44  ;;  %v7448_v44 = vld [vmem:[%s8624_s3 + $0x1a0] ss:$8 sps:$4 sm:$0xff]  }
 0x220   : > { %3039 = vmatpush1.bf16.msra.mxu0 %v7412_v45  ;;  %v7453_v45 = vld [vmem:[%s8624_s3 + $0x1b4] ss:$8 sps:$4 sm:$0xff]  }
 0x221   : > { %3040 = vmatprep.subr.bf16.mxu0 %v7417_v46  ;;  %v7451_v46 = vld [vmem:[%s8624_s3 + $0x1b0] ss:$8 sps:$4 sm:$0xff]  }
 0x224   : > { %3041 = vmatpush1.bf16.msra.mxu0 %v7415_v47  ;;  %v7456_v47 = vld [vmem:[%s8624_s3 + $0x1c4] ss:$8 sps:$4 sm:$0xff]  }
 0x225   : > { %3053 = vmatprep.subr.bf16.mxu0 %v7420_v48  ;;  %v7454_v48 = vld [vmem:[%s8624_s3 + $0x1c0] ss:$8 sps:$4 sm:$0xff]  }
 0x2ba   : > { %v2421_v60 = vpop.f32.mrb[0].mxu0  ;;  %v2593_v61 = vpop.f32.mrb[0].mxu1 }
 0x2bb   : > { %v6818_v62 = vadd.f32 %v2421_v60, %v921_v56  ;;  %v6822_v63 = vadd.f32 %v2593_v61, %v929_v57  ;;  %v2423_v0 = vpop.f32.mrb[1].mxu0  ;;  %v2595_v1 = vpop.f32.mrb[1].mxu1  ;;  %v7463_v60 = vld [vmem:[%s8624_s3 + $0x1f0] ss:$8 sps:$4 sm:$0xff]   ;;  %v7466_v61 = vld [vmem:[%s8626_s5 + $0x40] sm:$0xff]  }
 0x2bc   : > { %v6819_v2 = vadd.f32 %v2423_v0, %v925_v58  ;;  %v6823_v3 = vadd.f32 %v2595_v1, %v933_v59  ;;  %v2425_v4 = vpop.f32.mrb[2].mxu0  ;;  %v2597_v5 = vpop.f32.mrb[2].mxu1  ;;  %v7469_v0 = vld [vmem:[%s8626_s5 + $0x8] sm:$0xff]   ;;  %v7470_v1 = vld [vmem:[%s8626_s5 + $0x50] sm:$0xff]  }
 0x2bd   : > { %v6820_v6 = vadd.f32 %v2425_v4, %v921_v56  ;;  %v6824_v7 = vadd.f32 %v2597_v5, %v929_v57  ;;  %v2427_v8 = vpop.f32.mrb[3].mxu0  ;;  %v2599_v9 = vpop.f32.mrb[3].mxu1  ;;  %v2602_v12 = vmax.f32 %v6818_v62, 0.0  ;;  %v2604_v13 = vmax.f32 %v6822_v63, 0.0  ;;  %v7457_v56 = vld [vmem:[%s8624_s3 + $0x1d0] ss:$8 sps:$4 sm:$0xff]  }
 0x2be   : > { %v6821_v10 = vadd.f32 %v2427_v8, %v925_v58  ;;  %v6825_v11 = vadd.f32 %v2599_v9, %v933_v59  ;;  %v2603_v18 = vmax.f32 %v6819_v2, 0.0  ;;  %v2605_v21 = vmax.f32 %v6823_v3, 0.0  ;;  %v7462_v57 = vld [vmem:[%s8624_s3 + $0x1e4] ss:$8 sps:$4 sm:$0xff]   ;;  %v7460_v58 = vld [vmem:[%s8624_s3 + $0x1e0] ss:$8 sps:$4 sm:$0xff]  }
 0x2bf   : > { %v2606_v16 = vmax.f32 %v6820_v6, 0.0  ;;  %v2608_v17 = vmax.f32 %v6824_v7, 0.0  ;;  %v7465_v59 = vld [vmem:[%s8624_s3 + $0x1f4] ss:$8 sps:$4 sm:$0xff]   ;;  %v7467_v62 = vld [vmem:[%s8626_s5] sm:$0xff]   ;;  %v7468_v63 = vld [vmem:[%s8626_s5 + $0x48] sm:$0xff]  }
 0x2c0   : > { %v2607_v22 = vmax.f32 %v6821_v10, 0.0  ;;  %v2609_v23 = vmax.f32 %v6825_v11, 0.0  ;;  %v7471_v2 = vld [vmem:[%s8626_s5 + $0x10] sm:$0xff]   ;;  %v7472_v3 = vld [vmem:[%s8626_s5 + $0x58] sm:$0xff]   ;;  %v7474_v5 = vld [vmem:[%s8626_s5 + $0x60] sm:$0xff]  }
 0x2c1   : > { %v2610_v19 = vpack.c.bf16 %v2606_v16, %v2602_v12  ;;  %v8342_v20 = vpack.c.bf16 %v2608_v17, %v2604_v13  ;;  %v7473_v4 = vld [vmem:[%s8626_s5 + $0x18] sm:$0xff]   ;;  %v7475_v6 = vld [vmem:[%s8626_s5 + $0x20] sm:$0xff]   ;;  %v7476_v7 = vld [vmem:[%s8626_s5 + $0x68] sm:$0xff]  }
 0x2c2   : > { %v2611_v24 = vpack.c.bf16 %v2607_v22, %v2603_v18  ;;  %v2613_v25 = vpack.c.bf16 %v2609_v23, %v2605_v21  ;;  %v7477_v8 = vld [vmem:[%s8626_s5 + $0x28] sm:$0xff]   ;;  %v7478_v9 = vld [vmem:[%s8626_s5 + $0x70] sm:$0xff]   ;;  %v7480_v11 = vld [vmem:[%s8626_s5 + $0x78] sm:$0xff]  }
 0x2c3   : > { %v7479_v10 = vld [vmem:[%s8626_s5 + $0x30] sm:$0xff]   ;;  %v7481_v12 = vld [vmem:[%s8626_s5 + $0x38] sm:$0xff]   ;;  %v2678_v13 = vld [vmem:[%s8625_s4] sm:$0x3] }
 0x2c4   : > { %3042 = vmatprep.mubr.bf16.mxu0 %v2611_v24  ;;  %v2683_v16 = vrot.slane %v2678_v13, %v8324_v51  ;;  %v2687_v17 = vrot.slane %v2678_v13, %v8333_v54  ;;  %v7517_v13 = vld [vmem:[#allocation9 + $0x120] ss:$16 sps:$4 sm:$0xff]  }
 0x2c5   : > { %3043 = vmatmul.mubr.bf16.vlgmr.msra.gmra.mrb[4].mxu0 %v2610_v19 }
 0x2c6   : > { %3054 = vmatpush1.bf16.msra.mxu0 %v7418_v26  ;;  %3085 = vmatprep.mubr.bf16.mxu0 %v2613_v25 }
 0x2c7   : > { %3055 = vmatprep.subr.bf16.mxu0 %v7423_v14 }
 0x2ca   : > { %3056 = vmatpush1.bf16.msra.mxu0 %v7421_v15 }
 0x2cb   : > { %3057 = vmatprep.subr.bf16.mxu0 %v7426_v27 }
 0x2ce   : > { %3058 = vmatpush1.bf16.msra.mxu0 %v7424_v28 }
 0x2cf   : > { %3059 = vmatprep.subr.bf16.mxu0 %v7429_v29 }
 0x2d2   : > { %3060 = vmatpush1.bf16.msra.mxu0 %v7427_v30  ;;  %v7482_v30 = vld [vmem:[%s8628_s7] sm:$0xff]  }
 0x2d3   : > { %3061 = vmatprep.subr.bf16.mxu0 %v7432_v31  ;;  %v7858_v31 = vmov 0.0  }
 0x2d4   : > { %6810 = vmatprep.subr.bf16.mxu1 %v7858_v31  ;;  %6814 = vmatprep.mubr.msk.bf16.mxu1 %vm7859_vm0, %v7858_v31 }
 0x2d5   : > { %6811 = vmatpush3.bf16.msra.mxu1 %v7482_v30 }
 0x2d6   : > { %3062 = vmatpush1.bf16.msra.mxu0 %v7430_v32  ;;  %6812 = vmatprep.subr.bf16.mxu1 %v7858_v31  ;;  %v7483_v32 = vld [vmem:[%s8628_s7 + $0x8] sm:$0xff]  }
 0x2d7   : > { %3063 = vmatprep.subr.bf16.mxu0 %v7435_v33  ;;  %v7486_v33 = vld [vmem:[%s8661_s24 + $0x4] ss:$8 sps:$4 sm:$0xff]  }
 0x2d9   : > { %6813 = vmatpush3.bf16.msra.mxu1 %v7483_v32 }
 0x2da   : > { %3064 = vmatpush1.bf16.msra.mxu0 %v7433_v34  ;;  %3416 = vmatprep.subr.bf16.mxu1 %v7486_v33 }
 0x2db   : > { %3065 = vmatprep.subr.bf16.mxu0 %v7438_v35  ;;  %v6435_v35 = vld [vmem:[#allocation4] ss:$0 sm:$0xff] }
 0x2de   : > { %3066 = vmatpush1.bf16.msra.mxu0 %v7436_v36 }
 0x2df   : > { %3067 = vmatprep.subr.bf16.mxu0 %v7441_v37 }
 0x2e2   : > { %3068 = vmatpush1.bf16.msra.mxu0 %v7439_v38 }
 0x2e3   : > { %3069 = vmatprep.subr.bf16.mxu0 %v7444_v39 }
 0x2e6   : > { %3070 = vmatpush1.bf16.msra.mxu0 %v7442_v40 }
 0x2e7   : > { %3071 = vmatprep.subr.bf16.mxu0 %v7447_v41 }
 0x2ea   : > { %3072 = vmatpush1.bf16.msra.mxu0 %v7445_v42 }
 0x2eb   : > { %3073 = vmatprep.subr.bf16.mxu0 %v7450_v43 }
 0x2ee   : > { %3074 = vmatpush1.bf16.msra.mxu0 %v7448_v44  ;;  %v7484_v44 = vld [vmem:[%s8661_s24] ss:$8 sps:$4 sm:$0xff]  }
 0x2ef   : > { %3075 = vmatprep.subr.bf16.mxu0 %v7453_v45 }
 0x2f2   : > { %3076 = vmatpush1.bf16.msra.mxu0 %v7451_v46 }
 0x2f3   : > { %3077 = vmatprep.subr.bf16.mxu0 %v7456_v47 }
 0x2f6   : > { %3078 = vmatpush1.bf16.msra.mxu0 %v7454_v48  ;;  %v7489_v48 = vld [vmem:[%s8661_s24 + $0x14] ss:$8 sps:$4 sm:$0xff]  }
 0x2f7   : > { %3079 = vmatprep.subr.bf16.mxu0 %v7459_v53  ;;  %v7487_v53 = vld [vmem:[%s8661_s24 + $0x10] ss:$8 sps:$4 sm:$0xff]  }
 0x2fa   : > { %3080 = vmatpush1.bf16.msra.mxu0 %v7457_v56  ;;  %v7860_v56 = vmov 0  }
 0x2fb   : > { %3081 = vmatprep.subr.bf16.mxu0 %v7462_v57 }
 0x2fe   : > { %3082 = vmatpush1.bf16.msra.mxu0 %v7460_v58  ;;  %v7490_v58 = vld [vmem:[#allocation9] ss:$16 sps:$4 sm:$0xff]  }
 0x2ff   : > { %3083 = vmatprep.subr.bf16.mxu0 %v7465_v59  ;;  %v7492_v59 = vld [vmem:[#allocation9 + $0x4] ss:$16 sps:$4 sm:$0xff]  }
 0x302   : > { %3084 = vmatpush1.bf16.msra.mxu0 %v7463_v60  ;;  %v7495_v60 = vld [vmem:[#allocation9 + $0x24] ss:$16 sps:$4 sm:$0xff]  }
 0x303   : > { %6785 = vmatprep.subr.bf16.mxu0 %v7466_v61  ;;  %v7493_v61 = vld [vmem:[#allocation9 + $0x20] ss:$16 sps:$4 sm:$0xff]  }
 0x305   : > { %3086 = vmatmul.mubr.bf16.vlgmr.msra.gmra.mrb[4].mxu0 %v8342_v20 }
 0x306   : > { %6786 = vmatpush3.bf16.msra.mxu0 %v7467_v62  ;;  %v7498_v62 = vld [vmem:[#allocation9 + $0x44] ss:$16 sps:$4 sm:$0xff]  }
 0x307   : > { %6787 = vmatprep.subr.bf16.mxu0 %v7468_v63  ;;  %v7496_v63 = vld [vmem:[#allocation9 + $0x40] ss:$16 sps:$4 sm:$0xff]  }
 0x30a   : > { %6788 = vmatpush3.bf16.msra.mxu0 %v7469_v0  ;;  %v7501_v0 = vld [vmem:[#allocation9 + $0x64] ss:$16 sps:$4 sm:$0xff]  }
 0x30b   : > { %6789 = vmatprep.subr.bf16.mxu0 %v7470_v1  ;;  %v7499_v1 = vld [vmem:[#allocation9 + $0x60] ss:$16 sps:$4 sm:$0xff]  }
 0x30e   : > { %6790 = vmatpush3.bf16.msra.mxu0 %v7471_v2  ;;  %v7504_v2 = vld [vmem:[#allocation9 + $0x84] ss:$16 sps:$4 sm:$0xff]  }
 0x30f   : > { %6791 = vmatprep.subr.bf16.mxu0 %v7472_v3  ;;  %v7502_v3 = vld [vmem:[#allocation9 + $0x80] ss:$16 sps:$4 sm:$0xff]  }
 0x312   : > { %6792 = vmatpush3.bf16.msra.mxu0 %v7473_v4  ;;  %v7507_v4 = vld [vmem:[#allocation9 + $0xa4] ss:$16 sps:$4 sm:$0xff]  }
 0x313   : > { %6793 = vmatprep.subr.bf16.mxu0 %v7474_v5  ;;  %v7505_v5 = vld [vmem:[#allocation9 + $0xa0] ss:$16 sps:$4 sm:$0xff]  }
 0x316   : > { %6794 = vmatpush3.bf16.msra.mxu0 %v7475_v6  ;;  %v7510_v6 = vld [vmem:[#allocation9 + $0xc4] ss:$16 sps:$4 sm:$0xff]  }
 0x317   : > { %6795 = vmatprep.subr.bf16.mxu0 %v7476_v7  ;;  %v7508_v7 = vld [vmem:[#allocation9 + $0xc0] ss:$16 sps:$4 sm:$0xff]  }
 0x31a   : > { %6796 = vmatpush3.bf16.msra.mxu0 %v7477_v8  ;;  %v7513_v8 = vld [vmem:[#allocation9 + $0xe4] ss:$16 sps:$4 sm:$0xff]  }
 0x31b   : > { %6797 = vmatprep.subr.bf16.mxu0 %v7478_v9  ;;  %v7511_v9 = vld [vmem:[#allocation9 + $0xe0] ss:$16 sps:$4 sm:$0xff]  }
 0x31e   : > { %6798 = vmatpush3.bf16.msra.mxu0 %v7479_v10  ;;  %v7516_v10 = vld [vmem:[#allocation9 + $0x104] ss:$16 sps:$4 sm:$0xff]  }
 0x31f   : > { %6799 = vmatprep.subr.bf16.mxu0 %v7480_v11  ;;  %v7514_v11 = vld [vmem:[#allocation9 + $0x100] ss:$16 sps:$4 sm:$0xff]  }
 0x322   : > { %6800 = vmatpush3.bf16.msra.mxu0 %v7481_v12  ;;  %v7519_v12 = vld [vmem:[#allocation9 + $0x124] ss:$16 sps:$4 sm:$0xff]  }
 0x3d8   : > { %v3087_v18 = vpop.f32.mrb[4].mxu0 }
 0x3d9   : > { %v6826_v21 = vadd.f32 %v3087_v18, %v2683_v16  ;;  %v3089_v22 = vpop.f32.mrb[5].mxu0  ;;  %v7525_v18 = vld [vmem:[#allocation9 + $0x164] ss:$16 sps:$4 sm:$0xff]  }
 0x3da   : > { %v6827_v23 = vadd.f32 %v3089_v22, %v2687_v17  ;;  %v3091_v19 = vpop.f32.mrb[6].mxu0  ;;  %v7528_v22 = vld [vmem:[#allocation9 + $0x184] ss:$16 sps:$4 sm:$0xff]  }
 0x3db   : > { %v6828_v20 = vadd.f32 %v3091_v19, %v2683_v16  ;;  %v3093_v24 = vpop.f32.mrb[7].mxu0  ;;  %v3096_v26 = vmax.f32 %v6826_v21, 0.0  ;;  %v7522_v16 = vld [vmem:[#allocation9 + $0x144] ss:$16 sps:$4 sm:$0xff]   ;;  %v7523_v21 = vld [vmem:[#allocation9 + $0x160] ss:$16 sps:$4 sm:$0xff]  }
 0x3dc   : > { %v6829_v25 = vadd.f32 %v3093_v24, %v2687_v17  ;;  %v3097_v15 = vmax.f32 %v6827_v23, 0.0  ;;  %v7520_v17 = vld [vmem:[#allocation9 + $0x140] ss:$16 sps:$4 sm:$0xff]   ;;  %v7531_v19 = vld [vmem:[#allocation9 + $0x1a4] ss:$16 sps:$4 sm:$0xff]  }
 0x3dd   : > { %v3098_v14 = vmax.f32 %v6828_v20, 0.0  ;;  %v7526_v23 = vld [vmem:[#allocation9 + $0x180] ss:$16 sps:$4 sm:$0xff]   ;;  %v7534_v24 = vld [vmem:[#allocation9 + $0x1c4] ss:$16 sps:$4 sm:$0xff]  }
 0x3de   : > { %v3099_v27 = vmax.f32 %v6829_v25, 0.0  ;;  %v7529_v20 = vld [vmem:[#allocation9 + $0x1a0] ss:$16 sps:$4 sm:$0xff]  }
 0x3df   : > { %v3100_v28 = vpack.c.bf16 %v3098_v14, %v3096_v26  ;;  %v7532_v25 = vld [vmem:[#allocation9 + $0x1c0] ss:$16 sps:$4 sm:$0xff]   ;;  %v7537_v26 = vld [vmem:[#allocation9 + $0x1e4] ss:$16 sps:$4 sm:$0xff]  }
 0x3e0   : > { %v3101_v29 = vpack.c.bf16 %v3099_v27, %v3097_v15  ;;  %v7535_v14 = vld [vmem:[#allocation9 + $0x1e0] ss:$16 sps:$4 sm:$0xff]   ;;  %v7540_v15 = vld [vmem:[#allocation9 + $0xc] ss:$16 sps:$4 sm:$0xff]  }
 0x3e2   : > { %3269 = vmatprep.mubr.bf16.mxu0 %v3101_v29 }
 0x3e3   : > { %3270 = vmatmul.mubr.bf16.vlgmr.msra.gmra.mrb[8].mxu0 %v3100_v28  ;;  %v6455_v28 = vld [vmem:[#allocation6] ss:$0 sm:$0xff] }
 0x4b6   : > { %v6801_v34 = vpop.f32.mrb[8].mxu0 }
 0x4b7   : > { %v6802_v36 = vpop.f32.mrb[9].mxu0 }
 0x4b8   : > { %v6803_v37 = vadd.f32 %v6802_v36, %v6801_v34  ;;  %v6804_v38 = vpop.f32.mrb[10].mxu0  ;;  %v3384_v36 = vld [vmem:[#allocation7] sm:$0x3] }
 0x4b9   : > { %v6805_v39 = vpop.f32.mrb[11].mxu0 }
 0x4ba   : > { %v3272_v40 = vadd.f32 %v6803_v37, %v6435_v35  ;;  %v6806_v41 = vadd.f32 %v6805_v39, %v6804_v38 }
 0x4bc   : > { %v3275_v42 = vadd.f32 %v6806_v41, %v6435_v35  ;;  %v3279_v43 = vmul.f32 %v3272_v40, %v3272_v40 }
 0x4be   : > { %v3278_v45 = vpack.c.bf16 %v3275_v42, %v3272_v40  ;;  %v3282_v46 = vsel %vm3281_vm1, %v3279_v43, 0.0  ;;  %v3280_v47 = vmul.f32 %v3275_v42, %v3275_v42  ;;  %v3389_v42 = vrot.slane %v3384_v36, %v8324_v51 }
 0x4bf   : > { %3283 = vadd.xlane.f32.xlu0 %v3282_v46  ;;  %v3393_v43 = vrot.slane %v3384_v36, %v8333_v54  ;;  %v7570_v36 = vld [vmem:[#allocation9 + $0x14c] ss:$16 sps:$4 sm:$0xff]  }
 0x4c0   : > { %6815 = vmatmul.mubr.msk.bf16.vlgmr.msra.gmra.mrb[4].mxu1 %vm3281_vm1, %v3278_v45  ;;  %v3285_v57 = vsel %vm3281_vm1, %v3280_v47, 0.0 }
 0x4c1   : > { %3417 = vmatpush1.bf16.msra.mxu1 %v7484_v44  ;;  %3448 = vmatprep.mubr.bf16.mxu1 %v7860_v56 }
 0x4c2   : > { %3418 = vmatprep.subr.bf16.mxu1 %v7489_v48 }
 0x4c3   : > { %3286 = vadd.xlane.f32.xlu0 %v3285_v57 }
 0x4c5   : > { %3419 = vmatpush1.bf16.msra.mxu1 %v7487_v53 }
 0x4c6   : > { %3871 = vmatprep.subr.bf16.mxu1 %v7492_v59 }
 0x4c8   : > { %6460 = vmatmul.mubr.msk.bf16.vlgmr.msra.gmra.mrb[8].mxu1 %vm3281_vm1, %v3278_v45 }
 0x4c9   : > { %3872 = vmatpush1.bf16.msra.mxu1 %v7490_v58  ;;  %v3366_v58 = vand.u32 127, %v918_v49  ;;  %v7541_v49 = vld [vmem:[#allocation9 + $0x28] ss:$16 sps:$4 sm:$0xff]  }
 0x4ca   : > { %3873 = vmatprep.subr.bf16.mxu1 %v7495_v60 }
 0x4cb   : > { %vm3367_vm2 = vcmp.lt.s32.totalorder %v3366_v58, 10  ;;  %v7574_v58 = vld [vmem:[#allocation9 + $0x188] ss:$16 sps:$4 sm:$0xff]  }
 0x4cd   : > { %3874 = vmatpush1.bf16.msra.mxu1 %v7493_v61 }
 0x4ce   : > { %3875 = vmatprep.subr.bf16.mxu1 %v7498_v62 }
 0x4d1   : > { %3876 = vmatpush1.bf16.msra.mxu1 %v7496_v63 }
 0x4d2   : > { %3877 = vmatprep.subr.bf16.mxu1 %v7501_v0 }
 0x4d5   : > { %3878 = vmatpush1.bf16.msra.mxu1 %v7499_v1 }
 0x4d6   : > { %3879 = vmatprep.subr.bf16.mxu1 %v7504_v2  ;;  %v7538_v2 = vld [vmem:[#allocation9 + $0x8] ss:$16 sps:$4 sm:$0xff]  }
 0x4d9   : > { %3880 = vmatpush1.bf16.msra.mxu1 %v7502_v3 }
 0x4da   : > { %3881 = vmatprep.subr.bf16.mxu1 %v7507_v4  ;;  %v7543_v4 = vld [vmem:[#allocation9 + $0x2c] ss:$16 sps:$4 sm:$0xff]  }
 0x4dd   : > { %3882 = vmatpush1.bf16.msra.mxu1 %v7505_v5 }
 0x4de   : > { %3883 = vmatprep.subr.bf16.mxu1 %v7510_v6 }
 0x4e1   : > { %3884 = vmatpush1.bf16.msra.mxu1 %v7508_v7  ;;  %v7546_v7 = vld [vmem:[#allocation9 + $0x4c] ss:$16 sps:$4 sm:$0xff]  }
 0x4e2   : > { %3885 = vmatprep.subr.bf16.mxu1 %v7513_v8 }
 0x4e5   : > { %3886 = vmatpush1.bf16.msra.mxu1 %v7511_v9  ;;  %v7544_v9 = vld [vmem:[#allocation9 + $0x48] ss:$16 sps:$4 sm:$0xff]  }
 0x4e6   : > { %3887 = vmatprep.subr.bf16.mxu1 %v7516_v10  ;;  %v7549_v10 = vld [vmem:[#allocation9 + $0x6c] ss:$16 sps:$4 sm:$0xff]  }
 0x4e9   : > { %3888 = vmatpush1.bf16.msra.mxu1 %v7514_v11  ;;  %v7547_v11 = vld [vmem:[#allocation9 + $0x68] ss:$16 sps:$4 sm:$0xff]  }
 0x4ea   : > { %3889 = vmatprep.subr.bf16.mxu1 %v7519_v12  ;;  %v7552_v12 = vld [vmem:[#allocation9 + $0x8c] ss:$16 sps:$4 sm:$0xff]  }
 0x4ed   : > { %3890 = vmatpush1.bf16.msra.mxu1 %v7517_v13  ;;  %v7550_v13 = vld [vmem:[#allocation9 + $0x88] ss:$16 sps:$4 sm:$0xff]  }
 0x4ee   : > { %3891 = vmatprep.subr.bf16.mxu1 %v7522_v16  ;;  %v7555_v16 = vld [vmem:[#allocation9 + $0xac] ss:$16 sps:$4 sm:$0xff]  }
 0x4f1   : > { %3892 = vmatpush1.bf16.msra.mxu1 %v7520_v17  ;;  %v7553_v17 = vld [vmem:[#allocation9 + $0xa8] ss:$16 sps:$4 sm:$0xff]  }
 0x4f2   : > { %3893 = vmatprep.subr.bf16.mxu1 %v7525_v18  ;;  %v7558_v18 = vld [vmem:[#allocation9 + $0xcc] ss:$16 sps:$4 sm:$0xff]  }
 0x4f5   : > { %3894 = vmatpush1.bf16.msra.mxu1 %v7523_v21  ;;  %v7556_v21 = vld [vmem:[#allocation9 + $0xc8] ss:$16 sps:$4 sm:$0xff]  }
 0x4f6   : > { %3895 = vmatprep.subr.bf16.mxu1 %v7528_v22  ;;  %v7561_v22 = vld [vmem:[#allocation9 + $0xec] ss:$16 sps:$4 sm:$0xff]  }
 0x4f9   : > { %3896 = vmatpush1.bf16.msra.mxu1 %v7526_v23  ;;  %v7559_v23 = vld [vmem:[#allocation9 + $0xe8] ss:$16 sps:$4 sm:$0xff]  }
 0x4fa   : > { %3897 = vmatprep.subr.bf16.mxu1 %v7531_v19  ;;  %v7564_v19 = vld [vmem:[#allocation9 + $0x10c] ss:$16 sps:$4 sm:$0xff]  }
 0x4fd   : > { %3898 = vmatpush1.bf16.msra.mxu1 %v7529_v20  ;;  %v3969_v20 = vld [vmem:[#allocation12] sm:$0xff] }
 0x4fe   : > { %3899 = vmatprep.subr.bf16.mxu1 %v7534_v24  ;;  %v3973_v24 = vld [vmem:[#allocation12 + $0x20] sm:$0xff] }
 0x501   : > { %3900 = vmatpush1.bf16.msra.mxu1 %v7532_v25  ;;  %v6526_v25 = vcombine.high %v3969_v20, %v3973_v24 }
 0x502   : > { %3901 = vmatprep.subr.bf16.mxu1 %v7537_v26  ;;  %v7562_v26 = vld [vmem:[#allocation9 + $0x108] ss:$16 sps:$4 sm:$0xff]  }
 0x503   : > { %5547 = vmatprep.subr.bf16.mxu0 %v6526_v25 }
 0x505   : > { %3902 = vmatpush1.bf16.msra.mxu1 %v7535_v14  ;;  %v6525_v14 = vcombine.low %v3969_v20, %v3973_v24  ;;  %v3982_v20 = vld [vmem:[#allocation12 + $0x68] sm:$0xff] }
 0x506   : > { %3914 = vmatprep.subr.bf16.mxu1 %v7540_v15  ;;  %v7567_v15 = vld [vmem:[#allocation9 + $0x12c] ss:$16 sps:$4 sm:$0xff]  }
 0x507   : > { %5548 = vmatpush1.bf16.msra.mxu0 %v6525_v14  ;;  %v4049_v14 = vld [vmem:[#allocation12 + $0x280] sm:$0xff] }
 0x54c   : > { %v3284_v27 = vpop.xlane.xlu0 %3283 }
 0x54d   : > { %v3355_v30 = vadd.f32 %v6455_v28, %v3284_v27  ;;  %v3977_v27 = vld [vmem:[#allocation12 + $0x40] sm:$0xff] }
 0x550   : > { %v3287_v29 = vpop.xlane.xlu0 %3286 }
 0x551   : > { %v3356_v32 = vadd.f32 %v6455_v28, %v3287_v29  ;;  %v3981_v28 = vld [vmem:[#allocation12 + $0x60] sm:$0xff] }
 0x552   : > { %v6533_v29 = vcombine.low %v3977_v27, %v3981_v28 }
 0x593   : > { %v3341_v31 = vpop.f32.mrb[4].mxu1 }
 0x594   : > { %v3357_v33 = vsub.f32 %v3355_v30, %v3341_v31  ;;  %v6816_v34 = vpop.f32.mrb[5].mxu1  ;;  %v6534_v30 = vcombine.high %v3977_v27, %v3981_v28  ;;  %v3985_v31 = vld [vmem:[#allocation12 + $0x80] sm:$0xff]  ;;  %v3986_v28 = vld [vmem:[#allocation12 + $0x88] sm:$0xff] }
 0x595   : > { %v3344_v35 = vpop.f32.mrb[6].mxu1 }
 0x596   : > { %v3359_v37 = vmax.f32 %v3357_v33, 0.0  ;;  %v3358_v38 = vsub.f32 %v3356_v32, %v3344_v35  ;;  %v6817_v39 = vpop.f32.mrb[7].mxu1  ;;  %v3989_v32 = vld [vmem:[#allocation12 + $0xa0] sm:$0xff]  ;;  %5549 = vmatprep.subr.bf16.mxu0 %v6534_v30 }
 0x597   : > { %v7565_v33 = vld [vmem:[#allocation9 + $0x128] ss:$16 sps:$4 sm:$0xff]   ;;  %v6542_v34 = vcombine.high %v3985_v31, %v3989_v32  ;;  %5550 = vmatpush1.bf16.msra.mxu0 %v6533_v29  ;;  %v3990_v29 = vld [vmem:[#allocation12 + $0xa8] sm:$0xff] }
 0x598   : > { %v3361_v40 = vadd.f32 1.0, %v3359_v37  ;;  %v3360_v41 = vmax.f32 %v3358_v38, 0.0  ;;  %v3993_v35 = vld [vmem:[#allocation12 + $0xc0] sm:$0xff]  ;;  %v6541_v38 = vcombine.low %v3985_v31, %v3989_v32 }
 0x599   : > { %v3997_v37 = vld [vmem:[#allocation12 + $0xe0] sm:$0xff]  ;;  %5551 = vmatprep.subr.bf16.mxu0 %v6542_v34 }
 0x59a   : > { %7586 = vrcp.f32 %v3361_v40  ;;  %v3362_v44 = vadd.f32 1.0, %v3360_v41  ;;  %v6550_v39 = vcombine.high %v3993_v35, %v3997_v37  ;;  %v7568_v40 = vld [vmem:[#allocation9 + $0x148] ss:$16 sps:$4 sm:$0xff]  }
 0x59b   : > { %v3450_v45 = vpop.f32.mrb[8].mxu1  ;;  %v4001_v41 = vld [vmem:[#allocation12 + $0x100] sm:$0xff]  ;;  %5552 = vmatpush1.bf16.msra.mxu0 %v6541_v38 }
 0x59c   : > { %7588 = vrcp.f32 %v3362_v44  ;;  %v3451_v46 = vadd.f32 %v3450_v45, %v3389_v42  ;;  %v3452_v47 = vpop.f32.mrb[9].mxu1  ;;  %v6549_v44 = vcombine.low %v3993_v35, %v3997_v37  ;;  %5553 = vmatprep.subr.bf16.mxu0 %v6550_v39  ;;  %v4061_v34 = vld [vmem:[#allocation12 + $0x2e0] sm:$0xff]  ;;  %v6544_v35 = vcombine.high %v3986_v28, %v3990_v29  ;;  %v3998_v37 = vld [vmem:[#allocation12 + $0xe8] sm:$0xff] }
 0x59d   : > { %v3453_v48 = vadd.f32 %v3452_v47, %v3393_v43  ;;  %v3454_v53 = vpop.f32.mrb[10].mxu1  ;;  %v4009_v47 = vld [vmem:[#allocation12 + $0x140] sm:$0xff] }
 0x59e   : > { %v3455_v56 = vadd.f32 %v3454_v53, %v3389_v42  ;;  %v3456_v57 = vpop.f32.mrb[11].mxu1  ;;  %v3459_v60 = vmax.f32 %v3451_v46, 0.0  ;;  %v4005_v42 = vld [vmem:[#allocation12 + $0x120] sm:$0xff]  ;;  %v7576_v53 = vld [vmem:[#allocation9 + $0x18c] ss:$16 sps:$4 sm:$0xff]  }
 0x59f   : > { %v3457_v59 = vadd.f32 %v3456_v57, %v3393_v43  ;;  %v3460_v62 = vmax.f32 %v3453_v48, 0.0  ;;  %v7573_v43 = vld [vmem:[#allocation9 + $0x16c] ss:$16 sps:$4 sm:$0xff]   ;;  %v6558_v45 = vcombine.high %v4001_v41, %v4005_v42  ;;  %v7571_v46 = vld [vmem:[#allocation9 + $0x168] ss:$16 sps:$4 sm:$0xff]   ;;  %5554 = vmatpush1.bf16.msra.mxu0 %v6549_v44 }
 0x5a0   : > { %v3461_v61 = vmax.f32 %v3455_v56, 0.0  ;;  %v4013_v48 = vld [vmem:[#allocation12 + $0x160] sm:$0xff]  ;;  %v6557_v56 = vcombine.low %v4001_v41, %v4005_v42  ;;  %v4006_v44 = vld [vmem:[#allocation12 + $0x128] sm:$0xff] }
 0x5a1   : > { %v3462_v63 = vmax.f32 %v3457_v59, 0.0  ;;  %5555 = vmatprep.subr.bf16.mxu0 %v6558_v45  ;;  %v6566_v57 = vcombine.high %v4009_v47, %v4013_v48  ;;  %v4017_v59 = vld [vmem:[#allocation12 + $0x180] sm:$0xff] }
 0x5a2   : > { %v8516_v0 = vpack.c.bf16 %v3461_v61, %v3459_v60  ;;  %v4021_v60 = vld [vmem:[#allocation12 + $0x1a0] sm:$0xff]  ;;  %v7579_v61 = vld [vmem:[#allocation9 + $0x1ac] ss:$16 sps:$4 sm:$0xff]  }
 0x5a3   : > { %v3464_v1 = vpack.c.bf16 %v3462_v63, %v3460_v62  ;;  %5556 = vmatpush1.bf16.msra.mxu0 %v6557_v56  ;;  %v6565_v62 = vcombine.low %v4009_v47, %v4013_v48  ;;  %v6574_v63 = vcombine.high %v4017_v59, %v4021_v60  ;;  %v4065_v41 = vld [vmem:[#allocation12 + $0x300] sm:$0xff] }
 0x5a4   : > { %v7587_v3 = vpop.eup %7586  ;;  %5557 = vmatprep.subr.bf16.mxu0 %v6566_v57  ;;  %v4069_v42 = vld [vmem:[#allocation12 + $0x320] sm:$0xff]  ;;  %v4010_v57 = vld [vmem:[#allocation12 + $0x148] sm:$0xff] }
 0x5a5   : > { %3903 = vmatprep.mubr.bf16.mxu1 %v3464_v1  ;;  %v8518_v5 = vsel %vm3367_vm2, %v7587_v3, 0.0  ;;  %v4029_v3 = vld [vmem:[#allocation12 + $0x1e0] sm:$0xff] }
 0x5a6   : > { %v7589_v6 = vpop.eup %7588  ;;  %3370 = vadd.xlane.f32.xlu1 %v8518_v5  ;;  %3904 = vmatmul.mubr.bf16.vlgmr.msra.gmra.mrb[12].mxu1 %v8516_v0  ;;  %v4073_v48 = vld [vmem:[#allocation12 + $0x340] sm:$0xff] }
 0x5a7   : > { %3915 = vmatpush1.bf16.msra.mxu1 %v7538_v2  ;;  %3946 = vmatprep.mubr.bf16.mxu1 %v3464_v1  ;;  %v8522_v8 = vsel %vm3367_vm2, %v7589_v6, 0.0  ;;  %v7577_v1 = vld [vmem:[#allocation9 + $0x1a8] ss:$16 sps:$4 sm:$0xff]   ;;  %v6573_v6 = vcombine.low %v4017_v59, %v4021_v60  ;;  %v6621_v59 = vcombine.low %v4065_v41, %v4069_v42 }
 0x5a8   : > { %3916 = vmatprep.subr.bf16.mxu1 %v7543_v4  ;;  %v4025_v2 = vld [vmem:[#allocation12 + $0x1c0] sm:$0xff]  ;;  %v7582_v4 = vld [vmem:[#allocation9 + $0x1cc] ss:$16 sps:$4 sm:$0xff]   ;;  %5558 = vmatpush1.bf16.msra.mxu0 %v6565_v62 }
 0x5a9   : > { %5559 = vmatprep.subr.bf16.mxu0 %v6574_v63  ;;  %v4018_v63 = vld [vmem:[#allocation12 + $0x188] sm:$0xff] }
 0x5aa   : > { %3372 = vadd.xlane.f32.xlu1 %v8522_v8 }
 0x5ab   : > { %3917 = vmatpush1.bf16.msra.mxu1 %v7541_v49  ;;  %v6582_v49 = vcombine.high %v4025_v2, %v4029_v3 }
 0x5ac   : > { %3918 = vmatprep.subr.bf16.mxu1 %v7546_v7  ;;  %v7580_v7 = vld [vmem:[#allocation9 + $0x1c8] ss:$16 sps:$4 sm:$0xff]   ;;  %5560 = vmatpush1.bf16.msra.mxu0 %v6573_v6  ;;  %v4026_v6 = vld [vmem:[#allocation12 + $0x1c8] sm:$0xff] }
 0x5ad   : > { %5561 = vmatprep.subr.bf16.mxu0 %v6582_v49  ;;  %v4030_v49 = vld [vmem:[#allocation12 + $0x1e8] sm:$0xff] }
 0x5af   : > { %3919 = vmatpush1.bf16.msra.mxu1 %v7544_v9  ;;  %v4033_v9 = vld [vmem:[#allocation12 + $0x200] sm:$0xff] }
 0x5b0   : > { %3920 = vmatprep.subr.bf16.mxu1 %v7549_v10  ;;  %v4037_v10 = vld [vmem:[#allocation12 + $0x220] sm:$0xff] }
 0x5b1   : > { %v6589_v24 = vcombine.low %v4033_v9, %v4037_v10 }
 0x5b3   : > { %3921 = vmatpush1.bf16.msra.mxu1 %v7547_v11  ;;  %v7585_v11 = vld [vmem:[#allocation9 + $0x1ec] ss:$16 sps:$4 sm:$0xff]  }
 0x5b4   : > { %3922 = vmatprep.subr.bf16.mxu1 %v7552_v12  ;;  %v3970_v12 = vld [vmem:[#allocation12 + $0x8] sm:$0xff] }
 0x5b7   : > { %3923 = vmatpush1.bf16.msra.mxu1 %v7550_v13  ;;  %v3974_v13 = vld [vmem:[#allocation12 + $0x28] sm:$0xff] }
 0x5b8   : > { %3924 = vmatprep.subr.bf16.mxu1 %v7555_v16  ;;  %v6581_v16 = vcombine.low %v4025_v2, %v4029_v3 }
 0x5ba   : > { %5562 = vmatpush1.bf16.msra.mxu0 %v6581_v16  ;;  %v4034_v16 = vld [vmem:[#allocation12 + $0x208] sm:$0xff] }
 0x5bb   : > { %3925 = vmatpush1.bf16.msra.mxu1 %v7553_v17  ;;  %v6590_v17 = vcombine.high %v4033_v9, %v4037_v10  ;;  %v4085_v9 = vld [vmem:[#allocation12 + $0x3a0] sm:$0xff] }
 0x5bc   : > { %3926 = vmatprep.subr.bf16.mxu1 %v7558_v18  ;;  %v7583_v18 = vld [vmem:[#allocation9 + $0x1e8] ss:$16 sps:$4 sm:$0xff]  }
 0x5bd   : > { %5563 = vmatprep.subr.bf16.mxu0 %v6590_v17  ;;  %v4038_v17 = vld [vmem:[#allocation12 + $0x228] sm:$0xff] }
 0x5be   : > { %5564 = vmatpush1.bf16.msra.mxu0 %v6589_v24  ;;  %v4042_v24 = vld [vmem:[#allocation12 + $0x248] sm:$0xff] }
 0x5bf   : > { %3927 = vmatpush1.bf16.msra.mxu1 %v7556_v21  ;;  %v4041_v21 = vld [vmem:[#allocation12 + $0x240] sm:$0xff] }
 0x5c0   : > { %3928 = vmatprep.subr.bf16.mxu1 %v7561_v22  ;;  %v4045_v22 = vld [vmem:[#allocation12 + $0x260] sm:$0xff] }
 0x5c1   : > { %v6598_v25 = vcombine.high %v4041_v21, %v4045_v22  ;;  %v6597_v30 = vcombine.low %v4041_v21, %v4045_v22  ;;  %v4093_v21 = vld [vmem:[#allocation12 + $0x3e0] sm:$0xff] }
 0x5c3   : > { %3929 = vmatpush1.bf16.msra.mxu1 %v7559_v23  ;;  %v6528_v23 = vcombine.high %v3970_v12, %v3974_v13  ;;  %5565 = vmatprep.subr.bf16.mxu0 %v6598_v25  ;;  %v4046_v25 = vld [vmem:[#allocation12 + $0x268] sm:$0xff] }
 0x5c4   : > { %3930 = vmatprep.subr.bf16.mxu1 %v7564_v19  ;;  %v3978_v19 = vld [vmem:[#allocation12 + $0x48] sm:$0xff]  ;;  %5566 = vmatpush1.bf16.msra.mxu0 %v6597_v30 }
 0x5c5   : > { %v6536_v27 = vcombine.high %v3978_v19, %v3982_v20  ;;  %v6535_v32 = vcombine.low %v3978_v19, %v3982_v20  ;;  %v6592_v20 = vcombine.high %v4034_v16, %v4038_v17 }
 0x5c7   : > { %3931 = vmatpush1.bf16.msra.mxu1 %v7562_v26  ;;  %v6527_v26 = vcombine.low %v3970_v12, %v3974_v13  ;;  %v6584_v13 = vcombine.high %v4026_v6, %v4030_v49 }
 0x5c8   : > { %3932 = vmatprep.subr.bf16.mxu1 %v7567_v15  ;;  %v4053_v15 = vld [vmem:[#allocation12 + $0x2a0] sm:$0xff] }
 0x5c9   : > { %v6606_v31 = vcombine.high %v4049_v14, %v4053_v15  ;;  %v6605_v38 = vcombine.low %v4049_v14, %v4053_v15  ;;  %v8528_v14 = vld [vmem:[#allocation12 + $0x420] sm:$0xff]  ;;  %v8530_v15 = vld [vmem:[#allocation12 + $0x408] sm:$0xff] }
 0x5cb   : > { %3933 = vmatpush1.bf16.msra.mxu1 %v7565_v33  ;;  %v4057_v33 = vld [vmem:[#allocation12 + $0x2c0] sm:$0xff]  ;;  %5567 = vmatprep.subr.bf16.mxu0 %v6606_v31 }
 0x5cc   : > { %3934 = vmatprep.subr.bf16.mxu1 %v7570_v36  ;;  %v3994_v36 = vld [vmem:[#allocation12 + $0xc8] sm:$0xff]  ;;  %v6614_v39 = vcombine.high %v4057_v33, %v4061_v34  ;;  %5568 = vmatpush1.bf16.msra.mxu0 %v6605_v38  ;;  %v6613_v45 = vcombine.low %v4057_v33, %v4061_v34 }
 0x5cd   : > { %v6551_v47 = vcombine.low %v3994_v36, %v3998_v37  ;;  %v4050_v33 = vld [vmem:[#allocation12 + $0x288] sm:$0xff] }
 0x5ce   : > { %5569 = vmatprep.subr.bf16.mxu0 %v6614_v39  ;;  %v4054_v34 = vld [vmem:[#allocation12 + $0x2a8] sm:$0xff] }
 0x5cf   : > { %3935 = vmatpush1.bf16.msra.mxu1 %v7568_v40  ;;  %v6543_v40 = vcombine.low %v3986_v28, %v3990_v29  ;;  %v8534_v28 = vld [vmem:[#allocation12 + $0x428] sm:$0xff]  ;;  %v6591_v29 = vcombine.low %v4034_v16, %v4038_v17  ;;  %v6607_v39 = vcombine.low %v4050_v33, %v4054_v34 }
 0x5d0   : > { %3936 = vmatprep.subr.bf16.mxu1 %v7573_v43  ;;  %v4002_v43 = vld [vmem:[#allocation12 + $0x108] sm:$0xff]  ;;  %5570 = vmatpush1.bf16.msra.mxu0 %v6613_v45  ;;  %v6655_v31 = vcombine.low %v8530_v15, %v8534_v28 }
 0x5d1   : > { %v6560_v56 = vcombine.high %v4002_v43, %v4006_v44  ;;  %v4062_v38 = vld [vmem:[#allocation12 + $0x2e8] sm:$0xff] }
 0x5d2   : > { %v4078_v45 = vld [vmem:[#allocation12 + $0x368] sm:$0xff] }
 0x5d3   : > { %3937 = vmatpush1.bf16.msra.mxu1 %v7571_v46  ;;  %v6622_v46 = vcombine.high %v4065_v41, %v4069_v42  ;;  %v4066_v41 = vld [vmem:[#allocation12 + $0x308] sm:$0xff] }
 0x5d4   : > { %3938 = vmatprep.subr.bf16.mxu1 %v7576_v53  ;;  %v4077_v53 = vld [vmem:[#allocation12 + $0x360] sm:$0xff]  ;;  %v4070_v42 = vld [vmem:[#allocation12 + $0x328] sm:$0xff] }
 0x5d5   : > { %5571 = vmatprep.subr.bf16.mxu0 %v6622_v46  ;;  %v6630_v60 = vcombine.high %v4073_v48, %v4077_v53  ;;  %v6629_v2 = vcombine.low %v4073_v48, %v4077_v53  ;;  %v6623_v46 = vcombine.low %v4066_v41, %v4070_v42  ;;  %v4082_v48 = vld [vmem:[#allocation12 + $0x388] sm:$0xff] }
 0x5d6   : > { %5572 = vmatpush1.bf16.msra.mxu0 %v6621_v59  ;;  %v4086_v53 = vld [vmem:[#allocation12 + $0x3a8] sm:$0xff] }
 0x5d7   : > { %3939 = vmatpush1.bf16.msra.mxu1 %v7574_v58  ;;  %v4014_v58 = vld [vmem:[#allocation12 + $0x168] sm:$0xff]  ;;  %5573 = vmatprep.subr.bf16.mxu0 %v6630_v60  ;;  %v6639_v60 = vcombine.low %v4082_v48, %v4086_v53 }
 0x5d8   : > { %3940 = vmatprep.subr.bf16.mxu1 %v7579_v61  ;;  %v6559_v61 = vcombine.low %v4002_v43, %v4006_v44  ;;  %v6568_v62 = vcombine.high %v4010_v57, %v4014_v58  ;;  %v6567_v3 = vcombine.low %v4010_v57, %v4014_v58  ;;  %v6624_v43 = vcombine.high %v4066_v41, %v4070_v42  ;;  %v4074_v44 = vld [vmem:[#allocation12 + $0x348] sm:$0xff] }
 0x5d9   : > { %v6640_v57 = vcombine.high %v4082_v48, %v4086_v53  ;;  %v4090_v58 = vld [vmem:[#allocation12 + $0x3c8] sm:$0xff] }
 0x5da   : > { %5574 = vmatpush1.bf16.msra.mxu0 %v6629_v2  ;;  %v4094_v59 = vld [vmem:[#allocation12 + $0x3e8] sm:$0xff] }
 0x5db   : > { %3941 = vmatpush1.bf16.msra.mxu1 %v7577_v1  ;;  %v4022_v1 = vld [vmem:[#allocation12 + $0x1a8] sm:$0xff] }
 0x5dc   : > { %3942 = vmatprep.subr.bf16.mxu1 %v7582_v4  ;;  %v6576_v4 = vcombine.high %v4018_v63, %v4022_v1 }
 0x5df   : > { %3943 = vmatpush1.bf16.msra.mxu1 %v7580_v7  ;;  %v4081_v7 = vld [vmem:[#allocation12 + $0x380] sm:$0xff] }
 0x5e0   : > { %3944 = vmatprep.subr.bf16.mxu1 %v7585_v11  ;;  %v6638_v10 = vcombine.high %v4081_v7, %v4085_v9  ;;  %v6575_v11 = vcombine.low %v4018_v63, %v4022_v1  ;;  %v6637_v12 = vcombine.low %v4081_v7, %v4085_v9  ;;  %v6656_v63 = vcombine.high %v8530_v15, %v8534_v28  ;;  %v8548_v7 = vld [vmem:[#allocation10] sm:$0xf]  ;;  %v4129_v15 = vld [vmem:[#allocation12 + $0x500] sm:$0xff] }
 0x5e1   : > { %v3534_v9 = vrot.slane %v8548_v7, %v8324_v51  ;;  %v4133_v28 = vld [vmem:[#allocation12 + $0x520] sm:$0xff] }
 0x5e2   : > { %5575 = vmatprep.subr.bf16.mxu0 %v6638_v10  ;;  %v3538_v10 = vrot.slane %v8548_v7, %v8333_v54 }
 0x5e3   : > { %3945 = vmatpush1.bf16.msra.mxu1 %v7583_v18  ;;  %5576 = vmatpush1.bf16.msra.mxu0 %v6637_v12  ;;  %v4089_v18 = vld [vmem:[#allocation12 + $0x3c0] sm:$0xff] }
 0x5e4   : > { %5633 = vmatprep.subr.bf16.mxu1 %v6528_v23  ;;  %v6646_v22 = vcombine.high %v4089_v18, %v4093_v21  ;;  %v6583_v23 = vcombine.low %v4026_v6, %v4030_v49  ;;  %v6645_v19 = vcombine.low %v4089_v18, %v4093_v21 }
 0x5e6   : > { %3947 = vmatmul.mubr.bf16.vlgmr.msra.gmra.mrb[16].mxu1 %v8516_v0  ;;  %v6552_v0 = vcombine.high %v3994_v36, %v3998_v37  ;;  %5577 = vmatprep.subr.bf16.mxu0 %v6646_v22  ;;  %v6608_v36 = vcombine.high %v4050_v33, %v4054_v34  ;;  %v4058_v37 = vld [vmem:[#allocation12 + $0x2c8] sm:$0xff] }
 0x5e7   : > { %5634 = vmatpush1.bf16.msra.mxu1 %v6527_v26  ;;  %5578 = vmatpush1.bf16.msra.mxu0 %v6645_v19  ;;  %v8526_v26 = vld [vmem:[#allocation12 + $0x400] sm:$0xff] }
 0x5e8   : > { %5635 = vmatprep.subr.bf16.mxu1 %v6536_v27  ;;  %v6654_v27 = vcombine.high %v8526_v26, %v8528_v14  ;;  %v6653_v30 = vcombine.low %v8526_v26, %v8528_v14 }
 0x5ea   : > { %5590 = vmatprep.subr.bf16.mxu0 %v6654_v27  ;;  %v4110_v27 = vld [vmem:[#allocation12 + $0x468] sm:$0xff] }
 0x5eb   : > { %5636 = vmatpush1.bf16.msra.mxu1 %v6535_v32  ;;  %v6600_v32 = vcombine.high %v4042_v24, %v4046_v25 }
 0x5ec   : > { %5637 = vmatprep.subr.bf16.mxu1 %v6544_v35  ;;  %v6599_v35 = vcombine.low %v4042_v24, %v4046_v25  ;;  %v4109_v24 = vld [vmem:[#allocation12 + $0x460] sm:$0xff]  ;;  %v4106_v25 = vld [vmem:[#allocation12 + $0x448] sm:$0xff] }
 0x5ed   : > { %v6664_v34 = vcombine.high %v4106_v25, %v4110_v27 }
 0x5ef   : > { %5638 = vmatpush1.bf16.msra.mxu1 %v6543_v40  ;;  %v6616_v40 = vcombine.high %v4058_v37, %v4062_v38 }
 0x5f0   : > { %5639 = vmatprep.subr.bf16.mxu1 %v6552_v0  ;;  %v6615_v0 = vcombine.low %v4058_v37, %v4062_v38  ;;  %v4114_v37 = vld [vmem:[#allocation12 + $0x488] sm:$0xff] }
 0x5f1   : > { %v4118_v38 = vld [vmem:[#allocation12 + $0x4a8] sm:$0xff] }
 0x5f2   : > { %v6672_v42 = vcombine.high %v4114_v37, %v4118_v38 }
 0x5f3   : > { %5640 = vmatpush1.bf16.msra.mxu1 %v6551_v47  ;;  %v6632_v47 = vcombine.high %v4074_v44, %v4078_v45 }
 0x5f4   : > { %5641 = vmatprep.subr.bf16.mxu1 %v6560_v56  ;;  %v6631_v56 = vcombine.low %v4074_v44, %v4078_v45  ;;  %v4122_v44 = vld [vmem:[#allocation12 + $0x4c8] sm:$0xff] }
 0x5f5   : > { %v4126_v45 = vld [vmem:[#allocation12 + $0x4e8] sm:$0xff] }
 0x5f6   : > { %v6680_v14 = vcombine.high %v4122_v44, %v4126_v45  ;;  %v6679_v53 = vcombine.low %v4122_v44, %v4126_v45  ;;  %v4178_v44 = vld [vmem:[#allocation12 + $0x688] sm:$0xff] }
 0x5f7   : > { %5642 = vmatpush1.bf16.msra.mxu1 %v6559_v61  ;;  %v6648_v61 = vcombine.high %v4090_v58, %v4094_v59  ;;  %v4182_v45 = vld [vmem:[#allocation12 + $0x6a8] sm:$0xff] }
 0x5f8   : > { %5643 = vmatprep.subr.bf16.mxu1 %v6568_v62  ;;  %v6647_v62 = vcombine.low %v4090_v58, %v4094_v59  ;;  %v4137_v58 = vld [vmem:[#allocation12 + $0x540] sm:$0xff] }
 0x5f9   : > { %v4141_v59 = vld [vmem:[#allocation12 + $0x560] sm:$0xff] }
 0x5fb   : > { %5644 = vmatpush1.bf16.msra.mxu1 %v6567_v3 }
 0x5fc   : > { %5645 = vmatprep.subr.bf16.mxu1 %v6576_v4 }
 0x5ff   : > { %5646 = vmatpush1.bf16.msra.mxu1 %v6575_v11 }
 0x600   : > { %5647 = vmatprep.subr.bf16.mxu1 %v6584_v13 }
 0x603   : > { %5648 = vmatpush1.bf16.msra.mxu1 %v6583_v23 }
 0x604   : > { %5649 = vmatprep.subr.bf16.mxu1 %v6592_v20 }
 0x607   : > { %5650 = vmatpush1.bf16.msra.mxu1 %v6591_v29 }
 0x608   : > { %5651 = vmatprep.subr.bf16.mxu1 %v6600_v32 }
 0x60b   : > { %5652 = vmatpush1.bf16.msra.mxu1 %v6599_v35  ;;  %v4113_v35 = vld [vmem:[#allocation12 + $0x480] sm:$0xff] }
 0x60c   : > { %5653 = vmatprep.subr.bf16.mxu1 %v6608_v36  ;;  %v4117_v36 = vld [vmem:[#allocation12 + $0x4a0] sm:$0xff] }
 0x60d   : > { %v6670_v41 = vcombine.high %v4113_v35, %v4117_v36 }
 0x60f   : > { %5654 = vmatpush1.bf16.msra.mxu1 %v6607_v39 }
 0x610   : > { %5655 = vmatprep.subr.bf16.mxu1 %v6616_v40  ;;  %v6663_v40 = vcombine.low %v4106_v25, %v4110_v27 }
 0x613   : > { %5656 = vmatpush1.bf16.msra.mxu1 %v6615_v0  ;;  %v4121_v0 = vld [vmem:[#allocation12 + $0x4c0] sm:$0xff] }
 0x614   : > { %5657 = vmatprep.subr.bf16.mxu1 %v6624_v43  ;;  %v4125_v43 = vld [vmem:[#allocation12 + $0x4e0] sm:$0xff] }
 0x615   : > { %v6678_v26 = vcombine.high %v4121_v0, %v4125_v43  ;;  %v6677_v48 = vcombine.low %v4121_v0, %v4125_v43  ;;  %v4177_v0 = vld [vmem:[#allocation12 + $0x680] sm:$0xff] }
 0x616   : > { %v4181_v43 = vld [vmem:[#allocation12 + $0x6a0] sm:$0xff] }
 0x617   : > { %5658 = vmatpush1.bf16.msra.mxu1 %v6623_v46  ;;  %v6669_v46 = vcombine.low %v4113_v35, %v4117_v36  ;;  %v4169_v35 = vld [vmem:[#allocation12 + $0x640] sm:$0xff] }
 0x618   : > { %5659 = vmatprep.subr.bf16.mxu1 %v6632_v47  ;;  %v6671_v47 = vcombine.low %v4114_v37, %v4118_v38  ;;  %v4173_v36 = vld [vmem:[#allocation12 + $0x660] sm:$0xff]  ;;  %v4170_v37 = vld [vmem:[#allocation12 + $0x648] sm:$0xff] }
 0x619   : > { %v4174_v38 = vld [vmem:[#allocation12 + $0x668] sm:$0xff] }
 0x61b   : > { %5660 = vmatpush1.bf16.msra.mxu1 %v6631_v56  ;;  %v6686_v56 = vcombine.high %v4129_v15, %v4133_v28 }
 0x61c   : > { %5661 = vmatprep.subr.bf16.mxu1 %v6640_v57 }
 0x61f   : > { %5662 = vmatpush1.bf16.msra.mxu1 %v6639_v60  ;;  %v4138_v60 = vld [vmem:[#allocation12 + $0x548] sm:$0xff] }
 0x620   : > { %5663 = vmatprep.subr.bf16.mxu1 %v6648_v61  ;;  %v4142_v61 = vld [vmem:[#allocation12 + $0x568] sm:$0xff] }
 0x623   : > { %5664 = vmatpush1.bf16.msra.mxu1 %v6647_v62  ;;  %v6685_v62 = vcombine.low %v4129_v15, %v4133_v28  ;;  %v4185_v15 = vld [vmem:[#allocation12 + $0x6c0] sm:$0xff] }
 0x624   : > { %5676 = vmatprep.subr.bf16.mxu1 %v6656_v63  ;;  %v4189_v28 = vld [vmem:[#allocation12 + $0x6e0] sm:$0xff] }
 0x633   : > { %v3371_v1 = vpop.xlane.xlu1 %3370 }
 0x634   : > { %7590 = vrcp.f32 %v3371_v1  ;;  %v6694_v1 = vcombine.high %v4137_v58, %v4141_v59 }
 0x637   : > { %v3373_v2 = vpop.xlane.xlu1 %3372 }
 0x638   : > { %7592 = vrcp.f32 %v3373_v2  ;;  %v6696_v2 = vcombine.high %v4138_v60, %v4142_v61 }
 0x63e   : > { %v7591_v3 = vpop.eup %7590 }
 0x63f   : > { %v3376_v4 = vmul.f32 %v7591_v3, %v8518_v5  ;;  %v4145_v3 = vld [vmem:[#allocation12 + $0x580] sm:$0xff] }
 0x641   : > { %3378 = vst [vmem:[%s649_s6] sm:$0xff] %v3376_v4  ;;  %v4149_v4 = vld [vmem:[#allocation12 + $0x5a0] sm:$0xff] }
 0x642   : > { %v7593_v6 = vpop.eup %7592 }
 0x643   : > { %v3377_v49 = vmul.f32 %v7593_v6, %v8522_v8  ;;  %v4105_v8 = vld [vmem:[#allocation12 + $0x440] sm:$0xff]  ;;  %v4146_v6 = vld [vmem:[#allocation12 + $0x588] sm:$0xff] }
 0x644   : > { %v6662_v33 = vcombine.high %v4105_v8, %v4109_v24  ;;  %v6661_v39 = vcombine.low %v4105_v8, %v4109_v24  ;;  %v4161_v8 = vld [vmem:[#allocation12 + $0x600] sm:$0xff]  ;;  %v4166_v24 = vld [vmem:[#allocation12 + $0x628] sm:$0xff] }
 0x645   : > { %3379 = vst [vmem:[%s649_s6 + $0x8] sm:$0xff] %v3377_v49  ;;  %v4150_v49 = vld [vmem:[#allocation12 + $0x5a8] sm:$0xff] }
 0x679   : > { %v3905_v11 = vpop.f32.mrb[12].mxu1 }
 0x67a   : > { %v3906_v12 = vadd.f32 %v3905_v11, %v3534_v9  ;;  %v3907_v13 = vpop.f32.mrb[13].mxu1  ;;  %v6702_v11 = vcombine.high %v4145_v3, %v4149_v4 }
 0x67b   : > { %v3908_v16 = vadd.f32 %v3907_v13, %v3538_v10  ;;  %v3909_v17 = vpop.f32.mrb[14].mxu1  ;;  %v4153_v13 = vld [vmem:[#allocation12 + $0x5c0] sm:$0xff] }
 0x67c   : > { %v3910_v18 = vadd.f32 %v3909_v17, %v3534_v9  ;;  %v3911_v5 = vpop.f32.mrb[15].mxu1  ;;  %v3957_v22 = vmax.f32 %v3906_v12, 0.0  ;;  %v6693_v9 = vcombine.low %v4137_v58, %v4141_v59  ;;  %v6704_v12 = vcombine.high %v4146_v6, %v4150_v49  ;;  %v4154_v17 = vld [vmem:[#allocation12 + $0x5c8] sm:$0xff]  ;;  %v4193_v58 = vld [vmem:[#allocation12 + $0x700] sm:$0xff] }
 0x67d   : > { %v3912_v21 = vadd.f32 %v3911_v5, %v3538_v10  ;;  %v3958_v19 = vmax.f32 %v3908_v16, 0.0  ;;  %v6695_v10 = vcombine.low %v4138_v60, %v4142_v61  ;;  %v4157_v16 = vld [vmem:[#allocation12 + $0x5e0] sm:$0xff]  ;;  %v6701_v5 = vcombine.low %v4145_v3, %v4149_v4  ;;  %v4194_v60 = vld [vmem:[#allocation12 + $0x708] sm:$0xff] }
 0x67e   : > { %v3961_v23 = vmax.f32 %v3910_v18, 0.0  ;;  %v4158_v18 = vld [vmem:[#allocation12 + $0x5e8] sm:$0xff]  ;;  %v6709_v25 = vcombine.low %v4153_v13, %v4157_v16  ;;  %v4197_v59 = vld [vmem:[#allocation12 + $0x720] sm:$0xff] }
 0x67f   : > { %v3962_v20 = vmax.f32 %v3912_v21, 0.0  ;;  %v6703_v21 = vcombine.low %v4146_v6, %v4150_v49  ;;  %v6711_v27 = vcombine.low %v4154_v17, %v4158_v18  ;;  %v4198_v61 = vld [vmem:[#allocation12 + $0x728] sm:$0xff]  ;;  %v4201_v3 = vld [vmem:[#allocation12 + $0x740] sm:$0xff] }
 0x680   : > { %v8554_v29 = vpack.c.bf16 %v3961_v23, %v3957_v22  ;;  %v6710_v22 = vcombine.high %v4153_v13, %v4157_v16  ;;  %v6712_v23 = vcombine.high %v4154_v17, %v4158_v18  ;;  %v4205_v4 = vld [vmem:[#allocation12 + $0x760] sm:$0xff]  ;;  %v4202_v6 = vld [vmem:[#allocation12 + $0x748] sm:$0xff] }
 0x681   : > { %v8556_v32 = vpack.c.bf16 %v3962_v20, %v3958_v19  ;;  %v4165_v19 = vld [vmem:[#allocation12 + $0x620] sm:$0xff]  ;;  %v4162_v20 = vld [vmem:[#allocation12 + $0x608] sm:$0xff] }
 0x682   : > { %v4206_v49 = vld [vmem:[#allocation12 + $0x768] sm:$0xff]  ;;  %v4209_v13 = vld [vmem:[#allocation12 + $0x780] sm:$0xff] }
 0x683   : > { %5579 = vmatprep.mubr.bf16.mxu0 %v8556_v32  ;;  %5665 = vmatprep.mubr.bf16.mxu1 %v8556_v32  ;;  %v4213_v16 = vld [vmem:[#allocation12 + $0x7a0] sm:$0xff]  ;;  %v4210_v17 = vld [vmem:[#allocation12 + $0x788] sm:$0xff] }
 0x684   : > { %5580 = vmatmul.mubr.bf16.vlgmr.msra.gmra.mrb[12].mxu0 %v8554_v29  ;;  %5666 = vmatmul.mubr.bf16.vlgmr.msra.gmra.mrb[20].mxu1 %v8554_v29  ;;  %v4214_v18 = vld [vmem:[#allocation12 + $0x7a8] sm:$0xff] }
 0x685   : > { %5591 = vmatpush1.bf16.msra.mxu0 %v6653_v30  ;;  %5677 = vmatpush1.bf16.msra.mxu1 %v6655_v31  ;;  %v4130_v30 = vld [vmem:[#allocation12 + $0x508] sm:$0xff] }
 0x686   : > { %5592 = vmatprep.subr.bf16.mxu0 %v6662_v33  ;;  %5678 = vmatprep.subr.bf16.mxu1 %v6664_v34  ;;  %v4134_v31 = vld [vmem:[#allocation12 + $0x528] sm:$0xff]  ;;  %v6718_v33 = vcombine.high %v4161_v8, %v4165_v19  ;;  %v6720_v34 = vcombine.high %v4162_v20, %v4166_v24 }
 0x687   : > { %v6688_v57 = vcombine.high %v4130_v30, %v4134_v31  ;;  %v6687_v63 = vcombine.low %v4130_v30, %v4134_v31  ;;  %v4186_v30 = vld [vmem:[#allocation12 + $0x6c8] sm:$0xff] }
 0x688   : > { %v4190_v31 = vld [vmem:[#allocation12 + $0x6e8] sm:$0xff] }
 0x689   : > { %5593 = vmatpush1.bf16.msra.mxu0 %v6661_v39  ;;  %5679 = vmatpush1.bf16.msra.mxu1 %v6663_v40  ;;  %v6717_v39 = vcombine.low %v4161_v8, %v4165_v19  ;;  %v6719_v40 = vcombine.low %v4162_v20, %v4166_v24  ;;  %v6768_v8 = vcombine.high %v4210_v17, %v4214_v18  ;;  %v4217_v19 = vld [vmem:[#allocation12 + $0x7c0] sm:$0xff] }
 0x68a   : > { %5594 = vmatprep.subr.bf16.mxu0 %v6670_v41  ;;  %5680 = vmatprep.subr.bf16.mxu1 %v6672_v42  ;;  %v6726_v41 = vcombine.high %v4169_v35, %v4173_v36  ;;  %v6728_v42 = vcombine.high %v4170_v37, %v4174_v38  ;;  %v3546_v20 = vrot.slane %v8548_v7, %v8336_v55  ;;  %v4221_v24 = vld [vmem:[#allocation12 + $0x7e0] sm:$0xff] }
 0x68d   : > { %5595 = vmatpush1.bf16.msra.mxu0 %v6669_v46  ;;  %5681 = vmatpush1.bf16.msra.mxu1 %v6671_v47  ;;  %v6725_v46 = vcombine.low %v4169_v35, %v4173_v36  ;;  %v6727_v47 = vcombine.low %v4170_v37, %v4174_v38  ;;  %v6767_v35 = vcombine.low %v4210_v17, %v4214_v18  ;;  %v4000_v17 = vld [vmem:[#allocation12 + $0xf8] sm:$0xff] }
 0x68e   : > { %5596 = vmatprep.subr.bf16.mxu0 %v6678_v26  ;;  %5682 = vmatprep.subr.bf16.mxu1 %v6680_v14  ;;  %v6734_v26 = vcombine.high %v4177_v0, %v4181_v43  ;;  %v6736_v14 = vcombine.high %v4178_v44, %v4182_v45  ;;  %v6774_v38 = vcombine.high %v4217_v19, %v4221_v24 }
 0x691   : > { %5597 = vmatpush1.bf16.msra.mxu0 %v6677_v48  ;;  %5683 = vmatpush1.bf16.msra.mxu1 %v6679_v53  ;;  %v6733_v48 = vcombine.low %v4177_v0, %v4181_v43  ;;  %v6735_v53 = vcombine.low %v4178_v44, %v4182_v45  ;;  %v3975_v0 = vld [vmem:[#allocation12 + $0x30] sm:$0xff]  ;;  %v3972_v43 = vld [vmem:[#allocation12 + $0x18] sm:$0xff] }
 0x692   : > { %5598 = vmatprep.subr.bf16.mxu0 %v6686_v56  ;;  %5684 = vmatprep.subr.bf16.mxu1 %v6688_v57  ;;  %v6742_v56 = vcombine.high %v4185_v15, %v4189_v28  ;;  %v6744_v57 = vcombine.high %v4186_v30, %v4190_v31 }
 0x695   : > { %5599 = vmatpush1.bf16.msra.mxu0 %v6685_v62  ;;  %5685 = vmatpush1.bf16.msra.mxu1 %v6687_v63  ;;  %v6741_v62 = vcombine.low %v4185_v15, %v4189_v28  ;;  %v6743_v63 = vcombine.low %v4186_v30, %v4190_v31 }
 0x696   : > { %5600 = vmatprep.subr.bf16.mxu0 %v6694_v1  ;;  %5686 = vmatprep.subr.bf16.mxu1 %v6696_v2  ;;  %v6750_v1 = vcombine.high %v4193_v58, %v4197_v59  ;;  %v6752_v2 = vcombine.high %v4194_v60, %v4198_v61 }
 0x699   : > { %5601 = vmatpush1.bf16.msra.mxu0 %v6693_v9  ;;  %5687 = vmatpush1.bf16.msra.mxu1 %v6695_v10  ;;  %v6749_v9 = vcombine.low %v4193_v58, %v4197_v59  ;;  %v6751_v10 = vcombine.low %v4194_v60, %v4198_v61  ;;  %v3980_v58 = vld [vmem:[#allocation12 + $0x58] sm:$0xff] }
 0x69a   : > { %5602 = vmatprep.subr.bf16.mxu0 %v6702_v11  ;;  %5688 = vmatprep.subr.bf16.mxu1 %v6704_v12  ;;  %v6758_v11 = vcombine.high %v4201_v3, %v4205_v4  ;;  %v6760_v12 = vcombine.high %v4202_v6, %v4206_v49  ;;  %v3984_v59 = vld [vmem:[#allocation12 + $0x78] sm:$0xff] }
 0x69d   : > { %5603 = vmatpush1.bf16.msra.mxu0 %v6701_v5  ;;  %5689 = vmatpush1.bf16.msra.mxu1 %v6703_v21  ;;  %v6757_v5 = vcombine.low %v4201_v3, %v4205_v4  ;;  %v6759_v21 = vcombine.low %v4202_v6, %v4206_v49  ;;  %v3991_v3 = vld [vmem:[#allocation12 + $0xb0] sm:$0xff]  ;;  %v3988_v4 = vld [vmem:[#allocation12 + $0x98] sm:$0xff] }
 0x69e   : > { %5604 = vmatprep.subr.bf16.mxu0 %v6710_v22  ;;  %5690 = vmatprep.subr.bf16.mxu1 %v6712_v23  ;;  %v3542_v22 = vrot.slane %v8548_v7, %v8327_v52  ;;  %v6766_v23 = vcombine.high %v4209_v13, %v4213_v16  ;;  %v3976_v7 = vld [vmem:[#allocation12 + $0x38] sm:$0xff] }
 0x69f   : > { %v6532_v30 = vcombine.high %v3972_v43, %v3976_v7  ;;  %v3992_v6 = vld [vmem:[#allocation12 + $0xb8] sm:$0xff] }
 0x6a1   : > { %5605 = vmatpush1.bf16.msra.mxu0 %v6709_v25  ;;  %5691 = vmatpush1.bf16.msra.mxu1 %v6711_v27  ;;  %v4218_v25 = vld [vmem:[#allocation12 + $0x7c8] sm:$0xff] }
 0x6a2   : > { %5606 = vmatprep.subr.bf16.mxu0 %v6718_v33  ;;  %5692 = vmatprep.subr.bf16.mxu1 %v6720_v34  ;;  %v4222_v27 = vld [vmem:[#allocation12 + $0x7e8] sm:$0xff]  ;;  %v6765_v34 = vcombine.low %v4209_v13, %v4213_v16  ;;  %v3999_v13 = vld [vmem:[#allocation12 + $0xf0] sm:$0xff]  ;;  %v3996_v16 = vld [vmem:[#allocation12 + $0xd8] sm:$0xff] }
 0x6a5   : > { %5607 = vmatpush1.bf16.msra.mxu0 %v6717_v39  ;;  %5693 = vmatpush1.bf16.msra.mxu1 %v6719_v40  ;;  %v6776_v39 = vcombine.high %v4218_v25, %v4222_v27  ;;  %v3971_v40 = vld [vmem:[#allocation12 + $0x10] sm:$0xff] }
 0x6a6   : > { %5608 = vmatprep.subr.bf16.mxu0 %v6726_v41  ;;  %5694 = vmatprep.subr.bf16.mxu1 %v6728_v42  ;;  %v6530_v28 = vcombine.high %v3971_v40, %v3975_v0  ;;  %v6529_v61 = vcombine.low %v3971_v40, %v3975_v0  ;;  %v4020_v0 = vld [vmem:[#allocation12 + $0x198] sm:$0xff] }
 0x6a9   : > { %5609 = vmatpush1.bf16.msra.mxu0 %v6725_v46  ;;  %5695 = vmatpush1.bf16.msra.mxu1 %v6727_v47  ;;  %v6773_v47 = vcombine.low %v4217_v19, %v4221_v24  ;;  %v4008_v19 = vld [vmem:[#allocation12 + $0x138] sm:$0xff]  ;;  %v6555_v24 = vcombine.low %v3996_v16, %v4000_v17 }
 0x6aa   : > { %5610 = vmatprep.subr.bf16.mxu0 %v6734_v26  ;;  %5696 = vmatprep.subr.bf16.mxu1 %v6736_v14  ;;  %v6775_v26 = vcombine.low %v4218_v25, %v4222_v27 }
 0x6ad   : > { %5611 = vmatpush1.bf16.msra.mxu0 %v6733_v48  ;;  %5697 = vmatpush1.bf16.msra.mxu1 %v6735_v53  ;;  %v3979_v53 = vld [vmem:[#allocation12 + $0x50] sm:$0xff] }
 0x6ae   : > { %5612 = vmatprep.subr.bf16.mxu0 %v6742_v56  ;;  %5698 = vmatprep.subr.bf16.mxu1 %v6744_v57  ;;  %v3983_v57 = vld [vmem:[#allocation12 + $0x70] sm:$0xff] }
 0x6af   : > { %v6537_v49 = vcombine.low %v3979_v53, %v3983_v57 }
 0x6b1   : > { %5613 = vmatpush1.bf16.msra.mxu0 %v6741_v62  ;;  %5699 = vmatpush1.bf16.msra.mxu1 %v6743_v63  ;;  %v6531_v62 = vcombine.low %v3972_v43, %v3976_v7  ;;  %v6538_v63 = vcombine.high %v3979_v53, %v3983_v57  ;;  %v4024_v43 = vld [vmem:[#allocation12 + $0x1b8] sm:$0xff]  ;;  %v4035_v53 = vld [vmem:[#allocation12 + $0x210] sm:$0xff] }
 0x6b2   : > { %5614 = vmatprep.subr.bf16.mxu0 %v6750_v1  ;;  %5700 = vmatprep.subr.bf16.mxu1 %v6752_v2  ;;  %v6540_v1 = vcombine.high %v3980_v58, %v3984_v59  ;;  %v3987_v2 = vld [vmem:[#allocation12 + $0x90] sm:$0xff] }
 0x6b3   : > { %v6545_v18 = vcombine.low %v3987_v2, %v3991_v3  ;;  %v4039_v57 = vld [vmem:[#allocation12 + $0x230] sm:$0xff] }
 0x6b5   : > { %5615 = vmatpush1.bf16.msra.mxu0 %v6749_v9  ;;  %5701 = vmatpush1.bf16.msra.mxu1 %v6751_v10  ;;  %v6539_v9 = vcombine.low %v3980_v58, %v3984_v59  ;;  %v6546_v10 = vcombine.high %v3987_v2, %v3991_v3  ;;  %v4036_v58 = vld [vmem:[#allocation12 + $0x218] sm:$0xff]  ;;  %v4043_v2 = vld [vmem:[#allocation12 + $0x250] sm:$0xff] }
 0x6b6   : > { %5616 = vmatprep.subr.bf16.mxu0 %v6758_v11  ;;  %5702 = vmatprep.subr.bf16.mxu1 %v6760_v12  ;;  %v6548_v11 = vcombine.high %v3988_v4, %v3992_v6  ;;  %v3995_v12 = vld [vmem:[#allocation12 + $0xd0] sm:$0xff]  ;;  %v4040_v59 = vld [vmem:[#allocation12 + $0x238] sm:$0xff] }
 0x6b7   : > { %v4047_v3 = vld [vmem:[#allocation12 + $0x270] sm:$0xff] }
 0x6b9   : > { %v3948_v33 = vpop.f32.mrb[16].mxu1  ;;  %5617 = vmatpush1.bf16.msra.mxu0 %v6757_v5  ;;  %5703 = vmatpush1.bf16.msra.mxu1 %v6759_v21  ;;  %v6547_v5 = vcombine.low %v3988_v4, %v3992_v6  ;;  %v6554_v21 = vcombine.high %v3995_v12, %v3999_v13  ;;  %v4044_v4 = vld [vmem:[#allocation12 + $0x258] sm:$0xff] }
 0x6ba   : > { %v3949_v36 = vadd.f32 %v3948_v33, %v3542_v22  ;;  %v3950_v37 = vpop.f32.mrb[17].mxu1  ;;  %5618 = vmatprep.subr.bf16.mxu0 %v6766_v23  ;;  %5704 = vmatprep.subr.bf16.mxu1 %v6768_v8  ;;  %v4003_v23 = vld [vmem:[#allocation12 + $0x110] sm:$0xff]  ;;  %v4048_v6 = vld [vmem:[#allocation12 + $0x278] sm:$0xff] }
 0x6bb   : > { %v3951_v41 = vadd.f32 %v3950_v37, %v3546_v20  ;;  %v3952_v42 = vpop.f32.mrb[18].mxu1  ;;  %v4007_v8 = vld [vmem:[#allocation12 + $0x130] sm:$0xff] }
 0x6bc   : > { %v3953_v44 = vadd.f32 %v3952_v42, %v3542_v22  ;;  %v3954_v45 = vpop.f32.mrb[19].mxu1  ;;  %v3959_v14 = vmax.f32 %v3949_v36, 0.0  ;;  %v6556_v22 = vcombine.high %v3996_v16, %v4000_v17  ;;  %v6562_v25 = vcombine.high %v4003_v23, %v4007_v8  ;;  %v4011_v33 = vld [vmem:[#allocation12 + $0x150] sm:$0xff]  ;;  %v4016_v36 = vld [vmem:[#allocation12 + $0x178] sm:$0xff] }
 0x6bd   : > { %v3955_v46 = vadd.f32 %v3954_v45, %v3546_v20  ;;  %5619 = vmatpush1.bf16.msra.mxu0 %v6765_v34  ;;  %5705 = vmatpush1.bf16.msra.mxu1 %v6767_v35  ;;  %v3960_v31 = vmax.f32 %v3951_v41, 0.0  ;;  %v6553_v20 = vcombine.low %v3995_v12, %v3999_v13  ;;  %v4015_v34 = vld [vmem:[#allocation12 + $0x170] sm:$0xff]  ;;  %v4012_v35 = vld [vmem:[#allocation12 + $0x158] sm:$0xff]  ;;  %v6561_v37 = vcombine.low %v4003_v23, %v4007_v8 }
 0x6be   : > { %v3963_v15 = vmax.f32 %v3953_v44, 0.0  ;;  %5620 = vmatprep.subr.bf16.mxu0 %v6774_v38  ;;  %5706 = vmatprep.subr.bf16.mxu1 %v6776_v39  ;;  %v6570_v39 = vcombine.high %v4011_v33, %v4015_v34  ;;  %v6572_v40 = vcombine.high %v4012_v35, %v4016_v36  ;;  %v4019_v41 = vld [vmem:[#allocation12 + $0x190] sm:$0xff]  ;;  %v6569_v7 = vcombine.low %v4011_v33, %v4015_v34  ;;  %v4052_v16 = vld [vmem:[#allocation12 + $0x298] sm:$0xff] }
 0x6bf   : > { %v3964_v48 = vmax.f32 %v3955_v46, 0.0  ;;  %v4023_v42 = vld [vmem:[#allocation12 + $0x1b0] sm:$0xff]  ;;  %v6571_v44 = vcombine.low %v4012_v35, %v4016_v36  ;;  %v6580_v46 = vcombine.high %v4020_v0, %v4024_v43  ;;  %v4056_v17 = vld [vmem:[#allocation12 + $0x2b8] sm:$0xff] }
 0x6c0   : > { %v8572_v56 = vpack.c.bf16 %v3963_v15, %v3959_v14  ;;  %v6578_v45 = vcombine.high %v4019_v41, %v4023_v42  ;;  %v4028_v14 = vld [vmem:[#allocation12 + $0x1d8] sm:$0xff]  ;;  %v4051_v12 = vld [vmem:[#allocation12 + $0x290] sm:$0xff] }
 0x6c1   : > { %v8574_v60 = vpack.c.bf16 %v3964_v48, %v3960_v31  ;;  %5621 = vmatpush1.bf16.msra.mxu0 %v6773_v47  ;;  %5707 = vmatpush1.bf16.msra.mxu1 %v6775_v26  ;;  %v4027_v47 = vld [vmem:[#allocation12 + $0x1d0] sm:$0xff]  ;;  %v4032_v15 = vld [vmem:[#allocation12 + $0x1f8] sm:$0xff] }
 0x6c2   : > { %5719 = vmatprep.subr.bf16.mxu0 %v6530_v28  ;;  %5805 = vmatprep.subr.bf16.mxu1 %v6532_v30  ;;  %v4031_v26 = vld [vmem:[#allocation12 + $0x1f0] sm:$0xff]  ;;  %v6577_v28 = vcombine.low %v4019_v41, %v4023_v42  ;;  %v6579_v30 = vcombine.low %v4020_v0, %v4024_v43  ;;  %v6588_v48 = vcombine.high %v4028_v14, %v4032_v15  ;;  %v4068_v35 = vld [vmem:[#allocation12 + $0x318] sm:$0xff] }
 0x6c3   : > { %5622 = vmatprep.mubr.bf16.mxu0 %v8574_v60  ;;  %5708 = vmatprep.mubr.bf16.mxu1 %v8574_v60  ;;  %v6586_v31 = vcombine.high %v4027_v47, %v4031_v26  ;;  %v4055_v13 = vld [vmem:[#allocation12 + $0x2b0] sm:$0xff]  ;;  %v4072_v36 = vld [vmem:[#allocation12 + $0x338] sm:$0xff] }
 0x6c4   : > { %5623 = vmatmul.mubr.bf16.vlgmr.msra.gmra.mrb[12].mxu0 %v8572_v56  ;;  %5709 = vmatmul.mubr.bf16.vlgmr.msra.gmra.mrb[20].mxu1 %v8572_v56  ;;  %v4059_v23 = vld [vmem:[#allocation12 + $0x2d0] sm:$0xff]  ;;  %v4076_v0 = vld [vmem:[#allocation12 + $0x358] sm:$0xff] }
 0x6c5   : > { %5720 = vmatpush1.bf16.msra.mxu0 %v6529_v61  ;;  %5751 = vmatprep.mubr.bf16.mxu0 %v8556_v32  ;;  %v6585_v61 = vcombine.low %v4027_v47, %v4031_v26  ;;  %v4063_v8 = vld [vmem:[#allocation12 + $0x2f0] sm:$0xff]  ;;  %v4080_v43 = vld [vmem:[#allocation12 + $0x378] sm:$0xff] }
 0x6c6   : > { %5806 = vmatpush1.bf16.msra.mxu1 %v6531_v62  ;;  %5837 = vmatprep.mubr.bf16.mxu1 %v8556_v32  ;;  %v4004_v32 = vld [vmem:[#allocation12 + $0x118] sm:$0xff]  ;;  %v6587_v62 = vcombine.low %v4028_v14, %v4032_v15  ;;  %v4067_v33 = vld [vmem:[#allocation12 + $0x310] sm:$0xff] }
 0x6c7   : > { %5721 = vmatprep.subr.bf16.mxu0 %v6538_v63  ;;  %5807 = vmatprep.subr.bf16.mxu1 %v6540_v1  ;;  %v6564_v27 = vcombine.high %v4004_v32, %v4008_v19  ;;  %v6563_v38 = vcombine.low %v4004_v32, %v4008_v19  ;;  %v6594_v63 = vcombine.high %v4035_v53, %v4039_v57  ;;  %v4060_v32 = vld [vmem:[#allocation12 + $0x2d8] sm:$0xff]  ;;  %v4071_v34 = vld [vmem:[#allocation12 + $0x330] sm:$0xff] }
 0x6c8   : > { %v6596_v1 = vcombine.high %v4036_v58, %v4040_v59  ;;  %v4064_v19 = vld [vmem:[#allocation12 + $0x2f8] sm:$0xff]  ;;  %v4075_v41 = vld [vmem:[#allocation12 + $0x350] sm:$0xff] }
 0x6c9   : > { %5722 = vmatpush1.bf16.msra.mxu0 %v6537_v49  ;;  %v6593_v49 = vcombine.low %v4035_v53, %v4039_v57  ;;  %v4079_v42 = vld [vmem:[#allocation12 + $0x370] sm:$0xff]  ;;  %v4084_v14 = vld [vmem:[#allocation12 + $0x398] sm:$0xff] }
 0x6ca   : > { %5808 = vmatpush1.bf16.msra.mxu1 %v6539_v9  ;;  %5723 = vmatprep.subr.bf16.mxu0 %v6546_v10  ;;  %v6595_v9 = vcombine.low %v4036_v58, %v4040_v59  ;;  %v6602_v10 = vcombine.high %v4043_v2, %v4047_v3  ;;  %v4083_v47 = vld [vmem:[#allocation12 + $0x390] sm:$0xff]  ;;  %v4088_v15 = vld [vmem:[#allocation12 + $0x3b8] sm:$0xff] }
 0x6cb   : > { %5809 = vmatprep.subr.bf16.mxu1 %v6548_v11  ;;  %v6604_v11 = vcombine.high %v4044_v4, %v4048_v6  ;;  %v4087_v26 = vld [vmem:[#allocation12 + $0x3b0] sm:$0xff]  ;;  %v4092_v58 = vld [vmem:[#allocation12 + $0x3d8] sm:$0xff] }
 0x6cc   : > { %v4091_v53 = vld [vmem:[#allocation12 + $0x3d0] sm:$0xff]  ;;  %v4096_v59 = vld [vmem:[#allocation12 + $0x3f8] sm:$0xff] }
 0x6cd   : > { %5724 = vmatpush1.bf16.msra.mxu0 %v6545_v18  ;;  %v6601_v18 = vcombine.low %v4043_v2, %v4047_v3  ;;  %v4095_v57 = vld [vmem:[#allocation12 + $0x3f0] sm:$0xff] }
 0x6ce   : > { %5810 = vmatpush1.bf16.msra.mxu1 %v6547_v5  ;;  %5725 = vmatprep.subr.bf16.mxu0 %v6554_v21  ;;  %v6603_v5 = vcombine.low %v4044_v4, %v4048_v6  ;;  %v6610_v21 = vcombine.high %v4051_v12, %v4055_v13  ;;  %v4099_v2 = vld [vmem:[#allocation12 + $0x410] sm:$0xff]  ;;  %v4100_v4 = vld [vmem:[#allocation12 + $0x418] sm:$0xff] }
 0x6cf   : > { %5811 = vmatprep.subr.bf16.mxu1 %v6556_v22  ;;  %v6612_v22 = vcombine.high %v4052_v16, %v4056_v17  ;;  %v4103_v3 = vld [vmem:[#allocation12 + $0x430] sm:$0xff]  ;;  %v4104_v6 = vld [vmem:[#allocation12 + $0x438] sm:$0xff] }
 0x6d1   : > { %5726 = vmatpush1.bf16.msra.mxu0 %v6553_v20  ;;  %v6609_v20 = vcombine.low %v4051_v12, %v4055_v13  ;;  %v4107_v12 = vld [vmem:[#allocation12 + $0x450] sm:$0xff] }
 0x6d2   : > { %5812 = vmatpush1.bf16.msra.mxu1 %v6555_v24  ;;  %5727 = vmatprep.subr.bf16.mxu0 %v6562_v25  ;;  %v6611_v24 = vcombine.low %v4052_v16, %v4056_v17  ;;  %v6618_v25 = vcombine.high %v4059_v23, %v4063_v8  ;;  %v4111_v13 = vld [vmem:[#allocation12 + $0x470] sm:$0xff]  ;;  %v6657_v16 = vcombine.low %v4099_v2, %v4103_v3  ;;  %v4108_v17 = vld [vmem:[#allocation12 + $0x458] sm:$0xff] }
 0x6d3   : > { %5813 = vmatprep.subr.bf16.mxu1 %v6564_v27  ;;  %v6620_v27 = vcombine.high %v4060_v32, %v4064_v19 }
 0x6d5   : > { %5728 = vmatpush1.bf16.msra.mxu0 %v6561_v37  ;;  %v6617_v37 = vcombine.low %v4059_v23, %v4063_v8  ;;  %v4119_v23 = vld [vmem:[#allocation12 + $0x4b0] sm:$0xff] }
 0x6d6   : > { %5814 = vmatpush1.bf16.msra.mxu1 %v6563_v38  ;;  %5729 = vmatprep.subr.bf16.mxu0 %v6570_v39  ;;  %v6619_v38 = vcombine.low %v4060_v32, %v4064_v19  ;;  %v6626_v39 = vcombine.high %v4067_v33, %v4071_v34  ;;  %v4116_v32 = vld [vmem:[#allocation12 + $0x498] sm:$0xff] }
 0x6d7   : > { %5815 = vmatprep.subr.bf16.mxu1 %v6572_v40  ;;  %v6628_v40 = vcombine.high %v4068_v35, %v4072_v36  ;;  %v4120_v19 = vld [vmem:[#allocation12 + $0x4b8] sm:$0xff] }
 0x6d9   : > { %5730 = vmatpush1.bf16.msra.mxu0 %v6569_v7  ;;  %v6625_v7 = vcombine.low %v4067_v33, %v4071_v34  ;;  %v4123_v33 = vld [vmem:[#allocation12 + $0x4d0] sm:$0xff] }
 0x6da   : > { %5816 = vmatpush1.bf16.msra.mxu1 %v6571_v44  ;;  %5731 = vmatprep.subr.bf16.mxu0 %v6578_v45  ;;  %v6627_v44 = vcombine.low %v4068_v35, %v4072_v36  ;;  %v6634_v45 = vcombine.high %v4075_v41, %v4079_v42  ;;  %v4127_v34 = vld [vmem:[#allocation12 + $0x4f0] sm:$0xff]  ;;  %v4124_v35 = vld [vmem:[#allocation12 + $0x4d8] sm:$0xff] }
 0x6db   : > { %5817 = vmatprep.subr.bf16.mxu1 %v6580_v46  ;;  %v6636_v46 = vcombine.high %v4076_v0, %v4080_v43  ;;  %v4128_v36 = vld [vmem:[#allocation12 + $0x4f8] sm:$0xff] }
 0x6dd   : > { %5732 = vmatpush1.bf16.msra.mxu0 %v6577_v28  ;;  %v6633_v28 = vcombine.low %v4075_v41, %v4079_v42  ;;  %v4135_v41 = vld [vmem:[#allocation12 + $0x530] sm:$0xff]  ;;  %v4132_v42 = vld [vmem:[#allocation12 + $0x518] sm:$0xff] }
 0x6de   : > { %5818 = vmatpush1.bf16.msra.mxu1 %v6579_v30  ;;  %5733 = vmatprep.subr.bf16.mxu0 %v6586_v31  ;;  %v6635_v30 = vcombine.low %v4076_v0, %v4080_v43  ;;  %v6642_v31 = vcombine.high %v4083_v47, %v4087_v26  ;;  %v4136_v0 = vld [vmem:[#allocation12 + $0x538] sm:$0xff]  ;;  %v6683_v43 = vcombine.low %v4124_v35, %v4128_v36 }
 0x6df   : > { %5819 = vmatprep.subr.bf16.mxu1 %v6588_v48  ;;  %v6644_v48 = vcombine.high %v4084_v14, %v4088_v15 }
 0x6e1   : > { %5734 = vmatpush1.bf16.msra.mxu0 %v6585_v61  ;;  %v6641_v61 = vcombine.low %v4083_v47, %v4087_v26  ;;  %v4140_v47 = vld [vmem:[#allocation12 + $0x558] sm:$0xff] }
 0x6e2   : > { %5820 = vmatpush1.bf16.msra.mxu1 %v6587_v62  ;;  %5735 = vmatprep.subr.bf16.mxu0 %v6594_v63  ;;  %v6643_v62 = vcombine.low %v4084_v14, %v4088_v15  ;;  %v6650_v63 = vcombine.high %v4091_v53, %v4095_v57  ;;  %v4144_v26 = vld [vmem:[#allocation12 + $0x578] sm:$0xff]  ;;  %v6691_v15 = vcombine.low %v4132_v42, %v4136_v0 }
 0x6e3   : > { %5821 = vmatprep.subr.bf16.mxu1 %v6596_v1  ;;  %v6652_v1 = vcombine.high %v4092_v58, %v4096_v59 }
 0x6e5   : > { %5736 = vmatpush1.bf16.msra.mxu0 %v6593_v49  ;;  %v6649_v49 = vcombine.low %v4091_v53, %v4095_v57  ;;  %v4148_v53 = vld [vmem:[#allocation12 + $0x598] sm:$0xff] }
 0x6e6   : > { %5822 = vmatpush1.bf16.msra.mxu1 %v6595_v9  ;;  %5737 = vmatprep.subr.bf16.mxu0 %v6602_v10  ;;  %v6651_v9 = vcombine.low %v4092_v58, %v4096_v59  ;;  %v6658_v10 = vcombine.high %v4099_v2, %v4103_v3  ;;  %v4152_v57 = vld [vmem:[#allocation12 + $0x5b8] sm:$0xff]  ;;  %v6699_v59 = vcombine.low %v4140_v47, %v4144_v26 }
 0x6e7   : > { %5823 = vmatprep.subr.bf16.mxu1 %v6604_v11  ;;  %v6660_v11 = vcombine.high %v4100_v4, %v4104_v6  ;;  %v4156_v2 = vld [vmem:[#allocation12 + $0x5d8] sm:$0xff] }
 0x6e8   : > { %v4160_v3 = vld [vmem:[#allocation12 + $0x5f8] sm:$0xff] }
 0x6e9   : > { %5738 = vmatpush1.bf16.msra.mxu0 %v6601_v18  ;;  %v4112_v18 = vld [vmem:[#allocation12 + $0x478] sm:$0xff] }
 0x6ea   : > { %5824 = vmatpush1.bf16.msra.mxu1 %v6603_v5  ;;  %5739 = vmatprep.subr.bf16.mxu0 %v6610_v21  ;;  %v6659_v5 = vcombine.low %v4100_v4, %v4104_v6  ;;  %v6666_v21 = vcombine.high %v4107_v12, %v4111_v13  ;;  %v6668_v8 = vcombine.high %v4108_v17, %v4112_v18 }
 0x6eb   : > { %5825 = vmatprep.subr.bf16.mxu1 %v6612_v22  ;;  %v4115_v22 = vld [vmem:[#allocation12 + $0x490] sm:$0xff]  ;;  %v6707_v6 = vcombine.low %v4148_v53, %v4152_v57 }
 0x6ed   : > { %5740 = vmatpush1.bf16.msra.mxu0 %v6609_v20  ;;  %v6665_v20 = vcombine.low %v4107_v12, %v4111_v13  ;;  %v4164_v12 = vld [vmem:[#allocation12 + $0x618] sm:$0xff] }
 0x6ee   : > { %5826 = vmatpush1.bf16.msra.mxu1 %v6611_v24  ;;  %5741 = vmatprep.subr.bf16.mxu0 %v6618_v25  ;;  %v6667_v24 = vcombine.low %v4108_v17, %v4112_v18  ;;  %v6674_v25 = vcombine.high %v4115_v22, %v4119_v23  ;;  %v4168_v13 = vld [vmem:[#allocation12 + $0x638] sm:$0xff]  ;;  %v6715_v17 = vcombine.low %v4156_v2, %v4160_v3 }
 0x6ef   : > { %5827 = vmatprep.subr.bf16.mxu1 %v6620_v27  ;;  %v6676_v27 = vcombine.high %v4116_v32, %v4120_v19 }
 0x6f1   : > { %5742 = vmatpush1.bf16.msra.mxu0 %v6617_v37  ;;  %v6673_v37 = vcombine.low %v4115_v22, %v4119_v23  ;;  %v4175_v22 = vld [vmem:[#allocation12 + $0x670] sm:$0xff]  ;;  %v4172_v23 = vld [vmem:[#allocation12 + $0x658] sm:$0xff] }
 0x6f2   : > { %5828 = vmatpush1.bf16.msra.mxu1 %v6619_v38  ;;  %5743 = vmatprep.subr.bf16.mxu0 %v6626_v39  ;;  %v6682_v38 = vcombine.high %v4123_v33, %v4127_v34  ;;  %v6684_v39 = vcombine.high %v4124_v35, %v4128_v36 }
 0x6f3   : > { %5829 = vmatprep.subr.bf16.mxu1 %v6628_v40  ;;  %v4131_v40 = vld [vmem:[#allocation12 + $0x510] sm:$0xff] }
 0x6f4   : > { %v6689_v14 = vcombine.low %v4131_v40, %v4135_v41 }
 0x6f5   : > { %5744 = vmatpush1.bf16.msra.mxu0 %v6625_v7  ;;  %v6690_v7 = vcombine.high %v4131_v40, %v4135_v41  ;;  %v4188_v40 = vld [vmem:[#allocation12 + $0x6d8] sm:$0xff] }
 0x6f6   : > { %5830 = vmatpush1.bf16.msra.mxu1 %v6627_v44  ;;  %5745 = vmatprep.subr.bf16.mxu0 %v6634_v45  ;;  %v6692_v44 = vcombine.high %v4132_v42, %v4136_v0  ;;  %v4139_v45 = vld [vmem:[#allocation12 + $0x550] sm:$0xff]  ;;  %v4192_v41 = vld [vmem:[#allocation12 + $0x6f8] sm:$0xff] }
 0x6f7   : > { %5831 = vmatprep.subr.bf16.mxu1 %v6636_v46  ;;  %v4143_v46 = vld [vmem:[#allocation12 + $0x570] sm:$0xff] }
 0x6f8   : > { %v6697_v58 = vcombine.low %v4139_v45, %v4143_v46 }
 0x6f9   : > { %5746 = vmatpush1.bf16.msra.mxu0 %v6633_v28  ;;  %v6698_v28 = vcombine.high %v4139_v45, %v4143_v46  ;;  %v4196_v45 = vld [vmem:[#allocation12 + $0x718] sm:$0xff] }
 0x6fa   : > { %5832 = vmatpush1.bf16.msra.mxu1 %v6635_v30  ;;  %5747 = vmatprep.subr.bf16.mxu0 %v6642_v31  ;;  %v6700_v30 = vcombine.high %v4140_v47, %v4144_v26  ;;  %v4147_v31 = vld [vmem:[#allocation12 + $0x590] sm:$0xff]  ;;  %v4200_v46 = vld [vmem:[#allocation12 + $0x738] sm:$0xff]  ;;  %v6747_v26 = vcombine.low %v4188_v40, %v4192_v41 }
 0x6fb   : > { %5833 = vmatprep.subr.bf16.mxu1 %v6644_v48  ;;  %v4151_v48 = vld [vmem:[#allocation12 + $0x5b0] sm:$0xff] }
 0x6fc   : > { %v6705_v4 = vcombine.low %v4147_v31, %v4151_v48 }
 0x6fd   : > { %5748 = vmatpush1.bf16.msra.mxu0 %v6641_v61  ;;  %v6706_v61 = vcombine.high %v4147_v31, %v4151_v48  ;;  %v4204_v31 = vld [vmem:[#allocation12 + $0x758] sm:$0xff] }
 0x6fe   : > { %5834 = vmatpush1.bf16.msra.mxu1 %v6643_v62  ;;  %5749 = vmatprep.subr.bf16.mxu0 %v6650_v63  ;;  %v6708_v62 = vcombine.high %v4148_v53, %v4152_v57  ;;  %v4155_v63 = vld [vmem:[#allocation12 + $0x5d0] sm:$0xff]  ;;  %v4208_v48 = vld [vmem:[#allocation12 + $0x778] sm:$0xff]  ;;  %v6755_v57 = vcombine.low %v4196_v45, %v4200_v46 }
 0x6ff   : > { %5835 = vmatprep.subr.bf16.mxu1 %v6652_v1  ;;  %v4159_v1 = vld [vmem:[#allocation12 + $0x5f0] sm:$0xff] }
 0x701   : > { %5750 = vmatpush1.bf16.msra.mxu0 %v6649_v49  ;;  %v6714_v49 = vcombine.high %v4155_v63, %v4159_v1 }
 0x702   : > { %5836 = vmatpush1.bf16.msra.mxu1 %v6651_v9  ;;  %5762 = vmatprep.subr.bf16.mxu0 %v6658_v10  ;;  %v6716_v9 = vcombine.high %v4156_v2, %v4160_v3  ;;  %v4163_v10 = vld [vmem:[#allocation12 + $0x610] sm:$0xff]  ;;  %v6763_v3 = vcombine.low %v4204_v31, %v4208_v48 }
 0x703   : > { %5848 = vmatprep.subr.bf16.mxu1 %v6660_v11  ;;  %v4167_v11 = vld [vmem:[#allocation12 + $0x630] sm:$0xff] }
 0x704   : > { %5752 = vmatmul.mubr.bf16.vlgmr.msra.gmra.mrb[16].mxu0 %v8554_v29  ;;  %v6722_v18 = vcombine.high %v4163_v10, %v4167_v11 }
 0x705   : > { %5838 = vmatmul.mubr.bf16.vlgmr.msra.gmra.mrb[24].mxu1 %v8554_v29  ;;  %5763 = vmatpush1.bf16.msra.mxu0 %v6657_v16  ;;  %v6675_v29 = vcombine.low %v4116_v32, %v4120_v19  ;;  %v6713_v16 = vcombine.low %v4155_v63, %v4159_v1  ;;  %v6721_v32 = vcombine.low %v4163_v10, %v4167_v11  ;;  %v4212_v63 = vld [vmem:[#allocation12 + $0x798] sm:$0xff] }
 0x706   : > { %5794 = vmatprep.mubr.bf16.mxu0 %v8574_v60  ;;  %5849 = vmatpush1.bf16.msra.mxu1 %v6659_v5  ;;  %v6724_v5 = vcombine.high %v4164_v12, %v4168_v13  ;;  %v6723_v19 = vcombine.low %v4164_v12, %v4168_v13  ;;  %v4216_v1 = vld [vmem:[#allocation12 + $0x7b8] sm:$0xff] }
 0x707   : > { %5880 = vmatprep.mubr.bf16.mxu1 %v8574_v60  ;;  %5764 = vmatprep.subr.bf16.mxu0 %v6666_v21  ;;  %v6681_v60 = vcombine.low %v4123_v33, %v4127_v34  ;;  %v4171_v21 = vld [vmem:[#allocation12 + $0x650] sm:$0xff]  ;;  %v4180_v33 = vld [vmem:[#allocation12 + $0x698] sm:$0xff]  ;;  %v6771_v13 = vcombine.low %v4212_v63, %v4216_v1 }
 0x708   : > { %5850 = vmatprep.subr.bf16.mxu1 %v6668_v8  ;;  %v4176_v8 = vld [vmem:[#allocation12 + $0x678] sm:$0xff]  ;;  %v6729_v35 = vcombine.low %v4171_v21, %v4175_v22 }
 0x709   : > { %5765 = vmatpush1.bf16.msra.mxu0 %v6665_v20  ;;  %v6730_v20 = vcombine.high %v4171_v21, %v4175_v22  ;;  %v4184_v34 = vld [vmem:[#allocation12 + $0x6b8] sm:$0xff]  ;;  %v6731_v36 = vcombine.low %v4172_v23, %v4176_v8  ;;  %v4225_v21 = vld [vmem:[#allocation13] sm:$0xff] }
 0x70a   : > { %5851 = vmatpush1.bf16.msra.mxu1 %v6667_v24  ;;  %5766 = vmatprep.subr.bf16.mxu0 %v6674_v25  ;;  %v6732_v24 = vcombine.high %v4172_v23, %v4176_v8  ;;  %v4179_v25 = vld [vmem:[#allocation12 + $0x690] sm:$0xff]  ;;  %v6739_v0 = vcombine.low %v4180_v33, %v4184_v34  ;;  %v4220_v10 = vld [vmem:[#allocation12 + $0x7d8] sm:$0xff]  ;;  %v4230_v22 = vrot.slane %v4225_v21, %v8324_v51 }
 0x70b   : > { %5852 = vmatprep.subr.bf16.mxu1 %v6676_v27  ;;  %v4183_v27 = vld [vmem:[#allocation12 + $0x6b0] sm:$0xff]  ;;  %v4224_v11 = vld [vmem:[#allocation12 + $0x7f8] sm:$0xff]  ;;  %v4238_v23 = vrot.slane %v4225_v21, %v8327_v52  ;;  %v4234_v8 = vrot.slane %v4225_v21, %v8333_v54 }
 0x70c   : > { %v6737_v42 = vcombine.low %v4179_v25, %v4183_v27 }
 0x70d   : > { %5767 = vmatpush1.bf16.msra.mxu0 %v6673_v37  ;;  %v6738_v37 = vcombine.high %v4179_v25, %v4183_v27 }
 0x70e   : > { %5853 = vmatpush1.bf16.msra.mxu1 %v6675_v29  ;;  %5768 = vmatprep.subr.bf16.mxu0 %v6682_v38  ;;  %v6740_v29 = vcombine.high %v4180_v33, %v4184_v34  ;;  %v4187_v38 = vld [vmem:[#allocation12 + $0x6d0] sm:$0xff] }
 0x70f   : > { %5854 = vmatprep.subr.bf16.mxu1 %v6684_v39  ;;  %v4191_v39 = vld [vmem:[#allocation12 + $0x6f0] sm:$0xff] }
 0x710   : > { %v6745_v47 = vcombine.low %v4187_v38, %v4191_v39 }
 0x711   : > { %5769 = vmatpush1.bf16.msra.mxu0 %v6681_v60  ;;  %v6746_v60 = vcombine.high %v4187_v38, %v4191_v39  ;;  %v4245_v38 = vsub.s32 4, %v8321_v50  ;;  %v4253_v39 = vsub.s32 6, %v8321_v50 }
 0x712   : > { %5855 = vmatpush1.bf16.msra.mxu1 %v6683_v43  ;;  %5770 = vmatprep.subr.bf16.mxu0 %v6690_v7  ;;  %v6748_v43 = vcombine.high %v4188_v40, %v4192_v41  ;;  %v4195_v7 = vld [vmem:[#allocation12 + $0x710] sm:$0xff]  ;;  %v4249_v40 = vsub.s32 5, %v8321_v50  ;;  %v4257_v41 = vsub.s32 7, %v8321_v50 }
 0x713   : > { %5856 = vmatprep.subr.bf16.mxu1 %v6692_v44  ;;  %v4199_v44 = vld [vmem:[#allocation12 + $0x730] sm:$0xff] }
 0x714   : > { %v6753_v53 = vcombine.low %v4195_v7, %v4199_v44 }
 0x715   : > { %5771 = vmatpush1.bf16.msra.mxu0 %v6689_v14  ;;  %v6754_v14 = vcombine.high %v4195_v7, %v4199_v44 }
 0x716   : > { %5857 = vmatpush1.bf16.msra.mxu1 %v6691_v15  ;;  %5772 = vmatprep.subr.bf16.mxu0 %v6698_v28  ;;  %v6756_v15 = vcombine.high %v4196_v45, %v4200_v46  ;;  %v4203_v28 = vld [vmem:[#allocation12 + $0x750] sm:$0xff] }
 0x717   : > { %5858 = vmatprep.subr.bf16.mxu1 %v6700_v30  ;;  %v4207_v30 = vld [vmem:[#allocation12 + $0x770] sm:$0xff] }
 0x718   : > { %v6761_v2 = vcombine.low %v4203_v28, %v4207_v30 }
 0x719   : > { %5773 = vmatpush1.bf16.msra.mxu0 %v6697_v58  ;;  %v6762_v58 = vcombine.high %v4203_v28, %v4207_v30 }
 0x71a   : > { %5859 = vmatpush1.bf16.msra.mxu1 %v6699_v59  ;;  %5774 = vmatprep.subr.bf16.mxu0 %v6706_v61  ;;  %v6764_v59 = vcombine.high %v4204_v31, %v4208_v48  ;;  %v4211_v61 = vld [vmem:[#allocation12 + $0x790] sm:$0xff] }
 0x71b   : > { %5860 = vmatprep.subr.bf16.mxu1 %v6708_v62  ;;  %v4215_v62 = vld [vmem:[#allocation12 + $0x7b0] sm:$0xff] }
 0x71c   : > { %v6769_v12 = vcombine.low %v4211_v61, %v4215_v62 }
 0x71d   : > { %5775 = vmatpush1.bf16.msra.mxu0 %v6705_v4  ;;  %v6770_v4 = vcombine.high %v4211_v61, %v4215_v62 }
 0x71e   : > { %5861 = vmatpush1.bf16.msra.mxu1 %v6707_v6  ;;  %5776 = vmatprep.subr.bf16.mxu0 %v6714_v49  ;;  %v6772_v6 = vcombine.high %v4212_v63, %v4216_v1  ;;  %v4219_v49 = vld [vmem:[#allocation12 + $0x7d0] sm:$0xff] }
 0x71f   : > { %5862 = vmatprep.subr.bf16.mxu1 %v6716_v9  ;;  %v4223_v9 = vld [vmem:[#allocation12 + $0x7f0] sm:$0xff] }
 0x721   : > { %5777 = vmatpush1.bf16.msra.mxu0 %v6713_v16  ;;  %v6778_v16 = vcombine.high %v4219_v49, %v4223_v9 }
 0x722   : > { %5863 = vmatpush1.bf16.msra.mxu1 %v6715_v17  ;;  %5778 = vmatprep.subr.bf16.mxu0 %v6722_v18  ;;  %v6780_v17 = vcombine.high %v4220_v10, %v4224_v11  ;;  %v6777_v18 = vcombine.low %v4219_v49, %v4223_v9 }
 0x723   : > { %5864 = vmatprep.subr.bf16.mxu1 %v6724_v5  ;;  %v6779_v5 = vcombine.low %v4220_v10, %v4224_v11 }
 0x725   : > { %5779 = vmatpush1.bf16.msra.mxu0 %v6721_v32  ;;  %v4242_v32 = vrot.slane %v4225_v21, %v8336_v55 }
 0x726   : > { %5865 = vmatpush1.bf16.msra.mxu1 %v6723_v19  ;;  %5780 = vmatprep.subr.bf16.mxu0 %v6730_v20 }
 0x727   : > { %5866 = vmatprep.subr.bf16.mxu1 %v6732_v24 }
 0x729   : > { %5781 = vmatpush1.bf16.msra.mxu0 %v6729_v35 }
 0x72a   : > { %5867 = vmatpush1.bf16.msra.mxu1 %v6731_v36  ;;  %5782 = vmatprep.subr.bf16.mxu0 %v6738_v37 }
 0x72b   : > { %5868 = vmatprep.subr.bf16.mxu1 %v6740_v29 }
 0x72d   : > { %5783 = vmatpush1.bf16.msra.mxu0 %v6737_v42  ;;  %v4246_v42 = vrot.slane %v4225_v21, %v4245_v38 }
 0x72e   : > { %5869 = vmatpush1.bf16.msra.mxu1 %v6739_v0  ;;  %5784 = vmatprep.subr.bf16.mxu0 %v6746_v60  ;;  %v4254_v0 = vrot.slane %v4225_v21, %v4253_v39  ;;  %v4250_v60 = vrot.slane %v4225_v21, %v4249_v40 }
 0x72f   : > { %5870 = vmatprep.subr.bf16.mxu1 %v6748_v43  ;;  %v4258_v43 = vrot.slane %v4225_v21, %v4257_v41 }
 0x731   : > { %5785 = vmatpush1.bf16.msra.mxu0 %v6745_v47 }
 0x732   : > { %5871 = vmatpush1.bf16.msra.mxu1 %v6747_v26  ;;  %5786 = vmatprep.subr.bf16.mxu0 %v6754_v14 }
 0x733   : > { %5872 = vmatprep.subr.bf16.mxu1 %v6756_v15 }
 0x735   : > { %5787 = vmatpush1.bf16.msra.mxu0 %v6753_v53 }
 0x736   : > { %5873 = vmatpush1.bf16.msra.mxu1 %v6755_v57  ;;  %5788 = vmatprep.subr.bf16.mxu0 %v6762_v58 }
 0x737   : > { %5874 = vmatprep.subr.bf16.mxu1 %v6764_v59 }
 0x739   : > { %5789 = vmatpush1.bf16.msra.mxu0 %v6761_v2 }
 0x73a   : > { %5875 = vmatpush1.bf16.msra.mxu1 %v6763_v3  ;;  %5790 = vmatprep.subr.bf16.mxu0 %v6770_v4 }
 0x73b   : > { %5876 = vmatprep.subr.bf16.mxu1 %v6772_v6 }
 0x73d   : > { %5791 = vmatpush1.bf16.msra.mxu0 %v6769_v12 }
 0x73e   : > { %5877 = vmatpush1.bf16.msra.mxu1 %v6771_v13  ;;  %5792 = vmatprep.subr.bf16.mxu0 %v6778_v16 }
 0x73f   : > { %5878 = vmatprep.subr.bf16.mxu1 %v6780_v17 }
 0x741   : > { %5793 = vmatpush1.bf16.msra.mxu0 %v6777_v18 }
 0x742   : > { %5879 = vmatpush1.bf16.msra.mxu1 %v6779_v5 }
 0x744   : > { %5795 = vmatmul.mubr.bf16.vlgmr.msra.gmra.mrb[16].mxu0 %v8572_v56 }
 0x745   : > { %5881 = vmatmul.mubr.bf16.vlgmr.msra.gmra.mrb[24].mxu1 %v8572_v56 }
 0x797   : > { %v5624_v19 = vpop.f32.mrb[12].mxu0  ;;  %v5710_v56 = vpop.f32.mrb[20].mxu1 }
 0x798   : > { %v6830_v20 = vadd.f32 %v5624_v19, %v4230_v22  ;;  %v6834_v24 = vadd.f32 %v5710_v56, %v4238_v23  ;;  %v5626_v51 = vpop.f32.mrb[13].mxu0  ;;  %v5712_v52 = vpop.f32.mrb[21].mxu1 }
 0x799   : > { %v6831_v54 = vadd.f32 %v5626_v51, %v4234_v8  ;;  %v6835_v55 = vadd.f32 %v5712_v52, %v4242_v32  ;;  %v5628_v25 = vpop.f32.mrb[14].mxu0  ;;  %v5714_v27 = vpop.f32.mrb[22].mxu1 }
 0x79a   : > { %5891 = vst [vmem:[%s8596_s29] sm:$0xff] %v6830_v20  ;;  %5893 = vst [vmem:[%s8596_s29 + $0x10] sm:$0xff] %v6834_v24  ;;  %v6832_v33 = vadd.f32 %v5628_v25, %v4230_v22  ;;  %v6836_v34 = vadd.f32 %v5714_v27, %v4238_v23  ;;  %v5630_v35 = vpop.f32.mrb[15].mxu0  ;;  %v5716_v36 = vpop.f32.mrb[23].mxu1 }
 0x79b   : > { %5892 = vst [vmem:[%s8596_s29 + $0x8] sm:$0xff] %v6831_v54  ;;  %5894 = vst [vmem:[%s8596_s29 + $0x18] sm:$0xff] %v6835_v55  ;;  %v6833_v37 = vadd.f32 %v5630_v35, %v4234_v8  ;;  %v6837_v29 = vadd.f32 %v5716_v36, %v4242_v32 }
 0x79c   : > { %5899 = vst [vmem:[%s8596_s29 + $0x40] sm:$0xff] %v6832_v33  ;;  %5901 = vst [vmem:[%s8596_s29 + $0x50] sm:$0xff] %v6836_v34 }
 0x79d   : > { %5900 = vst [vmem:[%s8596_s29 + $0x48] sm:$0xff] %v6833_v37  ;;  %5902 = vst [vmem:[%s8596_s29 + $0x58] sm:$0xff] %v6837_v29 }
 0x817   : > { %v5796_v7 = vpop.f32.mrb[16].mxu0 }
 0x818   : > { %v6838_v44 = vadd.f32 %v5796_v7, %v4246_v42  ;;  %v5882_v45 = vpop.f32.mrb[24].mxu1  ;;  %v5798_v46 = vpop.f32.mrb[17].mxu0 }
 0x819   : > { %v6842_v47 = vadd.f32 %v5882_v45, %v4254_v0  ;;  %v6839_v26 = vadd.f32 %v5798_v46, %v4250_v60  ;;  %v5884_v14 = vpop.f32.mrb[25].mxu1  ;;  %v5800_v15 = vpop.f32.mrb[18].mxu0 }
 0x81a   : > { %5895 = vst [vmem:[%s8596_s29 + $0x20] sm:$0xff] %v6838_v44  ;;  %v6843_v50 = vadd.f32 %v5884_v14, %v4258_v43  ;;  %v6840_v28 = vadd.f32 %v5800_v15, %v4246_v42  ;;  %v5886_v30 = vpop.f32.mrb[26].mxu1  ;;  %v5802_v31 = vpop.f32.mrb[19].mxu0 }
 0x81b   : > { %5897 = vst [vmem:[%s8596_s29 + $0x30] sm:$0xff] %v6842_v47  ;;  %5896 = vst [vmem:[%s8596_s29 + $0x28] sm:$0xff] %v6839_v26  ;;  %v6844_v48 = vadd.f32 %v5886_v30, %v4254_v0  ;;  %v6841_v53 = vadd.f32 %v5802_v31, %v4250_v60  ;;  %v5888_v57 = vpop.f32.mrb[27].mxu1 }
 0x81c   : > { %5898 = vst [vmem:[%s8596_s29 + $0x38] sm:$0xff] %v6843_v50  ;;  %5903 = vst [vmem:[%s8596_s29 + $0x60] sm:$0xff] %v6840_v28  ;;  %v6845_v58 = vadd.f32 %v5888_v57, %v4258_v43 }
 0x81d   : > { %5905 = vst [vmem:[%s8596_s29 + $0x70] sm:$0xff] %v6844_v48  ;;  %5904 = vst [vmem:[%s8596_s29 + $0x68] sm:$0xff] %v6841_v53 }
 0x81e   : > { %5906 = vst [vmem:[%s8596_s29 + $0x78] sm:$0xff] %v6845_v58 }
 0x81f PF: > { %s32_s21 = sadd.s32 1, %s7844_s21  }
 0x820   : > { %p29_p7 = scmp.ge.s32.totalorder %s32_s21, 4  }
 0x822   :  { %31 = sbr.rel (!%p29_p7) target bundleno = 13 (0xd), region = 155 }
 0x829   :  { %5948 = vsyncpa [#allocation3], 1 }
 0x82a   :  { %5950 = vsyncpa [#allocation3 + $0x1], 1 }
 0x82b   :  { %5951 = vsyncpa [#allocation5], 1 }
 0x82c   :  { %5952 = vsyncpa [#allocation8], 1 }
 0x82d   :  { %5953 = vsyncpa [#allocation11], 1 }
 0x82e   :  { %5954 = vsyncpa [#allocation14], 1 }

</bundles_post_ra>
